<compile_context>
chip_gen: v7x
topology: tpu7x:2x2x1
jax: 0.10.0
libtpu: 0.0.40
codegen_flags: <defaults>
</compile_context>

<pallas_src>
import jax
import jax.numpy as jnp
from jax.experimental import pallas as pl
from jax.experimental.pallas import tpu as pltpu

IN_DIM = 3 * 32 * 32   # 3072
H1 = 512
H2 = 256
OUT_DIM = 10
OUT_PAD = 128          # lane-dense padded width of the final layer


def _round_up(n, m):
    return ((n + m - 1) // m) * m


def _choose_bt(B, max_tile=512):
    """Batch-tile selection:
      - small batch: one tile, rounded to 16 (bf16 sublane packing).
      - 257..1023: 256-row tiles (MXU-row dense, >=2 grid steps for B>=512,
        which keeps both v7x TensorCores busy).
      - >=1024: 512-row tiles (amortize ~0.35us/step pipeline overhead) while
        still guaranteeing >=2 grid steps."""
    if B <= 256:
        return _round_up(B, 16)
    if B < 2 * max_tile:
        return 256
    return max_tile


def mlp_kernel(x_ref, w1_ref, b1_ref, w2_ref, b2_ref, w3_ref, b3_ref, o_ref):
    # Fused 3-layer MLP.  x arrives as f32 (no wrapper-side cast pass over HBM)
    # and is cast to bf16 here on the VPU; matmuls run bf16 on the MXU with f32
    # accumulation; bias add + ReLU stay f32.  Weights have constant index_maps
    # (DMA'd once, single-buffered) so everything stays VMEM-resident.
    x = x_ref[...].astype(jnp.bfloat16)
    h1 = jnp.dot(x, w1_ref[...], preferred_element_type=jnp.float32) + b1_ref[...]
    h1 = jnp.maximum(h1, 0.0).astype(jnp.bfloat16)
    h2 = jnp.dot(h1, w2_ref[...], preferred_element_type=jnp.float32) + b2_ref[...]
    h2 = jnp.maximum(h2, 0.0).astype(jnp.bfloat16)
    o = jnp.dot(h2, w3_ref[...], preferred_element_type=jnp.float32) + b3_ref[...]
    o_ref[...] = o.astype(o_ref.dtype)


def prepare_params(params):
    """One-time device-side prep (hoisted out of the forward path):
    bf16 weight casts + lane-dense zero-padding of the final layer to 128."""
    w1, b1, w2, b2, w3, b3 = params
    w3_p = (jnp.zeros((H2, OUT_PAD), jnp.bfloat16)
            .at[:, :OUT_DIM].set(w3.astype(jnp.bfloat16)))
    b3_p = jnp.zeros((1, OUT_PAD), jnp.float32).at[:, :OUT_DIM].set(b3)
    return (w1.astype(jnp.bfloat16), b1, w2.astype(jnp.bfloat16), b2, w3_p, b3_p)


def fully_connect_forward(x, prepared_params, *, max_batch_tile=512):
    """x: (B, 3, 32, 32) float32 (NCHW). Returns logits (B, 10) float32."""
    w1_bf, b1, w2_bf, b2, w3_p, b3_p = prepared_params
    B = x.shape[0]
    x2d = x.reshape(B, IN_DIM)  # same flattening order as torch .view(-1, 3*32*32)

    bt = _choose_bt(B, max_batch_tile)
    # Pad only to 16-row granularity (<=15 rows, negligible); ragged batch
    # tails beyond that are handled by Pallas edge blocks (no full extra HBM
    # pass over x).
    B16 = _round_up(B, 16)
    if B16 != B:
        x2d = jnp.pad(x2d, ((0, B16 - B), (0, 0)))

    grid_m = pl.cdiv(B16, bt)
    B_out = grid_m * bt  # tile-aligned output rows: allocation only, sliced below

    wb_kw = dict(pipeline_mode=pl.Buffered(1))  # constant index_map -> single buffer
    out = pl.pallas_call(
        mlp_kernel,
        out_shape=jax.ShapeDtypeStruct((B_out, OUT_PAD), jnp.float32),
        grid_spec=pltpu.PrefetchScalarGridSpec(
            num_scalar_prefetch=0,
            grid=(grid_m,),
            in_specs=[
                pl.BlockSpec((bt, IN_DIM), lambda i: (i, 0)),              # x tile (f32)
                pl.BlockSpec((IN_DIM, H1), lambda i: (0, 0), **wb_kw),     # w1 (bf16)
                pl.BlockSpec((1, H1), lambda i: (0, 0), **wb_kw),          # b1 (f32)
                pl.BlockSpec((H1, H2), lambda i: (0, 0), **wb_kw),         # w2 (bf16)
                pl.BlockSpec((1, H2), lambda i: (0, 0), **wb_kw),          # b2 (f32)
                pl.BlockSpec((H2, OUT_PAD), lambda i: (0, 0), **wb_kw),    # w3 padded
                pl.BlockSpec((1, OUT_PAD), lambda i: (0, 0), **wb_kw),     # b3 padded
            ],
            out_specs=pl.BlockSpec((bt, OUT_PAD), lambda i: (i, 0)),
        ),
        compiler_params=pltpu.CompilerParams(
            dimension_semantics=("parallel",),
            vmem_limit_bytes=48 << 20,  # bt=512 working set ~17 MiB; fits v7x 64 MiB
        ),
    )(x2d, w1_bf, b1, w2_bf, b2, w3_p, b3_p)
    return out[:B, :OUT_DIM]


def init_params(key):
    """Deterministic init mimicking nn.Linear default (uniform +/- 1/sqrt(fan_in)).
    Weights stored as (in_features, out_features), f32."""
    ks = jax.random.split(key, 6)

    def linear(kw, kb, fan_in, fan_out):
        bound = 1.0 / jnp.sqrt(fan_in)
        w = jax.random.uniform(kw, (fan_in, fan_out), jnp.float32, -bound, bound)
        b = jax.random.uniform(kb, (1, fan_out), jnp.float32, -bound, bound)
        return w, b

    w1, b1 = linear(ks[0], ks[1], IN_DIM, H1)
    w2, b2 = linear(ks[2], ks[3], H1, H2)
    w3, b3 = linear(ks[4], ks[5], H2, OUT_DIM)
    return (w1, b1, w2, b2, w3, b3)


def reference_forward(x, params, *, bf16_inputs=True):
    """Pure-JAX reference.  With bf16_inputs=True it applies the same bf16
    operand casts (f32 accumulation) as the kernel; with False it is full f32."""
    w1, b1, w2, b2, w3, b3 = params
    cast = (lambda a: a.astype(jnp.bfloat16)) if bf16_inputs else (lambda a: a)
    x2d = x.reshape(x.shape[0], IN_DIM)
    h1 = jnp.maximum(
        jnp.dot(cast(x2d), cast(w1), preferred_element_type=jnp.float32) + b1, 0.0)
    h2 = jnp.maximum(
        jnp.dot(cast(h1), cast(w2), preferred_element_type=jnp.float32) + b2, 0.0)
    return jnp.dot(cast(h2), cast(w3), preferred_element_type=jnp.float32) + b3


if __name__ == "__main__":
    key = jax.random.PRNGKey(0)
    k_x, k_p = jax.random.split(key)

    B = 8  # small demo batch; production batches get 256/512-row tiles
    x = jax.random.normal(k_x, (B, 3, 32, 32), dtype=jnp.float32)  # NCHW like PyTorch
    params = init_params(k_p)
    prepared = prepare_params(params)  # one-time bf16 cast + lane padding

    out = fully_connect_forward(x, prepared)
    out = jax.block_until_ready(out)
    assert out.shape == (B, OUT_DIM)

    # Matched-precision reference (bf16 operands, f32 accumulation): tight check.
    ref_bf16 = reference_forward(x, params, bf16_inputs=True)
    assert jnp.allclose(out, ref_bf16, atol=2e-3, rtol=2e-3), "mismatch vs bf16 reference"

    # Full-f32 reference: loose check (bf16 matmul operands -> ~1e-2 rel error).
    ref_f32 = reference_forward(x, params, bf16_inputs=False)
    assert jnp.allclose(out, ref_f32, atol=5e-2, rtol=5e-2), "mismatch vs f32 reference"

    print("KERNEL_OK")
</pallas_src>

<mosaic_0001>
module attributes {stable_mosaic.version = 11 : i64} {
  func.func @mlp_kernel(%arg0: i32, %arg1: memref<16x3072xf32, #tpu.memory_space<vmem>>, %arg2: memref<3072x512xbf16, #tpu.memory_space<vmem>>, %arg3: memref<1x512xf32, #tpu.memory_space<vmem>>, %arg4: memref<512x256xbf16, #tpu.memory_space<vmem>>, %arg5: memref<1x256xf32, #tpu.memory_space<vmem>>, %arg6: memref<256x128xbf16, #tpu.memory_space<vmem>>, %arg7: memref<1x128xf32, #tpu.memory_space<vmem>>, %arg8: memref<16x128xf32, #tpu.memory_space<vmem>>) attributes {dimension_semantics = [#tpu.dimension_semantics<parallel>], iteration_bounds = array<i64: 1>, scalar_prefetch = 0 : i64, scratch_operands = 0 : i64, tpu.core_type = #tpu.core_type<tc>, window_params = [{transform_indices = @transform_0, window_bounds = array<i64: 16, 3072>}, {pipeline_mode = #tpu.pipeline_mode<synchronous>, transform_indices = @transform_1, window_bounds = array<i64: 3072, 512>}, {pipeline_mode = #tpu.pipeline_mode<synchronous>, transform_indices = @transform_2, window_bounds = array<i64: 1, 512>}, {pipeline_mode = #tpu.pipeline_mode<synchronous>, transform_indices = @transform_3, window_bounds = array<i64: 512, 256>}, {pipeline_mode = #tpu.pipeline_mode<synchronous>, transform_indices = @transform_4, window_bounds = array<i64: 1, 256>}, {pipeline_mode = #tpu.pipeline_mode<synchronous>, transform_indices = @transform_5, window_bounds = array<i64: 256, 128>}, {pipeline_mode = #tpu.pipeline_mode<synchronous>, transform_indices = @transform_6, window_bounds = array<i64: 1, 128>}, {transform_indices = @transform_7, window_bounds = array<i64: 16, 128>}]} {
    %c0 = arith.constant 0 : index
    %c0_0 = arith.constant 0 : index
    %0 = vector.load %arg1[%c0, %c0_0] : memref<16x3072xf32, #tpu.memory_space<vmem>>, vector<16x3072xf32>
    %1 = arith.truncf %0 : vector<16x3072xf32> to vector<16x3072xbf16>
    %c0_1 = arith.constant 0 : index
    %c0_2 = arith.constant 0 : index
    %2 = vector.load %arg2[%c0_1, %c0_2] : memref<3072x512xbf16, #tpu.memory_space<vmem>>, vector<3072x512xbf16>
    %cst = arith.constant dense<0.000000e+00> : vector<16x512xf32>
    %3 = tpu.matmul %1, %2, %cst {dimension_numbers = #tpu.dot_dimension_numbers<[1], [0], [0], [1], [0, 0, 1, 1], [], []>} : vector<16x3072xbf16>, vector<3072x512xbf16>, vector<16x512xf32> -> vector<16x512xf32>
    %c0_3 = arith.constant 0 : index
    %c0_4 = arith.constant 0 : index
    %4 = vector.load %arg3[%c0_3, %c0_4] : memref<1x512xf32, #tpu.memory_space<vmem>>, vector<1x512xf32>
    %5 = vector.broadcast %4 : vector<1x512xf32> to vector<16x512xf32>
    %6 = arith.addf %3, %5 : vector<16x512xf32>
    %cst_5 = arith.constant 0.000000e+00 : f32
    %7 = vector.broadcast %cst_5 : f32 to vector<16x512xf32>
    %8 = arith.maximumf %6, %7 : vector<16x512xf32>
    %9 = arith.truncf %8 : vector<16x512xf32> to vector<16x512xbf16>
    %c0_6 = arith.constant 0 : index
    %c0_7 = arith.constant 0 : index
    %10 = vector.load %arg4[%c0_6, %c0_7] : memref<512x256xbf16, #tpu.memory_space<vmem>>, vector<512x256xbf16>
    %cst_8 = arith.constant dense<0.000000e+00> : vector<16x256xf32>
    %11 = tpu.matmul %9, %10, %cst_8 {dimension_numbers = #tpu.dot_dimension_numbers<[1], [0], [0], [1], [0, 0, 1, 1], [], []>} : vector<16x512xbf16>, vector<512x256xbf16>, vector<16x256xf32> -> vector<16x256xf32>
    %c0_9 = arith.constant 0 : index
    %c0_10 = arith.constant 0 : index
    %12 = vector.load %arg5[%c0_9, %c0_10] : memref<1x256xf32, #tpu.memory_space<vmem>>, vector<1x256xf32>
    %13 = vector.broadcast %12 : vector<1x256xf32> to vector<16x256xf32>
    %14 = arith.addf %11, %13 : vector<16x256xf32>
    %cst_11 = arith.constant 0.000000e+00 : f32
    %15 = vector.broadcast %cst_11 : f32 to vector<16x256xf32>
    %16 = arith.maximumf %14, %15 : vector<16x256xf32>
    %17 = arith.truncf %16 : vector<16x256xf32> to vector<16x256xbf16>
    %c0_12 = arith.constant 0 : index
    %c0_13 = arith.constant 0 : index
    %18 = vector.load %arg6[%c0_12, %c0_13] : memref<256x128xbf16, #tpu.memory_space<vmem>>, vector<256x128xbf16>
    %cst_14 = arith.constant dense<0.000000e+00> : vector<16x128xf32>
    %19 = tpu.matmul %17, %18, %cst_14 {dimension_numbers = #tpu.dot_dimension_numbers<[1], [0], [0], [1], [0, 0, 1, 1], [], []>} : vector<16x256xbf16>, vector<256x128xbf16>, vector<16x128xf32> -> vector<16x128xf32>
    %c0_15 = arith.constant 0 : index
    %c0_16 = arith.constant 0 : index
    %20 = vector.load %arg7[%c0_15, %c0_16] : memref<1x128xf32, #tpu.memory_space<vmem>>, vector<1x128xf32>
    %21 = vector.broadcast %20 : vector<1x128xf32> to vector<16x128xf32>
    %22 = arith.addf %19, %21 : vector<16x128xf32>
    %c0_17 = arith.constant 0 : index
    %c0_18 = arith.constant 0 : index
    %23 = vector.load %arg8[%c0_17, %c0_18] : memref<16x128xf32, #tpu.memory_space<vmem>>, vector<16x128xf32>
    tpu.vector_store %arg8[%c0_17, %c0_18], %22 {strides = array<i32>} : memref<16x128xf32, #tpu.memory_space<vmem>>, vector<16x128xf32>,
    return
  }
  func.func @transform_0(%arg0: i32) -> (i32, i32) {
    %c0_i32 = arith.constant 0 : i32
    %c0_i32_0 = arith.constant 0 : i32
    return %arg0, %c0_i32 : i32, i32
  }
  func.func @transform_1(%arg0: i32) -> (i32, i32) {
    %c0_i32 = arith.constant 0 : i32
    %c0_i32_0 = arith.constant 0 : i32
    %c0_i32_1 = arith.constant 0 : i32
    return %c0_i32, %c0_i32_0 : i32, i32
  }
  func.func @transform_2(%arg0: i32) -> (i32, i32) {
    %c0_i32 = arith.constant 0 : i32
    %c0_i32_0 = arith.constant 0 : i32
    %c0_i32_1 = arith.constant 0 : i32
    return %c0_i32, %c0_i32_0 : i32, i32
  }
  func.func @transform_3(%arg0: i32) -> (i32, i32) {
    %c0_i32 = arith.constant 0 : i32
    %c0_i32_0 = arith.constant 0 : i32
    %c0_i32_1 = arith.constant 0 : i32
    return %c0_i32, %c0_i32_0 : i32, i32
  }
  func.func @transform_4(%arg0: i32) -> (i32, i32) {
    %c0_i32 = arith.constant 0 : i32
    %c0_i32_0 = arith.constant 0 : i32
    %c0_i32_1 = arith.constant 0 : i32
    return %c0_i32, %c0_i32_0 : i32, i32
  }
  func.func @transform_5(%arg0: i32) -> (i32, i32) {
    %c0_i32 = arith.constant 0 : i32
    %c0_i32_0 = arith.constant 0 : i32
    %c0_i32_1 = arith.constant 0 : i32
    return %c0_i32, %c0_i32_0 : i32, i32
  }
  func.func @transform_6(%arg0: i32) -> (i32, i32) {
    %c0_i32 = arith.constant 0 : i32
    %c0_i32_0 = arith.constant 0 : i32
    %c0_i32_1 = arith.constant 0 : i32
    return %c0_i32, %c0_i32_0 : i32, i32
  }
  func.func @transform_7(%arg0: i32) -> (i32, i32) {
    %c0_i32 = arith.constant 0 : i32
    %c0_i32_0 = arith.constant 0 : i32
    return %arg0, %c0_i32 : i32, i32
  }
}

</mosaic_0001>

<bundles_post_ra>
// kernel: tpu_custom_call.1
= control target key start
LH: loop header
LB: loop body
LE: loop exit
PB: predicated region body
PF: predicated region fallthrough
CT: control target
= control target key end

     0   :  { %12 = vsyncpa [#allocation3], 0  ;;  %s9276_s0 = inlined_call_operand.hbm [shape: f32[16,3072], index: 0, kind: input, shape index: {}]   ;;  %s9277_s1 = inlined_call_operand.hbm [shape: bf16[3072,512], index: 1, kind: input, shape index: {}]   ;;  %s9278_s2 = inlined_call_operand.hbm [shape: f32[1,512], index: 2, kind: input, shape index: {}]   ;;  %s9279_s3 = inlined_call_operand.hbm [shape: bf16[512,256], index: 3, kind: input, shape index: {}]   ;;  %s9280_s4 = inlined_call_operand.hbm [shape: f32[1,256], index: 4, kind: input, shape index: {}]   ;;  %s9281_s5 = inlined_call_operand.hbm [shape: bf16[256,128], index: 5, kind: input, shape index: {}]   ;;  %s9282_s6 = inlined_call_operand.hbm [shape: f32[1,128], index: 6, kind: input, shape index: {}]   ;;  %s9283_s7 = inlined_call_operand.hbm [shape: f32[16,128], index: 7, kind: output, shape index: {}]  }
   0x1   :  { %13 = vsyncpa [#allocation6], 0 }
   0x2   :  { %14 = vsyncpa [#allocation9], 0 }
   0x3   :  { %15 = vsyncpa [#allocation12], 0 }
   0x4   :  { %16 = vsyncpa [#allocation4], 0  ;;  %s8990_s24 = smov [#allocation5]   ;;  %s8804_s28 = scalar_lea.hbm %s9277_s1, 98304 }
   0x5   :  { %s34_s25 = sshll.u32 %s8990_s24, 4  ;;  %p8805_p0 = scmp.ne.s32.totalorder %s9277_s1, %s8804_s28  ;;  %s35_s25 = int_to_ptr.vmem [resolvable:$true] %s34_s25 }
   0x6   :  { %p8808_p1 = scmp.lt.u32.totalorder %s8804_s28, %s9277_s1 }
   0x8   :  { %p8810_p2 = pnand %p8808_p1, %p8805_p0 }
   0xa   :  { %8813 = shalt.err (!%p8810_p2)
}
   0xb   :  { %s8814_s10 = scalar_lea.vmem %s35_s25, 98304  ;;  %p8819_p4 = scmp.lt.s32.totalorder %s35_s25, %s35_s25 }
   0xc   :  { %p8815_p3 = scmp.ne.s32.totalorder %s35_s25, %s8814_s10  ;;  %p8820_p5 = scmp.lt.s32.totalorder %s8814_s10, %s8814_s10 }
   0xe   :  { %p8821_p6 = por %p8820_p5, %p8819_p4 }
  0x10   :  { %p8822_p7 = pnand %p8821_p6, %p8815_p3 }
  0x12   :  { %8825 = shalt.err (!%p8822_p7)
}
  0x13   :  { %s8991_s11 = smov 256   ;;  %s8992_s12 = smov 16  }
  0x14   :  { %40 = dma.hbm_to_vmem [thread:$0]  %s9277_s1, 98304, %s35_s25, [#allocation6], %s8991_s11, %s8991_s11, %s8992_s12  }
  0x15   :  { %s8993_s15 = smov [#allocation8]   ;;  %s8826_s19 = scalar_lea.hbm %s9279_s3, 8192 }
  0x16   :  { %s56_s16 = sshll.u32 %s8993_s15, 4  ;;  %p8827_p8 = scmp.ne.s32.totalorder %s9279_s3, %s8826_s19  ;;  %s57_s16 = int_to_ptr.vmem [resolvable:$true] %s56_s16 }
  0x17   :  { %p8830_p9 = scmp.lt.u32.totalorder %s8826_s19, %s9279_s3 }
  0x19   :  { %p8832_p10 = pnand %p8830_p9, %p8827_p8 }
  0x1b   :  { %8835 = shalt.err (!%p8832_p10)
}
  0x1c   :  { %s8836_s24 = scalar_lea.vmem %s57_s16, 8192  ;;  %p8841_p12 = scmp.lt.s32.totalorder %s57_s16, %s57_s16 }
  0x1d   :  { %p8837_p11 = scmp.ne.s32.totalorder %s57_s16, %s8836_s24  ;;  %p8842_p13 = scmp.lt.s32.totalorder %s8836_s24, %s8836_s24 }
  0x1f   :  { %p8843_p0 = por %p8842_p13, %p8841_p12 }
  0x21   :  { %p8844_p1 = pnand %p8843_p0, %p8837_p11 }
  0x23   :  { %8847 = shalt.err (!%p8844_p1)
}
  0x24   :  { %s8994_s1 = smov 128   ;;  %s8995_s25 = smov 8  }
  0x25   :  { %62 = dma.hbm_to_vmem [thread:$0]  %s9279_s3, 8192, %s57_s16, [#allocation9], %s8994_s1, %s8994_s1, %s8995_s25  }
  0x26   :  { %s8996_s28 = smov [#allocation11]   ;;  %s8848_s9 = scalar_lea.hbm %s9281_s5, 2048 }
  0x27   :  { %s78_s29 = sshll.u32 %s8996_s28, 4  ;;  %p8849_p2 = scmp.ne.s32.totalorder %s9281_s5, %s8848_s9  ;;  %s79_s29 = int_to_ptr.vmem [resolvable:$true] %s78_s29 }
  0x28   :  { %p8852_p3 = scmp.lt.u32.totalorder %s8848_s9, %s9281_s5 }
  0x2a   :  { %p8854_p4 = pnand %p8852_p3, %p8849_p2 }
  0x2c   :  { %8857 = shalt.err (!%p8854_p4)
}
  0x2d   :  { %s8858_s14 = scalar_lea.vmem %s79_s29, 2048  ;;  %p8863_p6 = scmp.lt.s32.totalorder %s79_s29, %s79_s29 }
  0x2e   :  { %p8859_p5 = scmp.ne.s32.totalorder %s79_s29, %s8858_s14  ;;  %p8864_p7 = scmp.lt.s32.totalorder %s8858_s14, %s8858_s14 }
  0x30   :  { %p8865_p8 = por %p8864_p7, %p8863_p6 }
  0x32   :  { %p8866_p9 = pnand %p8865_p8, %p8859_p5 }
  0x34   :  { %8869 = shalt.err (!%p8866_p9)
}
  0x35   :  { %s8997_s3 = smov 64   ;;  %s8998_s15 = smov 4  }
  0x36   :  { %84 = dma.hbm_to_vmem [thread:$0]  %s9281_s5, 2048, %s79_s29, [#allocation12], %s8997_s3, %s8997_s3, %s8998_s15  }
  0x37   :  { %s8999_s18 = smov [#allocation2]   ;;  %s8870_s22 = scalar_lea.hbm %s9276_s0, 6144 }
  0x38   :  { %s22_s19 = sshll.u32 %s8999_s18, 4  ;;  %p8871_p10 = scmp.ne.s32.totalorder %s9276_s0, %s8870_s22  ;;  %s23_s19 = int_to_ptr.vmem [resolvable:$true] %s22_s19 }
  0x39   :  { %p8874_p11 = scmp.lt.u32.totalorder %s8870_s22, %s9276_s0 }
  0x3b   :  { %p8876_p12 = pnand %p8874_p11, %p8871_p10 }
  0x3d   :  { %8879 = shalt.err (!%p8876_p12)
}
  0x3e   :  { %s8880_s28 = scalar_lea.vmem %s23_s19, 6144  ;;  %p8885_p0 = scmp.lt.s32.totalorder %s23_s19, %s23_s19 }
  0x3f   :  { %p8881_p13 = scmp.ne.s32.totalorder %s23_s19, %s8880_s28  ;;  %p8886_p1 = scmp.lt.s32.totalorder %s8880_s28, %s8880_s28 }
  0x41   :  { %p8887_p2 = por %p8886_p1, %p8885_p0 }
  0x43   :  { %p8888_p3 = pnand %p8887_p2, %p8881_p13 }
  0x45   :  { %8891 = shalt.err (!%p8888_p3)
}
  0x46   :  { %s9000_s5 = smov 3072   ;;  %s9001_s29 = smov 192  }
  0x47   :  { %28 = dma.hbm_to_vmem [thread:$0]  %s9276_s0, 6144, %s23_s19, [#allocation3], %s9000_s5, %s9000_s5, %s9001_s29  }
  0x48   :  { %s9002_s9 = smov [#allocation7]   ;;  %s9003_s11 = smov [#allocation10]  }
  0x49   :  { %s47_s10 = sshll.u32 %s9002_s9, 4  ;;  %s69_s12 = sshll.u32 %s9003_s11, 4  ;;  %s48_s10 = int_to_ptr.vmem [resolvable:$true] %s47_s10  ;;  %s70_s12 = int_to_ptr.vmem [resolvable:$true] %s69_s12 }
  0x4a   :  { %s8892_s3 = scalar_lea.hbm %s9278_s2, 64 }
  0x4b   :  { %p8893_p4 = scmp.ne.s32.totalorder %s9278_s2, %s8892_s3  ;;  %p8896_p5 = scmp.lt.u32.totalorder %s8892_s3, %s9278_s2 }
  0x4d   :  { %p8898_p6 = pnand %p8896_p5, %p8893_p4 }
  0x4f   :  { %8901 = shalt.err (!%p8898_p6)
}
  0x50   :  { %s8902_s0 = scalar_lea.vmem %s48_s10, 64  ;;  %p8907_p8 = scmp.lt.s32.totalorder %s48_s10, %s48_s10 }
  0x51   :  { %p8903_p7 = scmp.ne.s32.totalorder %s48_s10, %s8902_s0  ;;  %p8908_p9 = scmp.lt.s32.totalorder %s8902_s0, %s8902_s0 }
  0x53   :  { %p8909_p10 = por %p8908_p9, %p8907_p8 }
  0x55   :  { %p8910_p11 = pnand %p8909_p10, %p8903_p7 }
  0x57   :  { %8913 = shalt.err (!%p8910_p11)
}
  0x58   :  { %50 = dma.hbm_to_vmem [thread:$0]  %s9278_s2, 64, %s48_s10, [#allocation6]  }
  0x59   :  { %s8914_s23 = scalar_lea.hbm %s9280_s4, 32 }
  0x5a   :  { %p8915_p12 = scmp.ne.s32.totalorder %s9280_s4, %s8914_s23  ;;  %p8918_p13 = scmp.lt.u32.totalorder %s8914_s23, %s9280_s4 }
  0x5c   :  { %p8920_p0 = pnand %p8918_p13, %p8915_p12 }
  0x5e   :  { %8923 = shalt.err (!%p8920_p0)
}
  0x5f   :  { %s8924_s5 = scalar_lea.vmem %s70_s12, 32  ;;  %p8929_p2 = scmp.lt.s32.totalorder %s70_s12, %s70_s12 }
  0x60   :  { %p8925_p1 = scmp.ne.s32.totalorder %s70_s12, %s8924_s5  ;;  %p8930_p3 = scmp.lt.s32.totalorder %s8924_s5, %s8924_s5 }
  0x62   :  { %p8931_p4 = por %p8930_p3, %p8929_p2 }
  0x64   :  { %p8932_p5 = pnand %p8931_p4, %p8925_p1 }
  0x66   :  { %8935 = shalt.err (!%p8932_p5)
}
  0x67   :  { %72 = dma.hbm_to_vmem [thread:$0]  %s9280_s4, 32, %s70_s12, [#allocation9]  }
  0x68   :  { %s9004_s30 = smov [#allocation13]   ;;  %s8936_s11 = scalar_lea.hbm %s9282_s6, 16 }
  0x69   :  { %s91_s8 = sshll.u32 %s9004_s30, 4  ;;  %p8937_p6 = scmp.ne.s32.totalorder %s9282_s6, %s8936_s11  ;;  %s92_s8 = int_to_ptr.vmem [resolvable:$true] %s91_s8 }
  0x6a   :  { %p8940_p7 = scmp.lt.u32.totalorder %s8936_s11, %s9282_s6 }
  0x6c   :  { %p8942_p8 = pnand %p8940_p7, %p8937_p6 }
  0x6e   :  { %8945 = shalt.err (!%p8942_p8)
}
  0x6f   :  { %s8946_s16 = scalar_lea.vmem %s92_s8, 16  ;;  %s8950_s4 = scalar_lea.vmem %s92_s8, 32 }
  0x70   :  { %p8947_p9 = scmp.ne.s32.totalorder %s92_s8, %s8946_s16  ;;  %p8951_p10 = scmp.lt.s32.totalorder %s92_s8, %s92_s8 }
  0x71   :  { %p8952_p11 = scmp.lt.s32.totalorder %s8950_s4, %s8946_s16 }
  0x73   :  { %p8953_p12 = por %p8952_p11, %p8951_p10 }
  0x75   :  { %p8954_p13 = pnand %p8953_p12, %p8947_p9 }
  0x77   :  { %8957 = shalt.err (!%p8954_p13)
}
  0x78   :  { %94 = dma.hbm_to_vmem [thread:$0]  %s9282_s6, 16, %s92_s8, [#allocation12]  }
  0x79   :  { %8980 = dma.done.wait [#allocation3], 6144  }
  0x7a   :  { %8981 = vsyncadd [#allocation3], 4294961152 }
  0x7b   :  { %8982 = dma.done.wait [#allocation6], 98368  }
  0x7c   :  { %8983 = vsyncadd [#allocation6], 4294868928 }
  0x7d   :  { %8984 = dma.done.wait [#allocation9], 8224  }
  0x7e   :  { %8985 = vsyncadd [#allocation9], 4294959072 }
  0x7f   :  { %8986 = dma.done.wait [#allocation12], 2064  }
  0x80   :  { %8987 = vsyncadd [#allocation12], 4294965232  ;;  %v7540_v0 = vld [vmem:[#allocation5 + $0x4] ss:$16 sps:$4 sm:$0xff]   ;;  %v7544_v2 = vld [vmem:[#allocation5] ss:$16 sps:$4 sm:$0xff]  }
  0x81   :  { %v7542_v1 = vld [vmem:[#allocation5 + $0x204] ss:$16 sps:$4 sm:$0xff]   ;;  %4819 = vmatprep.subr.bf16.mxu1 %v7540_v0  ;;  %v7545_v3 = vld [vmem:[#allocation5 + $0x200] ss:$16 sps:$4 sm:$0xff]   ;;  %v118_v46 = vld [vmem:[#allocation2 + $0x8] sm:$0xff]  ;;  %s9005_s6 = smov [#allocation14]  }
  0x82   :  { %4862 = vmatprep.subr.bf16.mxu0 %v7542_v1  ;;  %v7546_v4 = vld [vmem:[#allocation5 + $0x24] ss:$16 sps:$4 sm:$0xff]   ;;  %4820 = vmatpush1.bf16.msra.mxu1 %v7544_v2  ;;  %v7550_v6 = vld [vmem:[#allocation5 + $0x20] ss:$16 sps:$4 sm:$0xff]   ;;  %v142_v49 = vld [vmem:[#allocation2 + $0xc8] sm:$0xff]  ;;  %s6534_s18 = sshll.u32 %s9005_s6, 4  ;;  %s6535_s18 = int_to_ptr.vmem [resolvable:$true] %s6534_s18 }
  0x83   :  { %4863 = vmatpush1.bf16.msra.mxu0 %v7545_v3  ;;  %v7548_v5 = vld [vmem:[#allocation5 + $0x224] ss:$16 sps:$4 sm:$0xff]   ;;  %4821 = vmatprep.subr.bf16.mxu1 %v7546_v4  ;;  %v7551_v7 = vld [vmem:[#allocation5 + $0x220] ss:$16 sps:$4 sm:$0xff]   ;;  %v9133_v50 = vpack.c.bf16 %v142_v49, %v118_v46  ;;  %v120_v51 = vld [vmem:[#allocation2 + $0x18] sm:$0xff]  ;;  %s8958_s0 = scalar_lea.vmem %s6535_s18, 256  ;;  %p8963_p1 = scmp.lt.s32.totalorder %s6535_s18, %s6535_s18 }
  0x84   :  { %4864 = vmatprep.subr.bf16.mxu0 %v7548_v5  ;;  %v7552_v8 = vld [vmem:[#allocation5 + $0x44] ss:$16 sps:$4 sm:$0xff]   ;;  %v7556_v10 = vld [vmem:[#allocation5 + $0x40] ss:$16 sps:$4 sm:$0xff]   ;;  %v144_v52 = vld [vmem:[#allocation2 + $0xd8] sm:$0xff]  ;;  %p8959_p0 = scmp.ne.s32.totalorder %s6535_s18, %s8958_s0  ;;  %p8964_p2 = scmp.lt.s32.totalorder %s8958_s0, %s8958_s0 }
  0x85   :  { %v7554_v9 = vld [vmem:[#allocation5 + $0x244] ss:$16 sps:$4 sm:$0xff]   ;;  %v7557_v11 = vld [vmem:[#allocation5 + $0x240] ss:$16 sps:$4 sm:$0xff]   ;;  %v9135_v55 = vpack.c.bf16 %v144_v52, %v120_v51  ;;  %4851 = vmatprep.mubr.bf16.mxu1 %v9133_v50  ;;  %v7681_v46 = vld [vmem:[#allocation5 + $0xe8] ss:$16 sps:$4 sm:$0xff]  }
  0x86   :  { %4822 = vmatpush1.bf16.msra.mxu1 %v7550_v6  ;;  %v7558_v12 = vld [vmem:[#allocation5 + $0x64] ss:$16 sps:$4 sm:$0xff]   ;;  %v7562_v14 = vld [vmem:[#allocation5 + $0x60] ss:$16 sps:$4 sm:$0xff]   ;;  %v7695_v52 = vld [vmem:[#allocation5 + $0x12c] ss:$16 sps:$4 sm:$0xff]   ;;  %p8965_p3 = por %p8964_p2, %p8963_p1 }
  0x87   :  { %4865 = vmatpush1.bf16.msra.mxu0 %v7551_v7  ;;  %4823 = vmatprep.subr.bf16.mxu1 %v7552_v8  ;;  %v7560_v13 = vld [vmem:[#allocation5 + $0x264] ss:$16 sps:$4 sm:$0xff]   ;;  %v7563_v15 = vld [vmem:[#allocation5 + $0x260] ss:$16 sps:$4 sm:$0xff]  }
  0x88   :  { %4866 = vmatprep.subr.bf16.mxu0 %v7554_v9  ;;  %v7564_v16 = vld [vmem:[#allocation5 + $0x84] ss:$16 sps:$4 sm:$0xff]   ;;  %v7568_v18 = vld [vmem:[#allocation5 + $0x80] ss:$16 sps:$4 sm:$0xff]   ;;  %4894 = vmatprep.mubr.bf16.mxu0 %v9135_v55  ;;  %p8966_p4 = pnand %p8965_p3, %p8959_p0 }
  0x89   :  { %v7566_v17 = vld [vmem:[#allocation5 + $0x284] ss:$16 sps:$4 sm:$0xff]   ;;  %v7569_v19 = vld [vmem:[#allocation5 + $0x280] ss:$16 sps:$4 sm:$0xff]  }
  0x8a   :  { %4824 = vmatpush1.bf16.msra.mxu1 %v7556_v10  ;;  %v7570_v20 = vld [vmem:[#allocation5 + $0xa4] ss:$16 sps:$4 sm:$0xff]   ;;  %v7574_v22 = vld [vmem:[#allocation5 + $0xa0] ss:$16 sps:$4 sm:$0xff]  }
  0x8b   :  { %4867 = vmatpush1.bf16.msra.mxu0 %v7557_v11  ;;  %4825 = vmatprep.subr.bf16.mxu1 %v7558_v12  ;;  %v7572_v21 = vld [vmem:[#allocation5 + $0x2a4] ss:$16 sps:$4 sm:$0xff]   ;;  %v7575_v23 = vld [vmem:[#allocation5 + $0x2a0] ss:$16 sps:$4 sm:$0xff]   ;;  %v7641_v11 = vld [vmem:[#allocation5 + $0xc] ss:$16 sps:$4 sm:$0xff]  }
  0x8c   :  { %4868 = vmatprep.subr.bf16.mxu0 %v7560_v13  ;;  %v7576_v24 = vld [vmem:[#allocation5 + $0xc4] ss:$16 sps:$4 sm:$0xff]   ;;  %v7580_v26 = vld [vmem:[#allocation5 + $0xc0] ss:$16 sps:$4 sm:$0xff]  }
  0x8d   :  { %v7578_v25 = vld [vmem:[#allocation5 + $0x2c4] ss:$16 sps:$4 sm:$0xff]   ;;  %v7581_v27 = vld [vmem:[#allocation5 + $0x2c0] ss:$16 sps:$4 sm:$0xff]  }
  0x8e   :  { %4826 = vmatpush1.bf16.msra.mxu1 %v7562_v14  ;;  %v7582_v28 = vld [vmem:[#allocation5 + $0xe4] ss:$16 sps:$4 sm:$0xff]   ;;  %v7586_v30 = vld [vmem:[#allocation5 + $0xe0] ss:$16 sps:$4 sm:$0xff]   ;;  %v7639_v14 = vld [vmem:[#allocation5 + $0x8] ss:$16 sps:$4 sm:$0xff]  }
  0x8f   :  { %4869 = vmatpush1.bf16.msra.mxu0 %v7563_v15  ;;  %4827 = vmatprep.subr.bf16.mxu1 %v7564_v16  ;;  %v7584_v29 = vld [vmem:[#allocation5 + $0x2e4] ss:$16 sps:$4 sm:$0xff]   ;;  %v7587_v31 = vld [vmem:[#allocation5 + $0x2e0] ss:$16 sps:$4 sm:$0xff]  }
  0x90   :  { %4870 = vmatprep.subr.bf16.mxu0 %v7566_v17  ;;  %v7588_v32 = vld [vmem:[#allocation5 + $0x104] ss:$16 sps:$4 sm:$0xff]   ;;  %v7592_v34 = vld [vmem:[#allocation5 + $0x100] ss:$16 sps:$4 sm:$0xff]   ;;  %v7647_v17 = vld [vmem:[#allocation5 + $0x2c] ss:$16 sps:$4 sm:$0xff]  }
  0x91   :  { %v7590_v33 = vld [vmem:[#allocation5 + $0x304] ss:$16 sps:$4 sm:$0xff]   ;;  %v7593_v35 = vld [vmem:[#allocation5 + $0x300] ss:$16 sps:$4 sm:$0xff]  }
  0x92   :  { %4828 = vmatpush1.bf16.msra.mxu1 %v7568_v18  ;;  %v7594_v36 = vld [vmem:[#allocation5 + $0x124] ss:$16 sps:$4 sm:$0xff]   ;;  %v7598_v38 = vld [vmem:[#allocation5 + $0x120] ss:$16 sps:$4 sm:$0xff]  }
  0x93   :  { %4871 = vmatpush1.bf16.msra.mxu0 %v7569_v19  ;;  %4829 = vmatprep.subr.bf16.mxu1 %v7570_v20  ;;  %v7596_v37 = vld [vmem:[#allocation5 + $0x324] ss:$16 sps:$4 sm:$0xff]   ;;  %v7599_v39 = vld [vmem:[#allocation5 + $0x320] ss:$16 sps:$4 sm:$0xff]   ;;  %v7645_v19 = vld [vmem:[#allocation5 + $0x28] ss:$16 sps:$4 sm:$0xff]  }
  0x94   :  { %4872 = vmatprep.subr.bf16.mxu0 %v7572_v21  ;;  %v7600_v40 = vld [vmem:[#allocation5 + $0x144] ss:$16 sps:$4 sm:$0xff]   ;;  %v7604_v42 = vld [vmem:[#allocation5 + $0x140] ss:$16 sps:$4 sm:$0xff]   ;;  %v7653_v21 = vld [vmem:[#allocation5 + $0x4c] ss:$16 sps:$4 sm:$0xff]  }
  0x95   :  { %v7602_v41 = vld [vmem:[#allocation5 + $0x344] ss:$16 sps:$4 sm:$0xff]   ;;  %v7605_v43 = vld [vmem:[#allocation5 + $0x340] ss:$16 sps:$4 sm:$0xff]  }
  0x96   :  { %4830 = vmatpush1.bf16.msra.mxu1 %v7574_v22  ;;  %v7606_v44 = vld [vmem:[#allocation5 + $0x164] ss:$16 sps:$4 sm:$0xff]   ;;  %v7610_v47 = vld [vmem:[#allocation5 + $0x160] ss:$16 sps:$4 sm:$0xff]  }
  0x97   :  { %4873 = vmatpush1.bf16.msra.mxu0 %v7575_v23  ;;  %4831 = vmatprep.subr.bf16.mxu1 %v7576_v24  ;;  %v7608_v45 = vld [vmem:[#allocation5 + $0x364] ss:$16 sps:$4 sm:$0xff]   ;;  %v7611_v48 = vld [vmem:[#allocation5 + $0x360] ss:$16 sps:$4 sm:$0xff]   ;;  %v7651_v23 = vld [vmem:[#allocation5 + $0x48] ss:$16 sps:$4 sm:$0xff]  }
  0x98   :  { %4874 = vmatprep.subr.bf16.mxu0 %v7578_v25  ;;  %v7612_v53 = vld [vmem:[#allocation5 + $0x184] ss:$16 sps:$4 sm:$0xff]   ;;  %v7616_v56 = vld [vmem:[#allocation5 + $0x180] ss:$16 sps:$4 sm:$0xff]   ;;  %v7659_v25 = vld [vmem:[#allocation5 + $0x6c] ss:$16 sps:$4 sm:$0xff]  }
  0x99   :  { %v7614_v54 = vld [vmem:[#allocation5 + $0x384] ss:$16 sps:$4 sm:$0xff]   ;;  %v7617_v57 = vld [vmem:[#allocation5 + $0x380] ss:$16 sps:$4 sm:$0xff]  }
  0x9a   :  { %4832 = vmatpush1.bf16.msra.mxu1 %v7580_v26  ;;  %v7618_v58 = vld [vmem:[#allocation5 + $0x1a4] ss:$16 sps:$4 sm:$0xff]   ;;  %v7622_v60 = vld [vmem:[#allocation5 + $0x1a0] ss:$16 sps:$4 sm:$0xff]  }
  0x9b   :  { %4875 = vmatpush1.bf16.msra.mxu0 %v7581_v27  ;;  %4833 = vmatprep.subr.bf16.mxu1 %v7582_v28  ;;  %v7620_v59 = vld [vmem:[#allocation5 + $0x3a4] ss:$16 sps:$4 sm:$0xff]   ;;  %v7623_v61 = vld [vmem:[#allocation5 + $0x3a0] ss:$16 sps:$4 sm:$0xff]   ;;  %v7657_v27 = vld [vmem:[#allocation5 + $0x68] ss:$16 sps:$4 sm:$0xff]  }
  0x9c   :  { %4876 = vmatprep.subr.bf16.mxu0 %v7584_v29  ;;  %v7624_v62 = vld [vmem:[#allocation5 + $0x1c4] ss:$16 sps:$4 sm:$0xff]   ;;  %v7628_v0 = vld [vmem:[#allocation5 + $0x1c0] ss:$16 sps:$4 sm:$0xff]   ;;  %v7665_v29 = vld [vmem:[#allocation5 + $0x8c] ss:$16 sps:$4 sm:$0xff]  }
  0x9d   :  { %v7626_v63 = vld [vmem:[#allocation5 + $0x3c4] ss:$16 sps:$4 sm:$0xff]   ;;  %v7629_v1 = vld [vmem:[#allocation5 + $0x3c0] ss:$16 sps:$4 sm:$0xff]  }
  0x9e   :  { %4834 = vmatpush1.bf16.msra.mxu1 %v7586_v30  ;;  %v7630_v2 = vld [vmem:[#allocation5 + $0x1e4] ss:$16 sps:$4 sm:$0xff]   ;;  %v7634_v4 = vld [vmem:[#allocation5 + $0x1e0] ss:$16 sps:$4 sm:$0xff]  }
  0x9f   :  { %4877 = vmatpush1.bf16.msra.mxu0 %v7587_v31  ;;  %4835 = vmatprep.subr.bf16.mxu1 %v7588_v32  ;;  %v7632_v3 = vld [vmem:[#allocation5 + $0x3e4] ss:$16 sps:$4 sm:$0xff]   ;;  %v7635_v5 = vld [vmem:[#allocation5 + $0x3e0] ss:$16 sps:$4 sm:$0xff]   ;;  %v7663_v31 = vld [vmem:[#allocation5 + $0x88] ss:$16 sps:$4 sm:$0xff]  }
  0xa0   :  { %4878 = vmatprep.subr.bf16.mxu0 %v7590_v33  ;;  %v117_v6 = vld [vmem:[#allocation2] sm:$0xff]  ;;  %v119_v9 = vld [vmem:[#allocation2 + $0x10] sm:$0xff]  ;;  %v7671_v33 = vld [vmem:[#allocation5 + $0xac] ss:$16 sps:$4 sm:$0xff]  }
  0xa1   :  { %v141_v7 = vld [vmem:[#allocation2 + $0xc0] sm:$0xff]  ;;  %v143_v10 = vld [vmem:[#allocation2 + $0xd0] sm:$0xff] }
  0xa2   :  { %4836 = vmatpush1.bf16.msra.mxu1 %v7592_v34  ;;  %v7638_v8 = vld [vmem:[#allocation5 + $0x404] ss:$16 sps:$4 sm:$0xff]   ;;  %v9139_v12 = vpack.c.bf16 %v141_v7, %v117_v6  ;;  %v7636_v13 = vld [vmem:[#allocation5 + $0x400] ss:$16 sps:$4 sm:$0xff]   ;;  %v9141_v15 = vpack.c.bf16 %v143_v10, %v119_v9  ;;  %v7717_v7 = vld [vmem:[#allocation5 + $0x1a8] ss:$16 sps:$4 sm:$0xff]  }
  0xa3   :  { %4879 = vmatpush1.bf16.msra.mxu0 %v7593_v35  ;;  %4837 = vmatprep.subr.bf16.mxu1 %v7594_v36  ;;  %v7644_v16 = vld [vmem:[#allocation5 + $0x424] ss:$16 sps:$4 sm:$0xff]   ;;  %v7642_v18 = vld [vmem:[#allocation5 + $0x420] ss:$16 sps:$4 sm:$0xff]   ;;  %v7669_v35 = vld [vmem:[#allocation5 + $0xa8] ss:$16 sps:$4 sm:$0xff]  }
  0xa4   :  { %4880 = vmatprep.subr.bf16.mxu0 %v7596_v37  ;;  %v7650_v20 = vld [vmem:[#allocation5 + $0x444] ss:$16 sps:$4 sm:$0xff]   ;;  %v7648_v22 = vld [vmem:[#allocation5 + $0x440] ss:$16 sps:$4 sm:$0xff]   ;;  %v7677_v37 = vld [vmem:[#allocation5 + $0xcc] ss:$16 sps:$4 sm:$0xff]  }
  0xa5   :  { %v7656_v24 = vld [vmem:[#allocation5 + $0x464] ss:$16 sps:$4 sm:$0xff]   ;;  %v7654_v26 = vld [vmem:[#allocation5 + $0x460] ss:$16 sps:$4 sm:$0xff]   ;;  %v7725_v9 = vld [vmem:[#allocation5 + $0x1cc] ss:$16 sps:$4 sm:$0xff]  }
  0xa6   :  { %4838 = vmatpush1.bf16.msra.mxu1 %v7598_v38  ;;  %v7662_v28 = vld [vmem:[#allocation5 + $0x484] ss:$16 sps:$4 sm:$0xff]   ;;  %v7660_v30 = vld [vmem:[#allocation5 + $0x480] ss:$16 sps:$4 sm:$0xff]  }
  0xa7   :  { %4881 = vmatpush1.bf16.msra.mxu0 %v7599_v39  ;;  %4839 = vmatprep.subr.bf16.mxu1 %v7600_v40  ;;  %v7668_v32 = vld [vmem:[#allocation5 + $0x4a4] ss:$16 sps:$4 sm:$0xff]   ;;  %v7666_v34 = vld [vmem:[#allocation5 + $0x4a0] ss:$16 sps:$4 sm:$0xff]   ;;  %v7675_v39 = vld [vmem:[#allocation5 + $0xc8] ss:$16 sps:$4 sm:$0xff]  }
  0xa8   :  { %4882 = vmatprep.subr.bf16.mxu0 %v7602_v41  ;;  %v7674_v36 = vld [vmem:[#allocation5 + $0x4c4] ss:$16 sps:$4 sm:$0xff]   ;;  %v7672_v38 = vld [vmem:[#allocation5 + $0x4c0] ss:$16 sps:$4 sm:$0xff]   ;;  %v122_v40 = vld [vmem:[#allocation2 + $0x28] sm:$0xff] }
  0xa9   :  { %v146_v41 = vld [vmem:[#allocation2 + $0xe8] sm:$0xff]  ;;  %v7684_v49 = vld [vmem:[#allocation5 + $0x500] ss:$16 sps:$4 sm:$0xff]   ;;  %v7692_v51 = vld [vmem:[#allocation5 + $0x524] ss:$16 sps:$4 sm:$0xff]  }
  0xaa   :  { %4840 = vmatpush1.bf16.msra.mxu1 %v7604_v42  ;;  %v7680_v42 = vld [vmem:[#allocation5 + $0x4e4] ss:$16 sps:$4 sm:$0xff]   ;;  %v7714_v6 = vld [vmem:[#allocation5 + $0x5a0] ss:$16 sps:$4 sm:$0xff]  }
  0xab   :  { %4883 = vmatpush1.bf16.msra.mxu0 %v7605_v43  ;;  %4841 = vmatprep.subr.bf16.mxu1 %v7606_v44  ;;  %v7683_v43 = vld [vmem:[#allocation5 + $0xec] ss:$16 sps:$4 sm:$0xff]   ;;  %v9146_v44 = vpack.c.bf16 %v146_v41, %v122_v40  ;;  %v7720_v10 = vld [vmem:[#allocation5 + $0x5c0] ss:$16 sps:$4 sm:$0xff]  }
  0xac   :  { %4884 = vmatprep.subr.bf16.mxu0 %v7608_v45  ;;  %v7678_v45 = vld [vmem:[#allocation5 + $0x4e0] ss:$16 sps:$4 sm:$0xff]   ;;  %v7761_v40 = vld [vmem:[#allocation5 + $0x28c] ss:$16 sps:$4 sm:$0xff]  }
  0xad   :  { %v7756_v41 = vld [vmem:[#allocation5 + $0x680] ss:$16 sps:$4 sm:$0xff]  }
  0xae   :  { %4842 = vmatpush1.bf16.msra.mxu1 %v7610_v47  ;;  %v7686_v47 = vld [vmem:[#allocation5 + $0x504] ss:$16 sps:$4 sm:$0xff]  }
  0xaf   :  { %4885 = vmatpush1.bf16.msra.mxu0 %v7611_v48  ;;  %4843 = vmatprep.subr.bf16.mxu1 %v7612_v53  ;;  %v7689_v48 = vld [vmem:[#allocation5 + $0x10c] ss:$16 sps:$4 sm:$0xff]   ;;  %v7690_v53 = vld [vmem:[#allocation5 + $0x520] ss:$16 sps:$4 sm:$0xff]  }
  0xb0   :  { %4886 = vmatprep.subr.bf16.mxu0 %v7614_v54  ;;  %v7693_v54 = vld [vmem:[#allocation5 + $0x128] ss:$16 sps:$4 sm:$0xff]  }
  0xb2   :  { %4844 = vmatpush1.bf16.msra.mxu1 %v7616_v56  ;;  %v7698_v56 = vld [vmem:[#allocation5 + $0x544] ss:$16 sps:$4 sm:$0xff]  }
  0xb3   :  { %4887 = vmatpush1.bf16.msra.mxu0 %v7617_v57  ;;  %4845 = vmatprep.subr.bf16.mxu1 %v7618_v58  ;;  %v7701_v57 = vld [vmem:[#allocation5 + $0x14c] ss:$16 sps:$4 sm:$0xff]   ;;  %v7696_v58 = vld [vmem:[#allocation5 + $0x540] ss:$16 sps:$4 sm:$0xff]  }
  0xb4   :  { %4888 = vmatprep.subr.bf16.mxu0 %v7620_v59  ;;  %v7699_v59 = vld [vmem:[#allocation5 + $0x148] ss:$16 sps:$4 sm:$0xff]  }
  0xb6   :  { %4846 = vmatpush1.bf16.msra.mxu1 %v7622_v60  ;;  %v7704_v60 = vld [vmem:[#allocation5 + $0x564] ss:$16 sps:$4 sm:$0xff]  }
  0xb7   :  { %4889 = vmatpush1.bf16.msra.mxu0 %v7623_v61  ;;  %4847 = vmatprep.subr.bf16.mxu1 %v7624_v62  ;;  %v7707_v61 = vld [vmem:[#allocation5 + $0x16c] ss:$16 sps:$4 sm:$0xff]   ;;  %v7702_v62 = vld [vmem:[#allocation5 + $0x560] ss:$16 sps:$4 sm:$0xff]  }
  0xb8   :  { %4890 = vmatprep.subr.bf16.mxu0 %v7626_v63  ;;  %v7705_v63 = vld [vmem:[#allocation5 + $0x168] ss:$16 sps:$4 sm:$0xff]  }
  0xba   :  { %4848 = vmatpush1.bf16.msra.mxu1 %v7628_v0  ;;  %v7710_v0 = vld [vmem:[#allocation5 + $0x584] ss:$16 sps:$4 sm:$0xff]  }
  0xbb   :  { %4891 = vmatpush1.bf16.msra.mxu0 %v7629_v1  ;;  %4849 = vmatprep.subr.bf16.mxu1 %v7630_v2  ;;  %v7713_v1 = vld [vmem:[#allocation5 + $0x18c] ss:$16 sps:$4 sm:$0xff]   ;;  %v7708_v2 = vld [vmem:[#allocation5 + $0x580] ss:$16 sps:$4 sm:$0xff]  }
  0xbc   :  { %4892 = vmatprep.subr.bf16.mxu0 %v7632_v3  ;;  %v7711_v3 = vld [vmem:[#allocation5 + $0x188] ss:$16 sps:$4 sm:$0xff]  }
  0xbe   :  { %4850 = vmatpush1.bf16.msra.mxu1 %v7634_v4  ;;  %v7716_v4 = vld [vmem:[#allocation5 + $0x5a4] ss:$16 sps:$4 sm:$0xff]  }
  0xbf   :  { %4893 = vmatpush1.bf16.msra.mxu0 %v7635_v5  ;;  %5335 = vmatprep.subr.bf16.mxu1 %v7641_v11  ;;  %v7719_v5 = vld [vmem:[#allocation5 + $0x1ac] ss:$16 sps:$4 sm:$0xff]   ;;  %v7723_v11 = vld [vmem:[#allocation5 + $0x1c8] ss:$16 sps:$4 sm:$0xff]  }
  0xc0   :  { %4905 = vmatprep.subr.bf16.mxu0 %v7638_v8  ;;  %v7722_v8 = vld [vmem:[#allocation5 + $0x5c4] ss:$16 sps:$4 sm:$0xff]  }
  0xc1   :  { %4852 = vmatmul.mubr.bf16.vlgmr.msra.gmra.mrb[0].mxu1 %v9139_v12 }
  0xc2   :  { %4895 = vmatmul.mubr.bf16.vlgmr.msra.gmra.mrb[0].mxu0 %v9141_v15  ;;  %5336 = vmatpush1.bf16.msra.mxu1 %v7639_v14  ;;  %v7731_v14 = vld [vmem:[#allocation5 + $0x1ec] ss:$16 sps:$4 sm:$0xff]  }
  0xc3   :  { %4906 = vmatpush1.bf16.msra.mxu0 %v7636_v13  ;;  %5337 = vmatprep.subr.bf16.mxu1 %v7647_v17  ;;  %v7728_v13 = vld [vmem:[#allocation5 + $0x5e4] ss:$16 sps:$4 sm:$0xff]   ;;  %v7729_v17 = vld [vmem:[#allocation5 + $0x1e8] ss:$16 sps:$4 sm:$0xff]  }
  0xc4   :  { %4907 = vmatprep.subr.bf16.mxu0 %v7644_v16  ;;  %5367 = vmatprep.mubr.bf16.mxu1 %v9133_v50  ;;  %v7687_v50 = vld [vmem:[#allocation5 + $0x108] ss:$16 sps:$4 sm:$0xff]   ;;  %v7726_v16 = vld [vmem:[#allocation5 + $0x5e0] ss:$16 sps:$4 sm:$0xff]  }
  0xc5   :  { %4937 = vmatprep.mubr.bf16.mxu0 %v9146_v44 }
  0xc6   :  { %5338 = vmatpush1.bf16.msra.mxu1 %v7645_v19  ;;  %v121_v19 = vld [vmem:[#allocation2 + $0x20] sm:$0xff] }
  0xc7   :  { %4908 = vmatpush1.bf16.msra.mxu0 %v7642_v18  ;;  %5339 = vmatprep.subr.bf16.mxu1 %v7653_v21  ;;  %v7734_v18 = vld [vmem:[#allocation5 + $0x604] ss:$16 sps:$4 sm:$0xff]   ;;  %v7737_v21 = vld [vmem:[#allocation5 + $0x20c] ss:$16 sps:$4 sm:$0xff]  }
  0xc8   :  { %4909 = vmatprep.subr.bf16.mxu0 %v7650_v20  ;;  %v145_v20 = vld [vmem:[#allocation2 + $0xe0] sm:$0xff] }
  0xca   :  { %5340 = vmatpush1.bf16.msra.mxu1 %v7651_v23  ;;  %v7735_v23 = vld [vmem:[#allocation5 + $0x208] ss:$16 sps:$4 sm:$0xff]  }
  0xcb   :  { %4910 = vmatpush1.bf16.msra.mxu0 %v7648_v22  ;;  %5341 = vmatprep.subr.bf16.mxu1 %v7659_v25  ;;  %v7732_v22 = vld [vmem:[#allocation5 + $0x600] ss:$16 sps:$4 sm:$0xff]   ;;  %v7740_v25 = vld [vmem:[#allocation5 + $0x624] ss:$16 sps:$4 sm:$0xff]  }
  0xcc   :  { %4911 = vmatprep.subr.bf16.mxu0 %v7656_v24  ;;  %v9149_v24 = vpack.c.bf16 %v145_v20, %v121_v19  ;;  %v7821_v19 = vld [vmem:[#allocation5 + $0x3cc] ss:$16 sps:$4 sm:$0xff]   ;;  %v7816_v20 = vld [vmem:[#allocation5 + $0x7c0] ss:$16 sps:$4 sm:$0xff]  }
  0xce   :  { %5342 = vmatpush1.bf16.msra.mxu1 %v7657_v27  ;;  %v7738_v27 = vld [vmem:[#allocation5 + $0x620] ss:$16 sps:$4 sm:$0xff]  }
  0xcf   :  { %4912 = vmatpush1.bf16.msra.mxu0 %v7654_v26  ;;  %5343 = vmatprep.subr.bf16.mxu1 %v7665_v29  ;;  %v7743_v26 = vld [vmem:[#allocation5 + $0x22c] ss:$16 sps:$4 sm:$0xff]  }
  0xd0   :  { %4913 = vmatprep.subr.bf16.mxu0 %v7662_v28  ;;  %v7741_v28 = vld [vmem:[#allocation5 + $0x228] ss:$16 sps:$4 sm:$0xff]  }
  0xd1   :  { %v124_v29 = vld [vmem:[#allocation2 + $0x38] sm:$0xff] }
  0xd2   :  { %5344 = vmatpush1.bf16.msra.mxu1 %v7663_v31  ;;  %v7746_v31 = vld [vmem:[#allocation5 + $0x644] ss:$16 sps:$4 sm:$0xff]  }
  0xd3   :  { %4914 = vmatpush1.bf16.msra.mxu0 %v7660_v30  ;;  %5345 = vmatprep.subr.bf16.mxu1 %v7671_v33  ;;  %v148_v30 = vld [vmem:[#allocation2 + $0xf8] sm:$0xff] }
  0xd4   :  { %4915 = vmatprep.subr.bf16.mxu0 %v7668_v32  ;;  %v7749_v32 = vld [vmem:[#allocation5 + $0x24c] ss:$16 sps:$4 sm:$0xff]   ;;  %v9153_v33 = vpack.c.bf16 %v148_v30, %v124_v29  ;;  %v147_v29 = vld [vmem:[#allocation2 + $0xf0] sm:$0xff] }
  0xd5   :  { %v7833_v30 = vld [vmem:[#allocation5 + $0x40c] ss:$16 sps:$4 sm:$0xff]  }
  0xd6   :  { %5346 = vmatpush1.bf16.msra.mxu1 %v7669_v35  ;;  %v7747_v35 = vld [vmem:[#allocation5 + $0x248] ss:$16 sps:$4 sm:$0xff]  }
  0xd7   :  { %4916 = vmatpush1.bf16.msra.mxu0 %v7666_v34  ;;  %5347 = vmatprep.subr.bf16.mxu1 %v7677_v37  ;;  %v7744_v34 = vld [vmem:[#allocation5 + $0x640] ss:$16 sps:$4 sm:$0xff]  }
  0xd8   :  { %4917 = vmatprep.subr.bf16.mxu0 %v7674_v36  ;;  %v7755_v36 = vld [vmem:[#allocation5 + $0x26c] ss:$16 sps:$4 sm:$0xff]   ;;  %v7750_v37 = vld [vmem:[#allocation5 + $0x660] ss:$16 sps:$4 sm:$0xff]  }
  0xda   :  { %5348 = vmatpush1.bf16.msra.mxu1 %v7675_v39  ;;  %v7758_v39 = vld [vmem:[#allocation5 + $0x684] ss:$16 sps:$4 sm:$0xff]  }
  0xdb   :  { %4918 = vmatpush1.bf16.msra.mxu0 %v7672_v38  ;;  %5349 = vmatprep.subr.bf16.mxu1 %v7683_v43  ;;  %v7753_v38 = vld [vmem:[#allocation5 + $0x268] ss:$16 sps:$4 sm:$0xff]   ;;  %v7767_v43 = vld [vmem:[#allocation5 + $0x2ac] ss:$16 sps:$4 sm:$0xff]  }
  0xdc   :  { %4919 = vmatprep.subr.bf16.mxu0 %v7680_v42  ;;  %v7764_v42 = vld [vmem:[#allocation5 + $0x6a4] ss:$16 sps:$4 sm:$0xff]  }
  0xde   :  { %5350 = vmatpush1.bf16.msra.mxu1 %v7681_v46  ;;  %v7765_v46 = vld [vmem:[#allocation5 + $0x2a8] ss:$16 sps:$4 sm:$0xff]  }
  0xdf   :  { %4920 = vmatpush1.bf16.msra.mxu0 %v7678_v45  ;;  %5351 = vmatprep.subr.bf16.mxu1 %v7689_v48  ;;  %v7762_v45 = vld [vmem:[#allocation5 + $0x6a0] ss:$16 sps:$4 sm:$0xff]   ;;  %v7773_v48 = vld [vmem:[#allocation5 + $0x2cc] ss:$16 sps:$4 sm:$0xff]  }
  0xe0   :  { %4921 = vmatprep.subr.bf16.mxu0 %v7686_v47  ;;  %v7770_v47 = vld [vmem:[#allocation5 + $0x6c4] ss:$16 sps:$4 sm:$0xff]  }
  0xe2   :  { %5352 = vmatpush1.bf16.msra.mxu1 %v7687_v50  ;;  %v7771_v50 = vld [vmem:[#allocation5 + $0x2c8] ss:$16 sps:$4 sm:$0xff]  }
  0xe3   :  { %4922 = vmatpush1.bf16.msra.mxu0 %v7684_v49  ;;  %5353 = vmatprep.subr.bf16.mxu1 %v7695_v52  ;;  %v7768_v49 = vld [vmem:[#allocation5 + $0x6c0] ss:$16 sps:$4 sm:$0xff]   ;;  %v7779_v52 = vld [vmem:[#allocation5 + $0x2ec] ss:$16 sps:$4 sm:$0xff]  }
  0xe4   :  { %4923 = vmatprep.subr.bf16.mxu0 %v7692_v51  ;;  %v7776_v51 = vld [vmem:[#allocation5 + $0x6e4] ss:$16 sps:$4 sm:$0xff]  }
  0xe6   :  { %5354 = vmatpush1.bf16.msra.mxu1 %v7693_v54  ;;  %v7777_v54 = vld [vmem:[#allocation5 + $0x2e8] ss:$16 sps:$4 sm:$0xff]  }
  0xe7   :  { %4924 = vmatpush1.bf16.msra.mxu0 %v7690_v53  ;;  %5355 = vmatprep.subr.bf16.mxu1 %v7701_v57  ;;  %v7774_v53 = vld [vmem:[#allocation5 + $0x6e0] ss:$16 sps:$4 sm:$0xff]   ;;  %v7785_v57 = vld [vmem:[#allocation5 + $0x30c] ss:$16 sps:$4 sm:$0xff]  }
  0xe8   :  { %4925 = vmatprep.subr.bf16.mxu0 %v7698_v56  ;;  %v7782_v56 = vld [vmem:[#allocation5 + $0x704] ss:$16 sps:$4 sm:$0xff]  }
  0xea   :  { %5356 = vmatpush1.bf16.msra.mxu1 %v7699_v59  ;;  %v7783_v59 = vld [vmem:[#allocation5 + $0x308] ss:$16 sps:$4 sm:$0xff]  }
  0xeb   :  { %4926 = vmatpush1.bf16.msra.mxu0 %v7696_v58  ;;  %5357 = vmatprep.subr.bf16.mxu1 %v7707_v61  ;;  %v7780_v58 = vld [vmem:[#allocation5 + $0x700] ss:$16 sps:$4 sm:$0xff]   ;;  %v7791_v61 = vld [vmem:[#allocation5 + $0x32c] ss:$16 sps:$4 sm:$0xff]  }
  0xec   :  { %4927 = vmatprep.subr.bf16.mxu0 %v7704_v60  ;;  %v7788_v60 = vld [vmem:[#allocation5 + $0x724] ss:$16 sps:$4 sm:$0xff]  }
  0xee   :  { %5358 = vmatpush1.bf16.msra.mxu1 %v7705_v63  ;;  %v7789_v63 = vld [vmem:[#allocation5 + $0x328] ss:$16 sps:$4 sm:$0xff]  }
  0xef   :  { %4928 = vmatpush1.bf16.msra.mxu0 %v7702_v62  ;;  %5359 = vmatprep.subr.bf16.mxu1 %v7713_v1  ;;  %v7786_v62 = vld [vmem:[#allocation5 + $0x720] ss:$16 sps:$4 sm:$0xff]   ;;  %v7797_v1 = vld [vmem:[#allocation5 + $0x34c] ss:$16 sps:$4 sm:$0xff]  }
  0xf0   :  { %4929 = vmatprep.subr.bf16.mxu0 %v7710_v0  ;;  %v7794_v0 = vld [vmem:[#allocation5 + $0x744] ss:$16 sps:$4 sm:$0xff]  }
  0xf2   :  { %5360 = vmatpush1.bf16.msra.mxu1 %v7711_v3  ;;  %v7795_v3 = vld [vmem:[#allocation5 + $0x348] ss:$16 sps:$4 sm:$0xff]  }
  0xf3   :  { %4930 = vmatpush1.bf16.msra.mxu0 %v7708_v2  ;;  %5361 = vmatprep.subr.bf16.mxu1 %v7719_v5  ;;  %v7792_v2 = vld [vmem:[#allocation5 + $0x740] ss:$16 sps:$4 sm:$0xff]   ;;  %v7803_v5 = vld [vmem:[#allocation5 + $0x36c] ss:$16 sps:$4 sm:$0xff]  }
  0xf4   :  { %4931 = vmatprep.subr.bf16.mxu0 %v7716_v4  ;;  %v7800_v4 = vld [vmem:[#allocation5 + $0x764] ss:$16 sps:$4 sm:$0xff]  }
  0xf6   :  { %5362 = vmatpush1.bf16.msra.mxu1 %v7717_v7  ;;  %v7801_v7 = vld [vmem:[#allocation5 + $0x368] ss:$16 sps:$4 sm:$0xff]  }
  0xf7   :  { %4932 = vmatpush1.bf16.msra.mxu0 %v7714_v6  ;;  %5363 = vmatprep.subr.bf16.mxu1 %v7725_v9  ;;  %v7798_v6 = vld [vmem:[#allocation5 + $0x760] ss:$16 sps:$4 sm:$0xff]   ;;  %v7809_v9 = vld [vmem:[#allocation5 + $0x38c] ss:$16 sps:$4 sm:$0xff]  }
  0xf8   :  { %4933 = vmatprep.subr.bf16.mxu0 %v7722_v8  ;;  %v7806_v8 = vld [vmem:[#allocation5 + $0x784] ss:$16 sps:$4 sm:$0xff]  }
  0xfa   :  { %5364 = vmatpush1.bf16.msra.mxu1 %v7723_v11  ;;  %v7807_v11 = vld [vmem:[#allocation5 + $0x388] ss:$16 sps:$4 sm:$0xff]  }
  0xfb   :  { %4934 = vmatpush1.bf16.msra.mxu0 %v7720_v10  ;;  %5365 = vmatprep.subr.bf16.mxu1 %v7731_v14  ;;  %v7804_v10 = vld [vmem:[#allocation5 + $0x780] ss:$16 sps:$4 sm:$0xff]   ;;  %v7815_v14 = vld [vmem:[#allocation5 + $0x3ac] ss:$16 sps:$4 sm:$0xff]  }
  0xfc   :  { %4935 = vmatprep.subr.bf16.mxu0 %v7728_v13  ;;  %v7812_v13 = vld [vmem:[#allocation5 + $0x7a4] ss:$16 sps:$4 sm:$0xff]  }
  0xfe   :  { %5366 = vmatpush1.bf16.msra.mxu1 %v7729_v17  ;;  %v7813_v17 = vld [vmem:[#allocation5 + $0x3a8] ss:$16 sps:$4 sm:$0xff]  }
  0xff   :  { %4936 = vmatpush1.bf16.msra.mxu0 %v7726_v16  ;;  %5378 = vmatprep.subr.bf16.mxu1 %v7737_v21  ;;  %v7810_v16 = vld [vmem:[#allocation5 + $0x7a0] ss:$16 sps:$4 sm:$0xff]   ;;  %v7819_v21 = vld [vmem:[#allocation5 + $0x3c8] ss:$16 sps:$4 sm:$0xff]  }
 0x100   :  { %4948 = vmatprep.subr.bf16.mxu0 %v7734_v18  ;;  %v7818_v18 = vld [vmem:[#allocation5 + $0x7c4] ss:$16 sps:$4 sm:$0xff]  }
 0x101   :  { %5368 = vmatmul.mubr.bf16.vlgmr.msra.gmra.mrb[4].mxu1 %v9139_v12  ;;  %v7752_v12 = vld [vmem:[#allocation5 + $0x664] ss:$16 sps:$4 sm:$0xff]  }
 0x102   :  { %4938 = vmatmul.mubr.bf16.vlgmr.msra.gmra.mrb[0].mxu0 %v9149_v24  ;;  %5379 = vmatpush1.bf16.msra.mxu1 %v7735_v23  ;;  %v7827_v23 = vld [vmem:[#allocation5 + $0x3ec] ss:$16 sps:$4 sm:$0xff]  }
 0x103   :  { %4949 = vmatpush1.bf16.msra.mxu0 %v7732_v22  ;;  %5380 = vmatprep.subr.bf16.mxu1 %v7743_v26  ;;  %v7824_v22 = vld [vmem:[#allocation5 + $0x7e4] ss:$16 sps:$4 sm:$0xff]   ;;  %v7825_v26 = vld [vmem:[#allocation5 + $0x3e8] ss:$16 sps:$4 sm:$0xff]  }
 0x104   :  { %4950 = vmatprep.subr.bf16.mxu0 %v7740_v25  ;;  %5410 = vmatprep.mubr.bf16.mxu1 %v9135_v55  ;;  %v7759_v55 = vld [vmem:[#allocation5 + $0x288] ss:$16 sps:$4 sm:$0xff]   ;;  %v7822_v25 = vld [vmem:[#allocation5 + $0x7e0] ss:$16 sps:$4 sm:$0xff]  }
 0x105   :  { %4980 = vmatprep.mubr.bf16.mxu0 %v9153_v33 }
 0x106   :  { %5381 = vmatpush1.bf16.msra.mxu1 %v7741_v28  ;;  %v123_v28 = vld [vmem:[#allocation2 + $0x30] sm:$0xff] }
 0x107   :  { %4951 = vmatpush1.bf16.msra.mxu0 %v7738_v27  ;;  %5382 = vmatprep.subr.bf16.mxu1 %v7749_v32  ;;  %v7830_v27 = vld [vmem:[#allocation5 + $0x804] ss:$16 sps:$4 sm:$0xff]   ;;  %v126_v32 = vld [vmem:[#allocation2 + $0x48] sm:$0xff] }
 0x108   :  { %4952 = vmatprep.subr.bf16.mxu0 %v7746_v31  ;;  %v7828_v31 = vld [vmem:[#allocation5 + $0x800] ss:$16 sps:$4 sm:$0xff]  }
 0x10a   :  { %5383 = vmatpush1.bf16.msra.mxu1 %v7747_v35  ;;  %v150_v35 = vld [vmem:[#allocation2 + $0x108] sm:$0xff] }
 0x10b   :  { %4953 = vmatpush1.bf16.msra.mxu0 %v7744_v34  ;;  %5384 = vmatprep.subr.bf16.mxu1 %v7755_v36  ;;  %v9157_v34 = vpack.c.bf16 %v147_v29, %v123_v28  ;;  %v7836_v36 = vld [vmem:[#allocation5 + $0x824] ss:$16 sps:$4 sm:$0xff]   ;;  %v7917_v28 = vld [vmem:[#allocation5 + $0x5cc] ss:$16 sps:$4 sm:$0xff]   ;;  %v7912_v29 = vld [vmem:[#allocation5 + $0x9c0] ss:$16 sps:$4 sm:$0xff]  }
 0x10c   :  { %4954 = vmatprep.subr.bf16.mxu0 %v7752_v12  ;;  %v7831_v12 = vld [vmem:[#allocation5 + $0x408] ss:$16 sps:$4 sm:$0xff]  }
 0x10e   :  { %5385 = vmatpush1.bf16.msra.mxu1 %v7753_v38  ;;  %v9159_v38 = vpack.c.bf16 %v150_v35, %v126_v32  ;;  %v7923_v32 = vld [vmem:[#allocation5 + $0x5ec] ss:$16 sps:$4 sm:$0xff]   ;;  %v7918_v35 = vld [vmem:[#allocation5 + $0x9e0] ss:$16 sps:$4 sm:$0xff]  }
 0x10f   :  { %4955 = vmatpush1.bf16.msra.mxu0 %v7750_v37  ;;  %5386 = vmatprep.subr.bf16.mxu1 %v7761_v40  ;;  %v7839_v37 = vld [vmem:[#allocation5 + $0x42c] ss:$16 sps:$4 sm:$0xff]   ;;  %v7837_v40 = vld [vmem:[#allocation5 + $0x428] ss:$16 sps:$4 sm:$0xff]  }
 0x110   :  { %4956 = vmatprep.subr.bf16.mxu0 %v7758_v39  ;;  %v7834_v39 = vld [vmem:[#allocation5 + $0x820] ss:$16 sps:$4 sm:$0xff]  }
 0x112   :  { %5387 = vmatpush1.bf16.msra.mxu1 %v7759_v55  ;;  %v7845_v55 = vld [vmem:[#allocation5 + $0x44c] ss:$16 sps:$4 sm:$0xff]  }
 0x113   :  { %4957 = vmatpush1.bf16.msra.mxu0 %v7756_v41  ;;  %5388 = vmatprep.subr.bf16.mxu1 %v7767_v43  ;;  %v7842_v41 = vld [vmem:[#allocation5 + $0x844] ss:$16 sps:$4 sm:$0xff]   ;;  %v7843_v43 = vld [vmem:[#allocation5 + $0x448] ss:$16 sps:$4 sm:$0xff]  }
 0x114   :  { %4958 = vmatprep.subr.bf16.mxu0 %v7764_v42  ;;  %v7840_v42 = vld [vmem:[#allocation5 + $0x840] ss:$16 sps:$4 sm:$0xff]  }
 0x116   :  { %5389 = vmatpush1.bf16.msra.mxu1 %v7765_v46  ;;  %v7846_v46 = vld [vmem:[#allocation5 + $0x860] ss:$16 sps:$4 sm:$0xff]  }
 0x117   :  { %4959 = vmatpush1.bf16.msra.mxu0 %v7762_v45  ;;  %5390 = vmatprep.subr.bf16.mxu1 %v7773_v48  ;;  %v7848_v45 = vld [vmem:[#allocation5 + $0x864] ss:$16 sps:$4 sm:$0xff]  }
 0x118   :  { %4960 = vmatprep.subr.bf16.mxu0 %v7770_v47  ;;  %v7849_v47 = vld [vmem:[#allocation5 + $0x468] ss:$16 sps:$4 sm:$0xff]   ;;  %v7854_v48 = vld [vmem:[#allocation5 + $0x884] ss:$16 sps:$4 sm:$0xff]  }
 0x11a   :  { %5391 = vmatpush1.bf16.msra.mxu1 %v7771_v50  ;;  %v7852_v50 = vld [vmem:[#allocation5 + $0x880] ss:$16 sps:$4 sm:$0xff]  }
 0x11b   :  { %4961 = vmatpush1.bf16.msra.mxu0 %v7768_v49  ;;  %5392 = vmatprep.subr.bf16.mxu1 %v7779_v52  ;;  %v7857_v49 = vld [vmem:[#allocation5 + $0x48c] ss:$16 sps:$4 sm:$0xff]  }
 0x11c   :  { %4962 = vmatprep.subr.bf16.mxu0 %v7776_v51  ;;  %v7860_v51 = vld [vmem:[#allocation5 + $0x8a4] ss:$16 sps:$4 sm:$0xff]   ;;  %v7863_v52 = vld [vmem:[#allocation5 + $0x4ac] ss:$16 sps:$4 sm:$0xff]  }
 0x11e   :  { %5393 = vmatpush1.bf16.msra.mxu1 %v7777_v54  ;;  %v7861_v54 = vld [vmem:[#allocation5 + $0x4a8] ss:$16 sps:$4 sm:$0xff]  }
 0x11f   :  { %4963 = vmatpush1.bf16.msra.mxu0 %v7774_v53  ;;  %5394 = vmatprep.subr.bf16.mxu1 %v7785_v57  ;;  %v7858_v53 = vld [vmem:[#allocation5 + $0x8a0] ss:$16 sps:$4 sm:$0xff]   ;;  %v7869_v57 = vld [vmem:[#allocation5 + $0x4cc] ss:$16 sps:$4 sm:$0xff]  }
 0x120   :  { %4964 = vmatprep.subr.bf16.mxu0 %v7782_v56  ;;  %v7866_v56 = vld [vmem:[#allocation5 + $0x8c4] ss:$16 sps:$4 sm:$0xff]  }
 0x122   :  { %5395 = vmatpush1.bf16.msra.mxu1 %v7783_v59  ;;  %v7867_v59 = vld [vmem:[#allocation5 + $0x4c8] ss:$16 sps:$4 sm:$0xff]  }
 0x123   :  { %4965 = vmatpush1.bf16.msra.mxu0 %v7780_v58  ;;  %5396 = vmatprep.subr.bf16.mxu1 %v7791_v61  ;;  %v7864_v58 = vld [vmem:[#allocation5 + $0x8c0] ss:$16 sps:$4 sm:$0xff]   ;;  %v7875_v61 = vld [vmem:[#allocation5 + $0x4ec] ss:$16 sps:$4 sm:$0xff]  }
 0x124   :  { %4966 = vmatprep.subr.bf16.mxu0 %v7788_v60  ;;  %v7872_v60 = vld [vmem:[#allocation5 + $0x8e4] ss:$16 sps:$4 sm:$0xff]  }
 0x126   :  { %5397 = vmatpush1.bf16.msra.mxu1 %v7789_v63  ;;  %v7873_v63 = vld [vmem:[#allocation5 + $0x4e8] ss:$16 sps:$4 sm:$0xff]  }
 0x127   :  { %4967 = vmatpush1.bf16.msra.mxu0 %v7786_v62  ;;  %5398 = vmatprep.subr.bf16.mxu1 %v7797_v1  ;;  %v7870_v62 = vld [vmem:[#allocation5 + $0x8e0] ss:$16 sps:$4 sm:$0xff]   ;;  %v7881_v1 = vld [vmem:[#allocation5 + $0x50c] ss:$16 sps:$4 sm:$0xff]  }
 0x128   :  { %4968 = vmatprep.subr.bf16.mxu0 %v7794_v0  ;;  %v7878_v0 = vld [vmem:[#allocation5 + $0x904] ss:$16 sps:$4 sm:$0xff]  }
 0x12a   :  { %5399 = vmatpush1.bf16.msra.mxu1 %v7795_v3  ;;  %v7879_v3 = vld [vmem:[#allocation5 + $0x508] ss:$16 sps:$4 sm:$0xff]  }
 0x12b   :  { %4969 = vmatpush1.bf16.msra.mxu0 %v7792_v2  ;;  %5400 = vmatprep.subr.bf16.mxu1 %v7803_v5  ;;  %v7876_v2 = vld [vmem:[#allocation5 + $0x900] ss:$16 sps:$4 sm:$0xff]   ;;  %v7887_v5 = vld [vmem:[#allocation5 + $0x52c] ss:$16 sps:$4 sm:$0xff]  }
 0x12c   :  { %4970 = vmatprep.subr.bf16.mxu0 %v7800_v4  ;;  %v7884_v4 = vld [vmem:[#allocation5 + $0x924] ss:$16 sps:$4 sm:$0xff]  }
 0x12e   :  { %5401 = vmatpush1.bf16.msra.mxu1 %v7801_v7  ;;  %v7885_v7 = vld [vmem:[#allocation5 + $0x528] ss:$16 sps:$4 sm:$0xff]  }
 0x12f   :  { %4971 = vmatpush1.bf16.msra.mxu0 %v7798_v6  ;;  %5402 = vmatprep.subr.bf16.mxu1 %v7809_v9  ;;  %v7882_v6 = vld [vmem:[#allocation5 + $0x920] ss:$16 sps:$4 sm:$0xff]   ;;  %v7893_v9 = vld [vmem:[#allocation5 + $0x54c] ss:$16 sps:$4 sm:$0xff]  }
 0x130   :  { %4972 = vmatprep.subr.bf16.mxu0 %v7806_v8  ;;  %v7890_v8 = vld [vmem:[#allocation5 + $0x944] ss:$16 sps:$4 sm:$0xff]  }
 0x132   :  { %5403 = vmatpush1.bf16.msra.mxu1 %v7807_v11  ;;  %v7891_v11 = vld [vmem:[#allocation5 + $0x548] ss:$16 sps:$4 sm:$0xff]  }
 0x133   :  { %4973 = vmatpush1.bf16.msra.mxu0 %v7804_v10  ;;  %5404 = vmatprep.subr.bf16.mxu1 %v7815_v14  ;;  %v7888_v10 = vld [vmem:[#allocation5 + $0x940] ss:$16 sps:$4 sm:$0xff]   ;;  %v7899_v14 = vld [vmem:[#allocation5 + $0x56c] ss:$16 sps:$4 sm:$0xff]  }
 0x134   :  { %4974 = vmatprep.subr.bf16.mxu0 %v7812_v13  ;;  %v7896_v13 = vld [vmem:[#allocation5 + $0x964] ss:$16 sps:$4 sm:$0xff]  }
 0x136   :  { %5405 = vmatpush1.bf16.msra.mxu1 %v7813_v17  ;;  %v7897_v17 = vld [vmem:[#allocation5 + $0x568] ss:$16 sps:$4 sm:$0xff]  }
 0x137   :  { %4975 = vmatpush1.bf16.msra.mxu0 %v7810_v16  ;;  %5406 = vmatprep.subr.bf16.mxu1 %v7821_v19  ;;  %v7894_v16 = vld [vmem:[#allocation5 + $0x960] ss:$16 sps:$4 sm:$0xff]   ;;  %v7905_v19 = vld [vmem:[#allocation5 + $0x58c] ss:$16 sps:$4 sm:$0xff]  }
 0x138   :  { %4976 = vmatprep.subr.bf16.mxu0 %v7818_v18  ;;  %v7902_v18 = vld [vmem:[#allocation5 + $0x984] ss:$16 sps:$4 sm:$0xff]  }
 0x13a   :  { %5407 = vmatpush1.bf16.msra.mxu1 %v7819_v21  ;;  %v7903_v21 = vld [vmem:[#allocation5 + $0x588] ss:$16 sps:$4 sm:$0xff]  }
 0x13b   :  { %4977 = vmatpush1.bf16.msra.mxu0 %v7816_v20  ;;  %5408 = vmatprep.subr.bf16.mxu1 %v7827_v23  ;;  %v7900_v20 = vld [vmem:[#allocation5 + $0x980] ss:$16 sps:$4 sm:$0xff]   ;;  %v7911_v23 = vld [vmem:[#allocation5 + $0x5ac] ss:$16 sps:$4 sm:$0xff]  }
 0x13c   :  { %4978 = vmatprep.subr.bf16.mxu0 %v7824_v22  ;;  %v7908_v22 = vld [vmem:[#allocation5 + $0x9a4] ss:$16 sps:$4 sm:$0xff]  }
 0x13e   :  { %5409 = vmatpush1.bf16.msra.mxu1 %v7825_v26  ;;  %v7909_v26 = vld [vmem:[#allocation5 + $0x5a8] ss:$16 sps:$4 sm:$0xff]  }
 0x13f   :  { %4979 = vmatpush1.bf16.msra.mxu0 %v7822_v25  ;;  %5421 = vmatprep.subr.bf16.mxu1 %v7833_v30  ;;  %v7906_v25 = vld [vmem:[#allocation5 + $0x9a0] ss:$16 sps:$4 sm:$0xff]   ;;  %v7915_v30 = vld [vmem:[#allocation5 + $0x5c8] ss:$16 sps:$4 sm:$0xff]  }
 0x140   :  { %4991 = vmatprep.subr.bf16.mxu0 %v7830_v27  ;;  %v7914_v27 = vld [vmem:[#allocation5 + $0x9c4] ss:$16 sps:$4 sm:$0xff]  }
 0x141   :  { %5411 = vmatmul.mubr.bf16.vlgmr.msra.gmra.mrb[4].mxu1 %v9141_v15  ;;  %v7851_v15 = vld [vmem:[#allocation5 + $0x46c] ss:$16 sps:$4 sm:$0xff]  }
 0x142   :  { %4981 = vmatmul.mubr.bf16.vlgmr.msra.gmra.mrb[0].mxu0 %v9157_v34  ;;  %5422 = vmatpush1.bf16.msra.mxu1 %v7831_v12  ;;  %v7921_v12 = vld [vmem:[#allocation5 + $0x5e8] ss:$16 sps:$4 sm:$0xff]  }
 0x143   :  { %4992 = vmatpush1.bf16.msra.mxu0 %v7828_v31  ;;  %5423 = vmatprep.subr.bf16.mxu1 %v7839_v37  ;;  %v7920_v31 = vld [vmem:[#allocation5 + $0x9e4] ss:$16 sps:$4 sm:$0xff]  }
 0x144   :  { %4993 = vmatprep.subr.bf16.mxu0 %v7836_v36  ;;  %5023 = vmatprep.mubr.bf16.mxu0 %v9159_v38  ;;  %v125_v36 = vld [vmem:[#allocation2 + $0x40] sm:$0xff] }
 0x145   :  { %5453 = vmatprep.mubr.bf16.mxu1 %v9146_v44  ;;  %v7855_v44 = vld [vmem:[#allocation5 + $0x488] ss:$16 sps:$4 sm:$0xff]   ;;  %v149_v37 = vld [vmem:[#allocation2 + $0x100] sm:$0xff] }
 0x146   :  { %5424 = vmatpush1.bf16.msra.mxu1 %v7837_v40  ;;  %v7929_v40 = vld [vmem:[#allocation5 + $0x60c] ss:$16 sps:$4 sm:$0xff]  }
 0x147   :  { %4994 = vmatpush1.bf16.msra.mxu0 %v7834_v39  ;;  %5425 = vmatprep.subr.bf16.mxu1 %v7845_v55  ;;  %v7926_v39 = vld [vmem:[#allocation5 + $0xa04] ss:$16 sps:$4 sm:$0xff]   ;;  %v128_v55 = vld [vmem:[#allocation2 + $0x58] sm:$0xff] }
 0x148   :  { %4995 = vmatprep.subr.bf16.mxu0 %v7842_v41  ;;  %v7924_v41 = vld [vmem:[#allocation5 + $0xa00] ss:$16 sps:$4 sm:$0xff]  }
 0x14a   :  { %5426 = vmatpush1.bf16.msra.mxu1 %v7843_v43  ;;  %v152_v43 = vld [vmem:[#allocation2 + $0x118] sm:$0xff] }
 0x14b   :  { %4996 = vmatpush1.bf16.msra.mxu0 %v7840_v42  ;;  %5427 = vmatprep.subr.bf16.mxu1 %v7851_v15  ;;  %v9165_v42 = vpack.c.bf16 %v149_v37, %v125_v36  ;;  %v7932_v15 = vld [vmem:[#allocation5 + $0xa24] ss:$16 sps:$4 sm:$0xff]   ;;  %v8007_v37 = vld [vmem:[#allocation5 + $0x7ac] ss:$16 sps:$4 sm:$0xff]  }
 0x14c   :  { %4997 = vmatprep.subr.bf16.mxu0 %v7848_v45  ;;  %v7927_v45 = vld [vmem:[#allocation5 + $0x608] ss:$16 sps:$4 sm:$0xff]   ;;  %v8004_v36 = vld [vmem:[#allocation5 + $0xba4] ss:$16 sps:$4 sm:$0xff]  }
 0x14e   :  { %5428 = vmatpush1.bf16.msra.mxu1 %v7849_v47  ;;  %v9167_v47 = vpack.c.bf16 %v152_v43, %v128_v55  ;;  %v8013_v55 = vld [vmem:[#allocation5 + $0x7cc] ss:$16 sps:$4 sm:$0xff]   ;;  %v8008_v43 = vld [vmem:[#allocation5 + $0xbc0] ss:$16 sps:$4 sm:$0xff]  }
 0x14f   :  { %4998 = vmatpush1.bf16.msra.mxu0 %v7846_v46  ;;  %5429 = vmatprep.subr.bf16.mxu1 %v7857_v49  ;;  %v7935_v46 = vld [vmem:[#allocation5 + $0x62c] ss:$16 sps:$4 sm:$0xff]   ;;  %v7933_v49 = vld [vmem:[#allocation5 + $0x628] ss:$16 sps:$4 sm:$0xff]  }
 0x150   :  { %4999 = vmatprep.subr.bf16.mxu0 %v7854_v48  ;;  %v7930_v48 = vld [vmem:[#allocation5 + $0xa20] ss:$16 sps:$4 sm:$0xff]  }
 0x152   :  { %5430 = vmatpush1.bf16.msra.mxu1 %v7855_v44  ;;  %v7941_v44 = vld [vmem:[#allocation5 + $0x64c] ss:$16 sps:$4 sm:$0xff]  }
 0x153   :  { %5000 = vmatpush1.bf16.msra.mxu0 %v7852_v50  ;;  %5431 = vmatprep.subr.bf16.mxu1 %v7863_v52  ;;  %v7938_v50 = vld [vmem:[#allocation5 + $0xa44] ss:$16 sps:$4 sm:$0xff]   ;;  %v7939_v52 = vld [vmem:[#allocation5 + $0x648] ss:$16 sps:$4 sm:$0xff]  }
 0x154   :  { %5001 = vmatprep.subr.bf16.mxu0 %v7860_v51  ;;  %v7936_v51 = vld [vmem:[#allocation5 + $0xa40] ss:$16 sps:$4 sm:$0xff]  }
 0x156   :  { %5432 = vmatpush1.bf16.msra.mxu1 %v7861_v54  ;;  %v7942_v54 = vld [vmem:[#allocation5 + $0xa60] ss:$16 sps:$4 sm:$0xff]  }
 0x157   :  { %5002 = vmatpush1.bf16.msra.mxu0 %v7858_v53  ;;  %5433 = vmatprep.subr.bf16.mxu1 %v7869_v57  ;;  %v7944_v53 = vld [vmem:[#allocation5 + $0xa64] ss:$16 sps:$4 sm:$0xff]  }
 0x158   :  { %5003 = vmatprep.subr.bf16.mxu0 %v7866_v56  ;;  %v7945_v56 = vld [vmem:[#allocation5 + $0x668] ss:$16 sps:$4 sm:$0xff]   ;;  %v7950_v57 = vld [vmem:[#allocation5 + $0xa84] ss:$16 sps:$4 sm:$0xff]  }
 0x15a   :  { %5434 = vmatpush1.bf16.msra.mxu1 %v7867_v59  ;;  %v7948_v59 = vld [vmem:[#allocation5 + $0xa80] ss:$16 sps:$4 sm:$0xff]  }
 0x15b   :  { %5004 = vmatpush1.bf16.msra.mxu0 %v7864_v58  ;;  %5435 = vmatprep.subr.bf16.mxu1 %v7875_v61  ;;  %v7953_v58 = vld [vmem:[#allocation5 + $0x68c] ss:$16 sps:$4 sm:$0xff]  }
 0x15c   :  { %5005 = vmatprep.subr.bf16.mxu0 %v7872_v60  ;;  %v7956_v60 = vld [vmem:[#allocation5 + $0xaa4] ss:$16 sps:$4 sm:$0xff]   ;;  %v7959_v61 = vld [vmem:[#allocation5 + $0x6ac] ss:$16 sps:$4 sm:$0xff]  }
 0x15e   :  { %5436 = vmatpush1.bf16.msra.mxu1 %v7873_v63  ;;  %v7957_v63 = vld [vmem:[#allocation5 + $0x6a8] ss:$16 sps:$4 sm:$0xff]  }
 0x15f   :  { %5006 = vmatpush1.bf16.msra.mxu0 %v7870_v62  ;;  %5437 = vmatprep.subr.bf16.mxu1 %v7881_v1  ;;  %v7954_v62 = vld [vmem:[#allocation5 + $0xaa0] ss:$16 sps:$4 sm:$0xff]   ;;  %v7965_v1 = vld [vmem:[#allocation5 + $0x6cc] ss:$16 sps:$4 sm:$0xff]  }
 0x160   :  { %5007 = vmatprep.subr.bf16.mxu0 %v7878_v0  ;;  %v7962_v0 = vld [vmem:[#allocation5 + $0xac4] ss:$16 sps:$4 sm:$0xff]  }
 0x162   :  { %5438 = vmatpush1.bf16.msra.mxu1 %v7879_v3 }
 0x163   :  { %5008 = vmatpush1.bf16.msra.mxu0 %v7876_v2  ;;  %5439 = vmatprep.subr.bf16.mxu1 %v7887_v5 }
 0x164   :  { %5009 = vmatprep.subr.bf16.mxu0 %v7884_v4  ;;  %v7960_v4 = vld [vmem:[#allocation5 + $0xac0] ss:$16 sps:$4 sm:$0xff]  }
 0x166   :  { %5440 = vmatpush1.bf16.msra.mxu1 %v7885_v7 }
 0x167   :  { %5010 = vmatpush1.bf16.msra.mxu0 %v7882_v6  ;;  %5441 = vmatprep.subr.bf16.mxu1 %v7893_v9  ;;  %v7963_v6 = vld [vmem:[#allocation5 + $0x6c8] ss:$16 sps:$4 sm:$0xff]   ;;  %v7971_v9 = vld [vmem:[#allocation5 + $0x6ec] ss:$16 sps:$4 sm:$0xff]  }
 0x168   :  { %5011 = vmatprep.subr.bf16.mxu0 %v7890_v8  ;;  %v7968_v8 = vld [vmem:[#allocation5 + $0xae4] ss:$16 sps:$4 sm:$0xff]  }
 0x16a   :  { %5442 = vmatpush1.bf16.msra.mxu1 %v7891_v11  ;;  %v7969_v11 = vld [vmem:[#allocation5 + $0x6e8] ss:$16 sps:$4 sm:$0xff]  }
 0x16b   :  { %5012 = vmatpush1.bf16.msra.mxu0 %v7888_v10  ;;  %5443 = vmatprep.subr.bf16.mxu1 %v7899_v14  ;;  %v7966_v10 = vld [vmem:[#allocation5 + $0xae0] ss:$16 sps:$4 sm:$0xff]   ;;  %v7977_v14 = vld [vmem:[#allocation5 + $0x70c] ss:$16 sps:$4 sm:$0xff]  }
 0x16c   :  { %5013 = vmatprep.subr.bf16.mxu0 %v7896_v13  ;;  %v7974_v13 = vld [vmem:[#allocation5 + $0xb04] ss:$16 sps:$4 sm:$0xff]  }
 0x16e   :  { %5444 = vmatpush1.bf16.msra.mxu1 %v7897_v17  ;;  %v7975_v17 = vld [vmem:[#allocation5 + $0x708] ss:$16 sps:$4 sm:$0xff]  }
 0x16f   :  { %5014 = vmatpush1.bf16.msra.mxu0 %v7894_v16  ;;  %5445 = vmatprep.subr.bf16.mxu1 %v7905_v19  ;;  %v7972_v16 = vld [vmem:[#allocation5 + $0xb00] ss:$16 sps:$4 sm:$0xff]   ;;  %v7983_v19 = vld [vmem:[#allocation5 + $0x72c] ss:$16 sps:$4 sm:$0xff]  }
 0x170   :  { %5015 = vmatprep.subr.bf16.mxu0 %v7902_v18  ;;  %v7980_v18 = vld [vmem:[#allocation5 + $0xb24] ss:$16 sps:$4 sm:$0xff]  }
 0x172   :  { %5446 = vmatpush1.bf16.msra.mxu1 %v7903_v21  ;;  %v7981_v21 = vld [vmem:[#allocation5 + $0x728] ss:$16 sps:$4 sm:$0xff]  }
 0x173   :  { %5016 = vmatpush1.bf16.msra.mxu0 %v7900_v20  ;;  %5447 = vmatprep.subr.bf16.mxu1 %v7911_v23  ;;  %v7978_v20 = vld [vmem:[#allocation5 + $0xb20] ss:$16 sps:$4 sm:$0xff]   ;;  %v7989_v23 = vld [vmem:[#allocation5 + $0x74c] ss:$16 sps:$4 sm:$0xff]  }
 0x174   :  { %5017 = vmatprep.subr.bf16.mxu0 %v7908_v22  ;;  %v7986_v22 = vld [vmem:[#allocation5 + $0xb44] ss:$16 sps:$4 sm:$0xff]  }
 0x176   :  { %5448 = vmatpush1.bf16.msra.mxu1 %v7909_v26  ;;  %v7987_v26 = vld [vmem:[#allocation5 + $0x748] ss:$16 sps:$4 sm:$0xff]  }
 0x177   :  { %5018 = vmatpush1.bf16.msra.mxu0 %v7906_v25  ;;  %5449 = vmatprep.subr.bf16.mxu1 %v7917_v28  ;;  %v7984_v25 = vld [vmem:[#allocation5 + $0xb40] ss:$16 sps:$4 sm:$0xff]   ;;  %v7995_v28 = vld [vmem:[#allocation5 + $0x76c] ss:$16 sps:$4 sm:$0xff]  }
 0x178   :  { %5019 = vmatprep.subr.bf16.mxu0 %v7914_v27  ;;  %v7992_v27 = vld [vmem:[#allocation5 + $0xb64] ss:$16 sps:$4 sm:$0xff]  }
 0x17a   :  { %5450 = vmatpush1.bf16.msra.mxu1 %v7915_v30  ;;  %v7993_v30 = vld [vmem:[#allocation5 + $0x768] ss:$16 sps:$4 sm:$0xff]  }
 0x17b   :  { %5020 = vmatpush1.bf16.msra.mxu0 %v7912_v29  ;;  %5451 = vmatprep.subr.bf16.mxu1 %v7923_v32  ;;  %v7990_v29 = vld [vmem:[#allocation5 + $0xb60] ss:$16 sps:$4 sm:$0xff]   ;;  %v8001_v32 = vld [vmem:[#allocation5 + $0x78c] ss:$16 sps:$4 sm:$0xff]  }
 0x17c   :  { %5021 = vmatprep.subr.bf16.mxu0 %v7920_v31  ;;  %v7998_v31 = vld [vmem:[#allocation5 + $0xb84] ss:$16 sps:$4 sm:$0xff]  }
 0x17e   :  { %5452 = vmatpush1.bf16.msra.mxu1 %v7921_v12  ;;  %v7999_v12 = vld [vmem:[#allocation5 + $0x788] ss:$16 sps:$4 sm:$0xff]  }
 0x17f   :  { %5022 = vmatpush1.bf16.msra.mxu0 %v7918_v35  ;;  %5464 = vmatprep.subr.bf16.mxu1 %v7929_v40  ;;  %v7996_v35 = vld [vmem:[#allocation5 + $0xb80] ss:$16 sps:$4 sm:$0xff]   ;;  %v8005_v40 = vld [vmem:[#allocation5 + $0x7a8] ss:$16 sps:$4 sm:$0xff]  }
 0x180   :  { %5034 = vmatprep.subr.bf16.mxu0 %v7926_v39  ;;  %v8002_v39 = vld [vmem:[#allocation5 + $0xba0] ss:$16 sps:$4 sm:$0xff]  }
 0x181   :  { %5454 = vmatmul.mubr.bf16.vlgmr.msra.gmra.mrb[4].mxu1 %v9149_v24  ;;  %v7947_v24 = vld [vmem:[#allocation5 + $0x66c] ss:$16 sps:$4 sm:$0xff]  }
 0x182   :  { %5024 = vmatmul.mubr.bf16.vlgmr.msra.gmra.mrb[0].mxu0 %v9165_v42  ;;  %5465 = vmatpush1.bf16.msra.mxu1 %v7927_v45  ;;  %v8011_v45 = vld [vmem:[#allocation5 + $0x7c8] ss:$16 sps:$4 sm:$0xff]  }
 0x183   :  { %5035 = vmatpush1.bf16.msra.mxu0 %v7924_v41  ;;  %5466 = vmatprep.subr.bf16.mxu1 %v7935_v46  ;;  %v8010_v41 = vld [vmem:[#allocation5 + $0xbc4] ss:$16 sps:$4 sm:$0xff]   ;;  %v8019_v46 = vld [vmem:[#allocation5 + $0x7ec] ss:$16 sps:$4 sm:$0xff]  }
 0x184   :  { %5036 = vmatprep.subr.bf16.mxu0 %v7932_v15  ;;  %5066 = vmatprep.mubr.bf16.mxu0 %v9167_v47  ;;  %v8016_v15 = vld [vmem:[#allocation5 + $0xbe4] ss:$16 sps:$4 sm:$0xff]  }
 0x185   :  { %5496 = vmatprep.mubr.bf16.mxu1 %v9153_v33  ;;  %v7951_v33 = vld [vmem:[#allocation5 + $0x688] ss:$16 sps:$4 sm:$0xff]  }
 0x186   :  { %5467 = vmatpush1.bf16.msra.mxu1 %v7933_v49  ;;  %v8017_v49 = vld [vmem:[#allocation5 + $0x7e8] ss:$16 sps:$4 sm:$0xff]  }
 0x187   :  { %5037 = vmatpush1.bf16.msra.mxu0 %v7930_v48  ;;  %5468 = vmatprep.subr.bf16.mxu1 %v7941_v44  ;;  %v8014_v48 = vld [vmem:[#allocation5 + $0xbe0] ss:$16 sps:$4 sm:$0xff]   ;;  %v8025_v44 = vld [vmem:[#allocation5 + $0x80c] ss:$16 sps:$4 sm:$0xff]  }
 0x188   :  { %5038 = vmatprep.subr.bf16.mxu0 %v7938_v50  ;;  %v8022_v50 = vld [vmem:[#allocation5 + $0xc04] ss:$16 sps:$4 sm:$0xff]  }
 0x18a   :  { %5469 = vmatpush1.bf16.msra.mxu1 %v7939_v52  ;;  %v151_v52 = vld [vmem:[#allocation2 + $0x110] sm:$0xff] }
 0x18b   :  { %5039 = vmatpush1.bf16.msra.mxu0 %v7936_v51  ;;  %5470 = vmatprep.subr.bf16.mxu1 %v7947_v24  ;;  %v127_v51 = vld [vmem:[#allocation2 + $0x50] sm:$0xff]  ;;  %v154_v24 = vld [vmem:[#allocation2 + $0x128] sm:$0xff] }
 0x18c   :  { %5040 = vmatprep.subr.bf16.mxu0 %v7944_v53  ;;  %v130_v53 = vld [vmem:[#allocation2 + $0x68] sm:$0xff] }
 0x18e   :  { %5471 = vmatpush1.bf16.msra.mxu1 %v7945_v56  ;;  %v8020_v56 = vld [vmem:[#allocation5 + $0xc00] ss:$16 sps:$4 sm:$0xff]  }
 0x18f   :  { %5041 = vmatpush1.bf16.msra.mxu0 %v7942_v54  ;;  %5472 = vmatprep.subr.bf16.mxu1 %v7953_v58  ;;  %v9181_v54 = vpack.c.bf16 %v151_v52, %v127_v51  ;;  %v8028_v58 = vld [vmem:[#allocation5 + $0xc24] ss:$16 sps:$4 sm:$0xff]   ;;  %v8098_v51 = vld [vmem:[#allocation5 + $0xda0] ss:$16 sps:$4 sm:$0xff]   ;;  %v8101_v52 = vld [vmem:[#allocation5 + $0x9a8] ss:$16 sps:$4 sm:$0xff]  }
 0x190   :  { %5042 = vmatprep.subr.bf16.mxu0 %v7950_v57  ;;  %v8023_v57 = vld [vmem:[#allocation5 + $0x808] ss:$16 sps:$4 sm:$0xff]  }
 0x192   :  { %5473 = vmatpush1.bf16.msra.mxu1 %v7951_v33  ;;  %v9183_v33 = vpack.c.bf16 %v154_v24, %v130_v53  ;;  %v8106_v53 = vld [vmem:[#allocation5 + $0xdc4] ss:$16 sps:$4 sm:$0xff]   ;;  %v8109_v24 = vld [vmem:[#allocation5 + $0x9cc] ss:$16 sps:$4 sm:$0xff]  }
 0x193   :  { %5043 = vmatpush1.bf16.msra.mxu0 %v7948_v59  ;;  %5474 = vmatprep.subr.bf16.mxu1 %v7959_v61  ;;  %v8031_v59 = vld [vmem:[#allocation5 + $0x82c] ss:$16 sps:$4 sm:$0xff]   ;;  %v8029_v61 = vld [vmem:[#allocation5 + $0x828] ss:$16 sps:$4 sm:$0xff]  }
 0x194   :  { %5044 = vmatprep.subr.bf16.mxu0 %v7956_v60  ;;  %v9173_v2 = vpop.f32.mrb[0].mxu1  ;;  %v8026_v60 = vld [vmem:[#allocation5 + $0xc20] ss:$16 sps:$4 sm:$0xff]  }
 0x195   :  { %v9175_v3 = vpop.f32.mrb[1].mxu1 }
 0x196   :  { %v9177_v5 = vpop.f32.mrb[2].mxu1  ;;  %5475 = vmatpush1.bf16.msra.mxu1 %v7957_v63  ;;  %v8037_v63 = vld [vmem:[#allocation5 + $0x84c] ss:$16 sps:$4 sm:$0xff]  }
 0x197   :  { %5045 = vmatpush1.bf16.msra.mxu0 %v7954_v62  ;;  %v9179_v7 = vpop.f32.mrb[3].mxu1  ;;  %5476 = vmatprep.subr.bf16.mxu1 %v7965_v1  ;;  %v8034_v62 = vld [vmem:[#allocation5 + $0xc44] ss:$16 sps:$4 sm:$0xff]   ;;  %v8035_v1 = vld [vmem:[#allocation5 + $0x848] ss:$16 sps:$4 sm:$0xff]  }
 0x198   :  { %5046 = vmatprep.subr.bf16.mxu0 %v7962_v0  ;;  %v8032_v0 = vld [vmem:[#allocation5 + $0xc40] ss:$16 sps:$4 sm:$0xff]  }
 0x19a   :  { %5477 = vmatpush1.bf16.msra.mxu1 %v7963_v6  ;;  %v8038_v6 = vld [vmem:[#allocation5 + $0xc60] ss:$16 sps:$4 sm:$0xff]  }
 0x19b   :  { %5047 = vmatpush1.bf16.msra.mxu0 %v7960_v4  ;;  %5478 = vmatprep.subr.bf16.mxu1 %v7971_v9  ;;  %v8040_v4 = vld [vmem:[#allocation5 + $0xc64] ss:$16 sps:$4 sm:$0xff]  }
 0x19c   :  { %5048 = vmatprep.subr.bf16.mxu0 %v7968_v8  ;;  %v8041_v8 = vld [vmem:[#allocation5 + $0x868] ss:$16 sps:$4 sm:$0xff]   ;;  %v8046_v9 = vld [vmem:[#allocation5 + $0xc84] ss:$16 sps:$4 sm:$0xff]  }
 0x19e   :  { %5479 = vmatpush1.bf16.msra.mxu1 %v7969_v11  ;;  %v8044_v11 = vld [vmem:[#allocation5 + $0xc80] ss:$16 sps:$4 sm:$0xff]  }
 0x19f   :  { %5049 = vmatpush1.bf16.msra.mxu0 %v7966_v10  ;;  %5480 = vmatprep.subr.bf16.mxu1 %v7977_v14  ;;  %v8049_v10 = vld [vmem:[#allocation5 + $0x88c] ss:$16 sps:$4 sm:$0xff]  }
 0x1a0   :  { %5050 = vmatprep.subr.bf16.mxu0 %v7974_v13  ;;  %v8052_v13 = vld [vmem:[#allocation5 + $0xca4] ss:$16 sps:$4 sm:$0xff]   ;;  %v8055_v14 = vld [vmem:[#allocation5 + $0x8ac] ss:$16 sps:$4 sm:$0xff]  }
 0x1a2   :  { %5481 = vmatpush1.bf16.msra.mxu1 %v7975_v17  ;;  %v8053_v17 = vld [vmem:[#allocation5 + $0x8a8] ss:$16 sps:$4 sm:$0xff]  }
 0x1a3   :  { %5051 = vmatpush1.bf16.msra.mxu0 %v7972_v16  ;;  %5482 = vmatprep.subr.bf16.mxu1 %v7983_v19  ;;  %v8050_v16 = vld [vmem:[#allocation5 + $0xca0] ss:$16 sps:$4 sm:$0xff]   ;;  %v8061_v19 = vld [vmem:[#allocation5 + $0x8cc] ss:$16 sps:$4 sm:$0xff]  }
 0x1a4   :  { %5052 = vmatprep.subr.bf16.mxu0 %v7980_v18  ;;  %v8058_v18 = vld [vmem:[#allocation5 + $0xcc4] ss:$16 sps:$4 sm:$0xff]  }
 0x1a6   :  { %5483 = vmatpush1.bf16.msra.mxu1 %v7981_v21  ;;  %v8059_v21 = vld [vmem:[#allocation5 + $0x8c8] ss:$16 sps:$4 sm:$0xff]  }
 0x1a7   :  { %5053 = vmatpush1.bf16.msra.mxu0 %v7978_v20  ;;  %5484 = vmatprep.subr.bf16.mxu1 %v7989_v23  ;;  %v8056_v20 = vld [vmem:[#allocation5 + $0xcc0] ss:$16 sps:$4 sm:$0xff]   ;;  %v8067_v23 = vld [vmem:[#allocation5 + $0x8ec] ss:$16 sps:$4 sm:$0xff]  }
 0x1a8   :  { %5054 = vmatprep.subr.bf16.mxu0 %v7986_v22  ;;  %v8064_v22 = vld [vmem:[#allocation5 + $0xce4] ss:$16 sps:$4 sm:$0xff]  }
 0x1aa   :  { %5485 = vmatpush1.bf16.msra.mxu1 %v7987_v26  ;;  %v8065_v26 = vld [vmem:[#allocation5 + $0x8e8] ss:$16 sps:$4 sm:$0xff]  }
 0x1ab   :  { %5055 = vmatpush1.bf16.msra.mxu0 %v7984_v25  ;;  %5486 = vmatprep.subr.bf16.mxu1 %v7995_v28  ;;  %v8062_v25 = vld [vmem:[#allocation5 + $0xce0] ss:$16 sps:$4 sm:$0xff]   ;;  %v8073_v28 = vld [vmem:[#allocation5 + $0x90c] ss:$16 sps:$4 sm:$0xff]  }
 0x1ac   :  { %5056 = vmatprep.subr.bf16.mxu0 %v7992_v27  ;;  %v8070_v27 = vld [vmem:[#allocation5 + $0xd04] ss:$16 sps:$4 sm:$0xff]  }
 0x1ae   :  { %5487 = vmatpush1.bf16.msra.mxu1 %v7993_v30  ;;  %v8071_v30 = vld [vmem:[#allocation5 + $0x908] ss:$16 sps:$4 sm:$0xff]  }
 0x1af   :  { %5057 = vmatpush1.bf16.msra.mxu0 %v7990_v29  ;;  %5488 = vmatprep.subr.bf16.mxu1 %v8001_v32  ;;  %v8068_v29 = vld [vmem:[#allocation5 + $0xd00] ss:$16 sps:$4 sm:$0xff]   ;;  %v8079_v32 = vld [vmem:[#allocation5 + $0x92c] ss:$16 sps:$4 sm:$0xff]  }
 0x1b0   :  { %5058 = vmatprep.subr.bf16.mxu0 %v7998_v31  ;;  %v8076_v31 = vld [vmem:[#allocation5 + $0xd24] ss:$16 sps:$4 sm:$0xff]  }
 0x1b2   :  { %5489 = vmatpush1.bf16.msra.mxu1 %v7999_v12  ;;  %v8077_v12 = vld [vmem:[#allocation5 + $0x928] ss:$16 sps:$4 sm:$0xff]  }
 0x1b3   :  { %5059 = vmatpush1.bf16.msra.mxu0 %v7996_v35  ;;  %5490 = vmatprep.subr.bf16.mxu1 %v8007_v37  ;;  %v8074_v35 = vld [vmem:[#allocation5 + $0xd20] ss:$16 sps:$4 sm:$0xff]   ;;  %v8085_v37 = vld [vmem:[#allocation5 + $0x94c] ss:$16 sps:$4 sm:$0xff]  }
 0x1b4   :  { %5060 = vmatprep.subr.bf16.mxu0 %v8004_v36  ;;  %v8082_v36 = vld [vmem:[#allocation5 + $0xd44] ss:$16 sps:$4 sm:$0xff]  }
 0x1b6   :  { %5491 = vmatpush1.bf16.msra.mxu1 %v8005_v40  ;;  %v8083_v40 = vld [vmem:[#allocation5 + $0x948] ss:$16 sps:$4 sm:$0xff]  }
 0x1b7   :  { %5061 = vmatpush1.bf16.msra.mxu0 %v8002_v39  ;;  %5492 = vmatprep.subr.bf16.mxu1 %v8013_v55  ;;  %v8080_v39 = vld [vmem:[#allocation5 + $0xd40] ss:$16 sps:$4 sm:$0xff]   ;;  %v8091_v55 = vld [vmem:[#allocation5 + $0x96c] ss:$16 sps:$4 sm:$0xff]  }
 0x1b8   :  { %5062 = vmatprep.subr.bf16.mxu0 %v8010_v41  ;;  %v8088_v41 = vld [vmem:[#allocation5 + $0xd64] ss:$16 sps:$4 sm:$0xff]  }
 0x1ba   :  { %5493 = vmatpush1.bf16.msra.mxu1 %v8011_v45  ;;  %v8089_v45 = vld [vmem:[#allocation5 + $0x968] ss:$16 sps:$4 sm:$0xff]  }
 0x1bb   :  { %5063 = vmatpush1.bf16.msra.mxu0 %v8008_v43  ;;  %5494 = vmatprep.subr.bf16.mxu1 %v8019_v46  ;;  %v8086_v43 = vld [vmem:[#allocation5 + $0xd60] ss:$16 sps:$4 sm:$0xff]   ;;  %v8097_v46 = vld [vmem:[#allocation5 + $0x98c] ss:$16 sps:$4 sm:$0xff]  }
 0x1bc   :  { %5064 = vmatprep.subr.bf16.mxu0 %v8016_v15  ;;  %v8094_v15 = vld [vmem:[#allocation5 + $0xd84] ss:$16 sps:$4 sm:$0xff]  }
 0x1be   :  { %5495 = vmatpush1.bf16.msra.mxu1 %v8017_v49  ;;  %v8095_v49 = vld [vmem:[#allocation5 + $0x988] ss:$16 sps:$4 sm:$0xff]  }
 0x1bf   :  { %5065 = vmatpush1.bf16.msra.mxu0 %v8014_v48  ;;  %5507 = vmatprep.subr.bf16.mxu1 %v8025_v44  ;;  %v8092_v48 = vld [vmem:[#allocation5 + $0xd80] ss:$16 sps:$4 sm:$0xff]   ;;  %v8103_v44 = vld [vmem:[#allocation5 + $0x9ac] ss:$16 sps:$4 sm:$0xff]  }
 0x1c0   :  { %5077 = vmatprep.subr.bf16.mxu0 %v8022_v50  ;;  %v8100_v50 = vld [vmem:[#allocation5 + $0xda4] ss:$16 sps:$4 sm:$0xff]  }
 0x1c1   :  { %5497 = vmatmul.mubr.bf16.vlgmr.msra.gmra.mrb[4].mxu1 %v9157_v34  ;;  %v8043_v34 = vld [vmem:[#allocation5 + $0x86c] ss:$16 sps:$4 sm:$0xff]  }
 0x1c2   :  { %5067 = vmatmul.mubr.bf16.vlgmr.msra.gmra.mrb[0].mxu0 %v9181_v54  ;;  %5508 = vmatpush1.bf16.msra.mxu1 %v8023_v57  ;;  %v8107_v57 = vld [vmem:[#allocation5 + $0x9c8] ss:$16 sps:$4 sm:$0xff]  }
 0x1c3   :  { %5078 = vmatpush1.bf16.msra.mxu0 %v8020_v56  ;;  %5509 = vmatprep.subr.bf16.mxu1 %v8031_v59  ;;  %v8104_v56 = vld [vmem:[#allocation5 + $0xdc0] ss:$16 sps:$4 sm:$0xff]   ;;  %v8115_v59 = vld [vmem:[#allocation5 + $0x9ec] ss:$16 sps:$4 sm:$0xff]  }
 0x1c4   :  { %5079 = vmatprep.subr.bf16.mxu0 %v8028_v58  ;;  %5109 = vmatprep.mubr.bf16.mxu0 %v9183_v33  ;;  %v8112_v58 = vld [vmem:[#allocation5 + $0xde4] ss:$16 sps:$4 sm:$0xff]  }
 0x1c5   :  { %5539 = vmatprep.mubr.bf16.mxu1 %v9159_v38  ;;  %v8047_v38 = vld [vmem:[#allocation5 + $0x888] ss:$16 sps:$4 sm:$0xff]  }
 0x1c6   :  { %5510 = vmatpush1.bf16.msra.mxu1 %v8029_v61  ;;  %v8113_v61 = vld [vmem:[#allocation5 + $0x9e8] ss:$16 sps:$4 sm:$0xff]  }
 0x1c7   :  { %5080 = vmatpush1.bf16.msra.mxu0 %v8026_v60  ;;  %5511 = vmatprep.subr.bf16.mxu1 %v8037_v63  ;;  %v8110_v60 = vld [vmem:[#allocation5 + $0xde0] ss:$16 sps:$4 sm:$0xff]   ;;  %v8121_v63 = vld [vmem:[#allocation5 + $0xa0c] ss:$16 sps:$4 sm:$0xff]  }
 0x1c8   :  { %5081 = vmatprep.subr.bf16.mxu0 %v8034_v62  ;;  %v8118_v62 = vld [vmem:[#allocation5 + $0xe04] ss:$16 sps:$4 sm:$0xff]  }
 0x1ca   :  { %5512 = vmatpush1.bf16.msra.mxu1 %v8035_v1  ;;  %v153_v1 = vld [vmem:[#allocation2 + $0x120] sm:$0xff] }
 0x1cb   :  { %5082 = vmatpush1.bf16.msra.mxu0 %v8032_v0  ;;  %5513 = vmatprep.subr.bf16.mxu1 %v8043_v34  ;;  %v129_v0 = vld [vmem:[#allocation2 + $0x60] sm:$0xff]  ;;  %v156_v34 = vld [vmem:[#allocation2 + $0x138] sm:$0xff] }
 0x1cc   :  { %5083 = vmatprep.subr.bf16.mxu0 %v8040_v4  ;;  %v132_v4 = vld [vmem:[#allocation2 + $0x78] sm:$0xff] }
 0x1ce   :  { %5514 = vmatpush1.bf16.msra.mxu1 %v8041_v8  ;;  %v8116_v8 = vld [vmem:[#allocation5 + $0xe00] ss:$16 sps:$4 sm:$0xff]  }
 0x1cf   :  { %5084 = vmatpush1.bf16.msra.mxu0 %v8038_v6  ;;  %5515 = vmatprep.subr.bf16.mxu1 %v8049_v10  ;;  %v9189_v6 = vpack.c.bf16 %v153_v1, %v129_v0  ;;  %v8124_v10 = vld [vmem:[#allocation5 + $0xe24] ss:$16 sps:$4 sm:$0xff]   ;;  %v8194_v0 = vld [vmem:[#allocation5 + $0xfa0] ss:$16 sps:$4 sm:$0xff]   ;;  %v8197_v1 = vld [vmem:[#allocation5 + $0xba8] ss:$16 sps:$4 sm:$0xff]  }
 0x1d0   :  { %5085 = vmatprep.subr.bf16.mxu0 %v8046_v9  ;;  %v8119_v9 = vld [vmem:[#allocation5 + $0xa08] ss:$16 sps:$4 sm:$0xff]  }
 0x1d2   :  { %5516 = vmatpush1.bf16.msra.mxu1 %v8047_v38  ;;  %v9191_v38 = vpack.c.bf16 %v156_v34, %v132_v4  ;;  %v8202_v4 = vld [vmem:[#allocation5 + $0xfc4] ss:$16 sps:$4 sm:$0xff]   ;;  %v8205_v34 = vld [vmem:[#allocation5 + $0xbcc] ss:$16 sps:$4 sm:$0xff]  }
 0x1d3   :  { %5086 = vmatpush1.bf16.msra.mxu0 %v8044_v11  ;;  %5517 = vmatprep.subr.bf16.mxu1 %v8055_v14  ;;  %v8127_v11 = vld [vmem:[#allocation5 + $0xa2c] ss:$16 sps:$4 sm:$0xff]   ;;  %v8125_v14 = vld [vmem:[#allocation5 + $0xa28] ss:$16 sps:$4 sm:$0xff]  }
 0x1d4   :  { %5087 = vmatprep.subr.bf16.mxu0 %v8052_v13  ;;  %v8122_v13 = vld [vmem:[#allocation5 + $0xe20] ss:$16 sps:$4 sm:$0xff]  }
 0x1d6   :  { %5518 = vmatpush1.bf16.msra.mxu1 %v8053_v17  ;;  %v8133_v17 = vld [vmem:[#allocation5 + $0xa4c] ss:$16 sps:$4 sm:$0xff]  }
 0x1d7   :  { %5088 = vmatpush1.bf16.msra.mxu0 %v8050_v16  ;;  %5519 = vmatprep.subr.bf16.mxu1 %v8061_v19  ;;  %v8130_v16 = vld [vmem:[#allocation5 + $0xe44] ss:$16 sps:$4 sm:$0xff]   ;;  %v8131_v19 = vld [vmem:[#allocation5 + $0xa48] ss:$16 sps:$4 sm:$0xff]  }
 0x1d8   :  { %5089 = vmatprep.subr.bf16.mxu0 %v8058_v18  ;;  %v8128_v18 = vld [vmem:[#allocation5 + $0xe40] ss:$16 sps:$4 sm:$0xff]  }
 0x1da   :  { %5520 = vmatpush1.bf16.msra.mxu1 %v8059_v21  ;;  %v8134_v21 = vld [vmem:[#allocation5 + $0xe60] ss:$16 sps:$4 sm:$0xff]  }
 0x1db   :  { %5090 = vmatpush1.bf16.msra.mxu0 %v8056_v20  ;;  %5521 = vmatprep.subr.bf16.mxu1 %v8067_v23  ;;  %v8136_v20 = vld [vmem:[#allocation5 + $0xe64] ss:$16 sps:$4 sm:$0xff]  }
 0x1dc   :  { %5091 = vmatprep.subr.bf16.mxu0 %v8064_v22  ;;  %v8137_v22 = vld [vmem:[#allocation5 + $0xa68] ss:$16 sps:$4 sm:$0xff]   ;;  %v8142_v23 = vld [vmem:[#allocation5 + $0xe84] ss:$16 sps:$4 sm:$0xff]  }
 0x1de   :  { %5522 = vmatpush1.bf16.msra.mxu1 %v8065_v26  ;;  %v8140_v26 = vld [vmem:[#allocation5 + $0xe80] ss:$16 sps:$4 sm:$0xff]  }
 0x1df   :  { %5092 = vmatpush1.bf16.msra.mxu0 %v8062_v25  ;;  %5523 = vmatprep.subr.bf16.mxu1 %v8073_v28  ;;  %v8145_v25 = vld [vmem:[#allocation5 + $0xa8c] ss:$16 sps:$4 sm:$0xff]  }
 0x1e0   :  { %5093 = vmatprep.subr.bf16.mxu0 %v8070_v27  ;;  %v8148_v27 = vld [vmem:[#allocation5 + $0xea4] ss:$16 sps:$4 sm:$0xff]   ;;  %v8151_v28 = vld [vmem:[#allocation5 + $0xaac] ss:$16 sps:$4 sm:$0xff]  }
 0x1e2   :  { %5524 = vmatpush1.bf16.msra.mxu1 %v8071_v30  ;;  %v8149_v30 = vld [vmem:[#allocation5 + $0xaa8] ss:$16 sps:$4 sm:$0xff]  }
 0x1e3   :  { %5094 = vmatpush1.bf16.msra.mxu0 %v8068_v29  ;;  %5525 = vmatprep.subr.bf16.mxu1 %v8079_v32  ;;  %v8146_v29 = vld [vmem:[#allocation5 + $0xea0] ss:$16 sps:$4 sm:$0xff]   ;;  %v8157_v32 = vld [vmem:[#allocation5 + $0xacc] ss:$16 sps:$4 sm:$0xff]  }
 0x1e4   :  { %5095 = vmatprep.subr.bf16.mxu0 %v8076_v31  ;;  %v8154_v31 = vld [vmem:[#allocation5 + $0xec4] ss:$16 sps:$4 sm:$0xff]  }
 0x1e6   :  { %5526 = vmatpush1.bf16.msra.mxu1 %v8077_v12  ;;  %v8155_v12 = vld [vmem:[#allocation5 + $0xac8] ss:$16 sps:$4 sm:$0xff]  }
 0x1e7   :  { %5096 = vmatpush1.bf16.msra.mxu0 %v8074_v35  ;;  %5527 = vmatprep.subr.bf16.mxu1 %v8085_v37  ;;  %v8152_v35 = vld [vmem:[#allocation5 + $0xec0] ss:$16 sps:$4 sm:$0xff]   ;;  %v8163_v37 = vld [vmem:[#allocation5 + $0xaec] ss:$16 sps:$4 sm:$0xff]  }
 0x1e8   :  { %5097 = vmatprep.subr.bf16.mxu0 %v8082_v36  ;;  %v8160_v36 = vld [vmem:[#allocation5 + $0xee4] ss:$16 sps:$4 sm:$0xff]  }
 0x1ea   :  { %5528 = vmatpush1.bf16.msra.mxu1 %v8083_v40  ;;  %v8161_v40 = vld [vmem:[#allocation5 + $0xae8] ss:$16 sps:$4 sm:$0xff]  }
 0x1eb   :  { %5098 = vmatpush1.bf16.msra.mxu0 %v8080_v39  ;;  %5529 = vmatprep.subr.bf16.mxu1 %v8091_v55  ;;  %v8158_v39 = vld [vmem:[#allocation5 + $0xee0] ss:$16 sps:$4 sm:$0xff]   ;;  %v8169_v55 = vld [vmem:[#allocation5 + $0xb0c] ss:$16 sps:$4 sm:$0xff]  }
 0x1ec   :  { %5099 = vmatprep.subr.bf16.mxu0 %v8088_v41  ;;  %v8166_v41 = vld [vmem:[#allocation5 + $0xf04] ss:$16 sps:$4 sm:$0xff]  }
 0x1ee   :  { %5530 = vmatpush1.bf16.msra.mxu1 %v8089_v45  ;;  %v8167_v45 = vld [vmem:[#allocation5 + $0xb08] ss:$16 sps:$4 sm:$0xff]  }
 0x1ef   :  { %5100 = vmatpush1.bf16.msra.mxu0 %v8086_v43  ;;  %5531 = vmatprep.subr.bf16.mxu1 %v8097_v46  ;;  %v8164_v43 = vld [vmem:[#allocation5 + $0xf00] ss:$16 sps:$4 sm:$0xff]   ;;  %v8175_v46 = vld [vmem:[#allocation5 + $0xb2c] ss:$16 sps:$4 sm:$0xff]  }
 0x1f0   :  { %5101 = vmatprep.subr.bf16.mxu0 %v8094_v15  ;;  %v8172_v15 = vld [vmem:[#allocation5 + $0xf24] ss:$16 sps:$4 sm:$0xff]  }
 0x1f2   :  { %5532 = vmatpush1.bf16.msra.mxu1 %v8095_v49  ;;  %v8173_v49 = vld [vmem:[#allocation5 + $0xb28] ss:$16 sps:$4 sm:$0xff]  }
 0x1f3   :  { %5102 = vmatpush1.bf16.msra.mxu0 %v8092_v48  ;;  %5533 = vmatprep.subr.bf16.mxu1 %v8103_v44  ;;  %v8170_v48 = vld [vmem:[#allocation5 + $0xf20] ss:$16 sps:$4 sm:$0xff]   ;;  %v8181_v44 = vld [vmem:[#allocation5 + $0xb4c] ss:$16 sps:$4 sm:$0xff]  }
 0x1f4   :  { %5103 = vmatprep.subr.bf16.mxu0 %v8100_v50  ;;  %v8178_v50 = vld [vmem:[#allocation5 + $0xf44] ss:$16 sps:$4 sm:$0xff]  }
 0x1f6   :  { %5534 = vmatpush1.bf16.msra.mxu1 %v8101_v52  ;;  %v8179_v52 = vld [vmem:[#allocation5 + $0xb48] ss:$16 sps:$4 sm:$0xff]  }
 0x1f7   :  { %5104 = vmatpush1.bf16.msra.mxu0 %v8098_v51  ;;  %5535 = vmatprep.subr.bf16.mxu1 %v8109_v24  ;;  %v8176_v51 = vld [vmem:[#allocation5 + $0xf40] ss:$16 sps:$4 sm:$0xff]   ;;  %v8187_v24 = vld [vmem:[#allocation5 + $0xb6c] ss:$16 sps:$4 sm:$0xff]  }
 0x1f8   :  { %5105 = vmatprep.subr.bf16.mxu0 %v8106_v53  ;;  %v8184_v53 = vld [vmem:[#allocation5 + $0xf64] ss:$16 sps:$4 sm:$0xff]  }
 0x1fa   :  { %5536 = vmatpush1.bf16.msra.mxu1 %v8107_v57  ;;  %v8185_v57 = vld [vmem:[#allocation5 + $0xb68] ss:$16 sps:$4 sm:$0xff]  }
 0x1fb   :  { %5106 = vmatpush1.bf16.msra.mxu0 %v8104_v56  ;;  %5537 = vmatprep.subr.bf16.mxu1 %v8115_v59  ;;  %v8182_v56 = vld [vmem:[#allocation5 + $0xf60] ss:$16 sps:$4 sm:$0xff]   ;;  %v8193_v59 = vld [vmem:[#allocation5 + $0xb8c] ss:$16 sps:$4 sm:$0xff]  }
 0x1fc   :  { %5107 = vmatprep.subr.bf16.mxu0 %v8112_v58  ;;  %v8190_v58 = vld [vmem:[#allocation5 + $0xf84] ss:$16 sps:$4 sm:$0xff]  }
 0x1fe   :  { %5538 = vmatpush1.bf16.msra.mxu1 %v8113_v61  ;;  %v8191_v61 = vld [vmem:[#allocation5 + $0xb88] ss:$16 sps:$4 sm:$0xff]  }
 0x1ff   :  { %5108 = vmatpush1.bf16.msra.mxu0 %v8110_v60  ;;  %5550 = vmatprep.subr.bf16.mxu1 %v8121_v63  ;;  %v8188_v60 = vld [vmem:[#allocation5 + $0xf80] ss:$16 sps:$4 sm:$0xff]   ;;  %v8199_v63 = vld [vmem:[#allocation5 + $0xbac] ss:$16 sps:$4 sm:$0xff]  }
 0x200   :  { %5120 = vmatprep.subr.bf16.mxu0 %v8118_v62  ;;  %v8196_v62 = vld [vmem:[#allocation5 + $0xfa4] ss:$16 sps:$4 sm:$0xff]  }
 0x201   :  { %5540 = vmatmul.mubr.bf16.vlgmr.msra.gmra.mrb[4].mxu1 %v9165_v42  ;;  %v8139_v42 = vld [vmem:[#allocation5 + $0xa6c] ss:$16 sps:$4 sm:$0xff]  }
 0x202   :  { %5110 = vmatmul.mubr.bf16.vlgmr.msra.gmra.mrb[0].mxu0 %v9189_v6  ;;  %5551 = vmatpush1.bf16.msra.mxu1 %v8119_v9  ;;  %v8203_v9 = vld [vmem:[#allocation5 + $0xbc8] ss:$16 sps:$4 sm:$0xff]  }
 0x203   :  { %5121 = vmatpush1.bf16.msra.mxu0 %v8116_v8  ;;  %5552 = vmatprep.subr.bf16.mxu1 %v8127_v11  ;;  %v8200_v8 = vld [vmem:[#allocation5 + $0xfc0] ss:$16 sps:$4 sm:$0xff]   ;;  %v8211_v11 = vld [vmem:[#allocation5 + $0xbec] ss:$16 sps:$4 sm:$0xff]  }
 0x204   :  { %5122 = vmatprep.subr.bf16.mxu0 %v8124_v10  ;;  %5152 = vmatprep.mubr.bf16.mxu0 %v9191_v38  ;;  %v8208_v10 = vld [vmem:[#allocation5 + $0xfe4] ss:$16 sps:$4 sm:$0xff]  }
 0x205   :  { %5582 = vmatprep.mubr.bf16.mxu1 %v9167_v47  ;;  %v8143_v47 = vld [vmem:[#allocation5 + $0xa88] ss:$16 sps:$4 sm:$0xff]  }
 0x206   :  { %5553 = vmatpush1.bf16.msra.mxu1 %v8125_v14  ;;  %v8209_v14 = vld [vmem:[#allocation5 + $0xbe8] ss:$16 sps:$4 sm:$0xff]  }
 0x207   :  { %5123 = vmatpush1.bf16.msra.mxu0 %v8122_v13  ;;  %5554 = vmatprep.subr.bf16.mxu1 %v8133_v17  ;;  %v8206_v13 = vld [vmem:[#allocation5 + $0xfe0] ss:$16 sps:$4 sm:$0xff]   ;;  %v8217_v17 = vld [vmem:[#allocation5 + $0xc0c] ss:$16 sps:$4 sm:$0xff]  }
 0x208   :  { %5124 = vmatprep.subr.bf16.mxu0 %v8130_v16  ;;  %v8214_v16 = vld [vmem:[#allocation5 + $0x1004] ss:$16 sps:$4 sm:$0xff]  }
 0x20a   :  { %5555 = vmatpush1.bf16.msra.mxu1 %v8131_v19  ;;  %v155_v19 = vld [vmem:[#allocation2 + $0x130] sm:$0xff] }
 0x20b   :  { %5125 = vmatpush1.bf16.msra.mxu0 %v8128_v18  ;;  %5556 = vmatprep.subr.bf16.mxu1 %v8139_v42  ;;  %v131_v18 = vld [vmem:[#allocation2 + $0x70] sm:$0xff]  ;;  %v158_v42 = vld [vmem:[#allocation2 + $0x148] sm:$0xff] }
 0x20c   :  { %5126 = vmatprep.subr.bf16.mxu0 %v8136_v20  ;;  %v134_v20 = vld [vmem:[#allocation2 + $0x88] sm:$0xff] }
 0x20e   :  { %5557 = vmatpush1.bf16.msra.mxu1 %v8137_v22  ;;  %v8212_v22 = vld [vmem:[#allocation5 + $0x1000] ss:$16 sps:$4 sm:$0xff]  }
 0x20f   :  { %5127 = vmatpush1.bf16.msra.mxu0 %v8134_v21  ;;  %5558 = vmatprep.subr.bf16.mxu1 %v8145_v25  ;;  %v9197_v21 = vpack.c.bf16 %v155_v19, %v131_v18  ;;  %v8220_v25 = vld [vmem:[#allocation5 + $0x1024] ss:$16 sps:$4 sm:$0xff]   ;;  %v8290_v18 = vld [vmem:[#allocation5 + $0x11a0] ss:$16 sps:$4 sm:$0xff]   ;;  %v8293_v19 = vld [vmem:[#allocation5 + $0xda8] ss:$16 sps:$4 sm:$0xff]  }
 0x210   :  { %5128 = vmatprep.subr.bf16.mxu0 %v8142_v23  ;;  %v8215_v23 = vld [vmem:[#allocation5 + $0xc08] ss:$16 sps:$4 sm:$0xff]  }
 0x212   :  { %5559 = vmatpush1.bf16.msra.mxu1 %v8143_v47  ;;  %v9199_v47 = vpack.c.bf16 %v158_v42, %v134_v20  ;;  %v8298_v20 = vld [vmem:[#allocation5 + $0x11c4] ss:$16 sps:$4 sm:$0xff]   ;;  %v8301_v42 = vld [vmem:[#allocation5 + $0xdcc] ss:$16 sps:$4 sm:$0xff]  }
 0x213   :  { %5129 = vmatpush1.bf16.msra.mxu0 %v8140_v26  ;;  %5560 = vmatprep.subr.bf16.mxu1 %v8151_v28  ;;  %v8223_v26 = vld [vmem:[#allocation5 + $0xc2c] ss:$16 sps:$4 sm:$0xff]   ;;  %v8221_v28 = vld [vmem:[#allocation5 + $0xc28] ss:$16 sps:$4 sm:$0xff]  }
 0x214   :  { %5130 = vmatprep.subr.bf16.mxu0 %v8148_v27  ;;  %v8218_v27 = vld [vmem:[#allocation5 + $0x1020] ss:$16 sps:$4 sm:$0xff]  }
 0x216   :  { %5561 = vmatpush1.bf16.msra.mxu1 %v8149_v30  ;;  %v8229_v30 = vld [vmem:[#allocation5 + $0xc4c] ss:$16 sps:$4 sm:$0xff]  }
 0x217   :  { %5131 = vmatpush1.bf16.msra.mxu0 %v8146_v29  ;;  %5562 = vmatprep.subr.bf16.mxu1 %v8157_v32  ;;  %v8226_v29 = vld [vmem:[#allocation5 + $0x1044] ss:$16 sps:$4 sm:$0xff]   ;;  %v8227_v32 = vld [vmem:[#allocation5 + $0xc48] ss:$16 sps:$4 sm:$0xff]  }
 0x218   :  { %5132 = vmatprep.subr.bf16.mxu0 %v8154_v31  ;;  %v8224_v31 = vld [vmem:[#allocation5 + $0x1040] ss:$16 sps:$4 sm:$0xff]  }
 0x21a   :  { %5563 = vmatpush1.bf16.msra.mxu1 %v8155_v12  ;;  %v8230_v12 = vld [vmem:[#allocation5 + $0x1060] ss:$16 sps:$4 sm:$0xff]  }
 0x21b   :  { %5133 = vmatpush1.bf16.msra.mxu0 %v8152_v35  ;;  %5564 = vmatprep.subr.bf16.mxu1 %v8163_v37  ;;  %v8232_v35 = vld [vmem:[#allocation5 + $0x1064] ss:$16 sps:$4 sm:$0xff]  }
 0x21c   :  { %5134 = vmatprep.subr.bf16.mxu0 %v8160_v36  ;;  %v8233_v36 = vld [vmem:[#allocation5 + $0xc68] ss:$16 sps:$4 sm:$0xff]   ;;  %v8238_v37 = vld [vmem:[#allocation5 + $0x1084] ss:$16 sps:$4 sm:$0xff]  }
 0x21e   :  { %5565 = vmatpush1.bf16.msra.mxu1 %v8161_v40  ;;  %v8236_v40 = vld [vmem:[#allocation5 + $0x1080] ss:$16 sps:$4 sm:$0xff]  }
 0x21f   :  { %5135 = vmatpush1.bf16.msra.mxu0 %v8158_v39  ;;  %5566 = vmatprep.subr.bf16.mxu1 %v8169_v55  ;;  %v8241_v39 = vld [vmem:[#allocation5 + $0xc8c] ss:$16 sps:$4 sm:$0xff]  }
 0x220   :  { %5136 = vmatprep.subr.bf16.mxu0 %v8166_v41  ;;  %v8244_v41 = vld [vmem:[#allocation5 + $0x10a4] ss:$16 sps:$4 sm:$0xff]   ;;  %v8247_v55 = vld [vmem:[#allocation5 + $0xcac] ss:$16 sps:$4 sm:$0xff]  }
 0x222   :  { %5567 = vmatpush1.bf16.msra.mxu1 %v8167_v45  ;;  %v8245_v45 = vld [vmem:[#allocation5 + $0xca8] ss:$16 sps:$4 sm:$0xff]  }
 0x223   :  { %5137 = vmatpush1.bf16.msra.mxu0 %v8164_v43  ;;  %5568 = vmatprep.subr.bf16.mxu1 %v8175_v46  ;;  %v8242_v43 = vld [vmem:[#allocation5 + $0x10a0] ss:$16 sps:$4 sm:$0xff]   ;;  %v8253_v46 = vld [vmem:[#allocation5 + $0xccc] ss:$16 sps:$4 sm:$0xff]  }
 0x224   :  { %5138 = vmatprep.subr.bf16.mxu0 %v8172_v15  ;;  %v8250_v15 = vld [vmem:[#allocation5 + $0x10c4] ss:$16 sps:$4 sm:$0xff]  }
 0x226   :  { %5569 = vmatpush1.bf16.msra.mxu1 %v8173_v49  ;;  %v8251_v49 = vld [vmem:[#allocation5 + $0xcc8] ss:$16 sps:$4 sm:$0xff]  }
 0x227   :  { %5139 = vmatpush1.bf16.msra.mxu0 %v8170_v48  ;;  %5570 = vmatprep.subr.bf16.mxu1 %v8181_v44  ;;  %v8248_v48 = vld [vmem:[#allocation5 + $0x10c0] ss:$16 sps:$4 sm:$0xff]   ;;  %v8259_v44 = vld [vmem:[#allocation5 + $0xcec] ss:$16 sps:$4 sm:$0xff]  }
 0x228   :  { %5140 = vmatprep.subr.bf16.mxu0 %v8178_v50  ;;  %v8256_v50 = vld [vmem:[#allocation5 + $0x10e4] ss:$16 sps:$4 sm:$0xff]  }
 0x22a   :  { %5571 = vmatpush1.bf16.msra.mxu1 %v8179_v52  ;;  %v8257_v52 = vld [vmem:[#allocation5 + $0xce8] ss:$16 sps:$4 sm:$0xff]  }
 0x22b   :  { %5141 = vmatpush1.bf16.msra.mxu0 %v8176_v51  ;;  %5572 = vmatprep.subr.bf16.mxu1 %v8187_v24  ;;  %v8254_v51 = vld [vmem:[#allocation5 + $0x10e0] ss:$16 sps:$4 sm:$0xff]   ;;  %v8265_v24 = vld [vmem:[#allocation5 + $0xd0c] ss:$16 sps:$4 sm:$0xff]  }
 0x22c   :  { %5142 = vmatprep.subr.bf16.mxu0 %v8184_v53  ;;  %v8262_v53 = vld [vmem:[#allocation5 + $0x1104] ss:$16 sps:$4 sm:$0xff]  }
 0x22e   :  { %5573 = vmatpush1.bf16.msra.mxu1 %v8185_v57  ;;  %v8263_v57 = vld [vmem:[#allocation5 + $0xd08] ss:$16 sps:$4 sm:$0xff]  }
 0x22f   :  { %5143 = vmatpush1.bf16.msra.mxu0 %v8182_v56  ;;  %5574 = vmatprep.subr.bf16.mxu1 %v8193_v59  ;;  %v8260_v56 = vld [vmem:[#allocation5 + $0x1100] ss:$16 sps:$4 sm:$0xff]   ;;  %v8271_v59 = vld [vmem:[#allocation5 + $0xd2c] ss:$16 sps:$4 sm:$0xff]  }
 0x230   :  { %5144 = vmatprep.subr.bf16.mxu0 %v8190_v58  ;;  %v8268_v58 = vld [vmem:[#allocation5 + $0x1124] ss:$16 sps:$4 sm:$0xff]  }
 0x232   :  { %5575 = vmatpush1.bf16.msra.mxu1 %v8191_v61  ;;  %v8269_v61 = vld [vmem:[#allocation5 + $0xd28] ss:$16 sps:$4 sm:$0xff]  }
 0x233   :  { %5145 = vmatpush1.bf16.msra.mxu0 %v8188_v60  ;;  %5576 = vmatprep.subr.bf16.mxu1 %v8199_v63  ;;  %v8266_v60 = vld [vmem:[#allocation5 + $0x1120] ss:$16 sps:$4 sm:$0xff]   ;;  %v8277_v63 = vld [vmem:[#allocation5 + $0xd4c] ss:$16 sps:$4 sm:$0xff]  }
 0x234   :  { %5146 = vmatprep.subr.bf16.mxu0 %v8196_v62  ;;  %v8274_v62 = vld [vmem:[#allocation5 + $0x1144] ss:$16 sps:$4 sm:$0xff]  }
 0x236   :  { %5577 = vmatpush1.bf16.msra.mxu1 %v8197_v1  ;;  %v8275_v1 = vld [vmem:[#allocation5 + $0xd48] ss:$16 sps:$4 sm:$0xff]  }
 0x237   :  { %5147 = vmatpush1.bf16.msra.mxu0 %v8194_v0  ;;  %5578 = vmatprep.subr.bf16.mxu1 %v8205_v34  ;;  %v8272_v0 = vld [vmem:[#allocation5 + $0x1140] ss:$16 sps:$4 sm:$0xff]   ;;  %v8283_v34 = vld [vmem:[#allocation5 + $0xd6c] ss:$16 sps:$4 sm:$0xff]  }
 0x238   :  { %5148 = vmatprep.subr.bf16.mxu0 %v8202_v4  ;;  %v8280_v4 = vld [vmem:[#allocation5 + $0x1164] ss:$16 sps:$4 sm:$0xff]  }
 0x23a   :  { %5579 = vmatpush1.bf16.msra.mxu1 %v8203_v9  ;;  %v8281_v9 = vld [vmem:[#allocation5 + $0xd68] ss:$16 sps:$4 sm:$0xff]  }
 0x23b   :  { %5149 = vmatpush1.bf16.msra.mxu0 %v8200_v8  ;;  %5580 = vmatprep.subr.bf16.mxu1 %v8211_v11  ;;  %v8278_v8 = vld [vmem:[#allocation5 + $0x1160] ss:$16 sps:$4 sm:$0xff]   ;;  %v8289_v11 = vld [vmem:[#allocation5 + $0xd8c] ss:$16 sps:$4 sm:$0xff]  }
 0x23c   :  { %5150 = vmatprep.subr.bf16.mxu0 %v8208_v10  ;;  %v8286_v10 = vld [vmem:[#allocation5 + $0x1184] ss:$16 sps:$4 sm:$0xff]  }
 0x23e   :  { %5581 = vmatpush1.bf16.msra.mxu1 %v8209_v14  ;;  %v8287_v14 = vld [vmem:[#allocation5 + $0xd88] ss:$16 sps:$4 sm:$0xff]  }
 0x23f   :  { %5151 = vmatpush1.bf16.msra.mxu0 %v8206_v13  ;;  %5593 = vmatprep.subr.bf16.mxu1 %v8217_v17  ;;  %v8284_v13 = vld [vmem:[#allocation5 + $0x1180] ss:$16 sps:$4 sm:$0xff]   ;;  %v8295_v17 = vld [vmem:[#allocation5 + $0xdac] ss:$16 sps:$4 sm:$0xff]  }
 0x240   :  { %5163 = vmatprep.subr.bf16.mxu0 %v8214_v16  ;;  %v8292_v16 = vld [vmem:[#allocation5 + $0x11a4] ss:$16 sps:$4 sm:$0xff]  }
 0x241   :  { %5583 = vmatmul.mubr.bf16.vlgmr.msra.gmra.mrb[4].mxu1 %v9181_v54  ;;  %v8235_v54 = vld [vmem:[#allocation5 + $0xc6c] ss:$16 sps:$4 sm:$0xff]  }
 0x242   :  { %5153 = vmatmul.mubr.bf16.vlgmr.msra.gmra.mrb[0].mxu0 %v9197_v21  ;;  %5594 = vmatpush1.bf16.msra.mxu1 %v8215_v23  ;;  %v8299_v23 = vld [vmem:[#allocation5 + $0xdc8] ss:$16 sps:$4 sm:$0xff]  }
 0x243   :  { %5164 = vmatpush1.bf16.msra.mxu0 %v8212_v22  ;;  %5595 = vmatprep.subr.bf16.mxu1 %v8223_v26  ;;  %v8296_v22 = vld [vmem:[#allocation5 + $0x11c0] ss:$16 sps:$4 sm:$0xff]   ;;  %v8307_v26 = vld [vmem:[#allocation5 + $0xdec] ss:$16 sps:$4 sm:$0xff]  }
 0x244   :  { %5165 = vmatprep.subr.bf16.mxu0 %v8220_v25  ;;  %5195 = vmatprep.mubr.bf16.mxu0 %v9199_v47  ;;  %v8304_v25 = vld [vmem:[#allocation5 + $0x11e4] ss:$16 sps:$4 sm:$0xff]  }
 0x245   :  { %5625 = vmatprep.mubr.bf16.mxu1 %v9183_v33  ;;  %v8239_v33 = vld [vmem:[#allocation5 + $0xc88] ss:$16 sps:$4 sm:$0xff]  }
 0x246   :  { %5596 = vmatpush1.bf16.msra.mxu1 %v8221_v28  ;;  %v8305_v28 = vld [vmem:[#allocation5 + $0xde8] ss:$16 sps:$4 sm:$0xff]  }
 0x247   :  { %5166 = vmatpush1.bf16.msra.mxu0 %v8218_v27  ;;  %5597 = vmatprep.subr.bf16.mxu1 %v8229_v30  ;;  %v8302_v27 = vld [vmem:[#allocation5 + $0x11e0] ss:$16 sps:$4 sm:$0xff]   ;;  %v8313_v30 = vld [vmem:[#allocation5 + $0xe0c] ss:$16 sps:$4 sm:$0xff]  }
 0x248   :  { %5167 = vmatprep.subr.bf16.mxu0 %v8226_v29  ;;  %v8310_v29 = vld [vmem:[#allocation5 + $0x1204] ss:$16 sps:$4 sm:$0xff]  }
 0x24a   :  { %5598 = vmatpush1.bf16.msra.mxu1 %v8227_v32  ;;  %v157_v32 = vld [vmem:[#allocation2 + $0x140] sm:$0xff] }
 0x24b   :  { %5168 = vmatpush1.bf16.msra.mxu0 %v8224_v31  ;;  %5599 = vmatprep.subr.bf16.mxu1 %v8235_v54  ;;  %v133_v31 = vld [vmem:[#allocation2 + $0x80] sm:$0xff]  ;;  %v160_v54 = vld [vmem:[#allocation2 + $0x158] sm:$0xff] }
 0x24c   :  { %5169 = vmatprep.subr.bf16.mxu0 %v8232_v35  ;;  %v136_v35 = vld [vmem:[#allocation2 + $0x98] sm:$0xff] }
 0x24e   :  { %5600 = vmatpush1.bf16.msra.mxu1 %v8233_v36  ;;  %v8308_v36 = vld [vmem:[#allocation5 + $0x1200] ss:$16 sps:$4 sm:$0xff]  }
 0x24f   :  { %5170 = vmatpush1.bf16.msra.mxu0 %v8230_v12  ;;  %5601 = vmatprep.subr.bf16.mxu1 %v8241_v39  ;;  %v9205_v12 = vpack.c.bf16 %v157_v32, %v133_v31  ;;  %v8316_v39 = vld [vmem:[#allocation5 + $0x1224] ss:$16 sps:$4 sm:$0xff]   ;;  %v8386_v31 = vld [vmem:[#allocation5 + $0x13a0] ss:$16 sps:$4 sm:$0xff]   ;;  %v8389_v32 = vld [vmem:[#allocation5 + $0xfa8] ss:$16 sps:$4 sm:$0xff]  }
 0x250   :  { %5171 = vmatprep.subr.bf16.mxu0 %v8238_v37  ;;  %v8311_v37 = vld [vmem:[#allocation5 + $0xe08] ss:$16 sps:$4 sm:$0xff]  }
 0x252   :  { %5602 = vmatpush1.bf16.msra.mxu1 %v8239_v33  ;;  %v9207_v33 = vpack.c.bf16 %v160_v54, %v136_v35  ;;  %v8394_v35 = vld [vmem:[#allocation5 + $0x13c4] ss:$16 sps:$4 sm:$0xff]   ;;  %v8397_v54 = vld [vmem:[#allocation5 + $0xfcc] ss:$16 sps:$4 sm:$0xff]  }
 0x253   :  { %5172 = vmatpush1.bf16.msra.mxu0 %v8236_v40  ;;  %5603 = vmatprep.subr.bf16.mxu1 %v8247_v55  ;;  %v8319_v40 = vld [vmem:[#allocation5 + $0xe2c] ss:$16 sps:$4 sm:$0xff]   ;;  %v8317_v55 = vld [vmem:[#allocation5 + $0xe28] ss:$16 sps:$4 sm:$0xff]  }
 0x254   :  { %5173 = vmatprep.subr.bf16.mxu0 %v8244_v41  ;;  %v8314_v41 = vld [vmem:[#allocation5 + $0x1220] ss:$16 sps:$4 sm:$0xff]  }
 0x256   :  { %5604 = vmatpush1.bf16.msra.mxu1 %v8245_v45  ;;  %v8325_v45 = vld [vmem:[#allocation5 + $0xe4c] ss:$16 sps:$4 sm:$0xff]  }
 0x257   :  { %5174 = vmatpush1.bf16.msra.mxu0 %v8242_v43  ;;  %5605 = vmatprep.subr.bf16.mxu1 %v8253_v46  ;;  %v8322_v43 = vld [vmem:[#allocation5 + $0x1244] ss:$16 sps:$4 sm:$0xff]   ;;  %v8323_v46 = vld [vmem:[#allocation5 + $0xe48] ss:$16 sps:$4 sm:$0xff]  }
 0x258   :  { %5175 = vmatprep.subr.bf16.mxu0 %v8250_v15  ;;  %v8320_v15 = vld [vmem:[#allocation5 + $0x1240] ss:$16 sps:$4 sm:$0xff]  }
 0x25a   :  { %5606 = vmatpush1.bf16.msra.mxu1 %v8251_v49  ;;  %v8326_v49 = vld [vmem:[#allocation5 + $0x1260] ss:$16 sps:$4 sm:$0xff]  }
 0x25b   :  { %5176 = vmatpush1.bf16.msra.mxu0 %v8248_v48  ;;  %5607 = vmatprep.subr.bf16.mxu1 %v8259_v44  ;;  %v8328_v48 = vld [vmem:[#allocation5 + $0x1264] ss:$16 sps:$4 sm:$0xff]  }
 0x25c   :  { %5177 = vmatprep.subr.bf16.mxu0 %v8256_v50  ;;  %v8329_v50 = vld [vmem:[#allocation5 + $0xe68] ss:$16 sps:$4 sm:$0xff]   ;;  %v8334_v44 = vld [vmem:[#allocation5 + $0x1284] ss:$16 sps:$4 sm:$0xff]  }
 0x25e   :  { %5608 = vmatpush1.bf16.msra.mxu1 %v8257_v52  ;;  %v8332_v52 = vld [vmem:[#allocation5 + $0x1280] ss:$16 sps:$4 sm:$0xff]  }
 0x25f   :  { %5178 = vmatpush1.bf16.msra.mxu0 %v8254_v51  ;;  %5609 = vmatprep.subr.bf16.mxu1 %v8265_v24  ;;  %v8337_v51 = vld [vmem:[#allocation5 + $0xe8c] ss:$16 sps:$4 sm:$0xff]  }
 0x260   :  { %5179 = vmatprep.subr.bf16.mxu0 %v8262_v53  ;;  %v8340_v53 = vld [vmem:[#allocation5 + $0x12a4] ss:$16 sps:$4 sm:$0xff]   ;;  %v8343_v24 = vld [vmem:[#allocation5 + $0xeac] ss:$16 sps:$4 sm:$0xff]  }
 0x262   :  { %5610 = vmatpush1.bf16.msra.mxu1 %v8263_v57  ;;  %v8341_v57 = vld [vmem:[#allocation5 + $0xea8] ss:$16 sps:$4 sm:$0xff]  }
 0x263   :  { %5180 = vmatpush1.bf16.msra.mxu0 %v8260_v56  ;;  %5611 = vmatprep.subr.bf16.mxu1 %v8271_v59  ;;  %v8338_v56 = vld [vmem:[#allocation5 + $0x12a0] ss:$16 sps:$4 sm:$0xff]   ;;  %v8349_v59 = vld [vmem:[#allocation5 + $0xecc] ss:$16 sps:$4 sm:$0xff]  }
 0x264   :  { %5181 = vmatprep.subr.bf16.mxu0 %v8268_v58  ;;  %v8346_v58 = vld [vmem:[#allocation5 + $0x12c4] ss:$16 sps:$4 sm:$0xff]  }
 0x266   :  { %5612 = vmatpush1.bf16.msra.mxu1 %v8269_v61  ;;  %v8347_v61 = vld [vmem:[#allocation5 + $0xec8] ss:$16 sps:$4 sm:$0xff]  }
 0x267   :  { %5182 = vmatpush1.bf16.msra.mxu0 %v8266_v60  ;;  %5613 = vmatprep.subr.bf16.mxu1 %v8277_v63  ;;  %v8344_v60 = vld [vmem:[#allocation5 + $0x12c0] ss:$16 sps:$4 sm:$0xff]   ;;  %v8355_v63 = vld [vmem:[#allocation5 + $0xeec] ss:$16 sps:$4 sm:$0xff]  }
 0x268   :  { %5183 = vmatprep.subr.bf16.mxu0 %v8274_v62  ;;  %v8352_v62 = vld [vmem:[#allocation5 + $0x12e4] ss:$16 sps:$4 sm:$0xff]  }
 0x26a   :  { %5614 = vmatpush1.bf16.msra.mxu1 %v8275_v1  ;;  %v8353_v1 = vld [vmem:[#allocation5 + $0xee8] ss:$16 sps:$4 sm:$0xff]  }
 0x26b   :  { %5184 = vmatpush1.bf16.msra.mxu0 %v8272_v0  ;;  %5615 = vmatprep.subr.bf16.mxu1 %v8283_v34  ;;  %v8350_v0 = vld [vmem:[#allocation5 + $0x12e0] ss:$16 sps:$4 sm:$0xff]   ;;  %v8361_v34 = vld [vmem:[#allocation5 + $0xf0c] ss:$16 sps:$4 sm:$0xff]  }
 0x26c   :  { %5185 = vmatprep.subr.bf16.mxu0 %v8280_v4  ;;  %v8358_v4 = vld [vmem:[#allocation5 + $0x1304] ss:$16 sps:$4 sm:$0xff]  }
 0x26e   :  { %5616 = vmatpush1.bf16.msra.mxu1 %v8281_v9  ;;  %v8359_v9 = vld [vmem:[#allocation5 + $0xf08] ss:$16 sps:$4 sm:$0xff]  }
 0x26f   :  { %5186 = vmatpush1.bf16.msra.mxu0 %v8278_v8  ;;  %5617 = vmatprep.subr.bf16.mxu1 %v8289_v11  ;;  %v8356_v8 = vld [vmem:[#allocation5 + $0x1300] ss:$16 sps:$4 sm:$0xff]   ;;  %v8367_v11 = vld [vmem:[#allocation5 + $0xf2c] ss:$16 sps:$4 sm:$0xff]  }
 0x270   :  { %5187 = vmatprep.subr.bf16.mxu0 %v8286_v10  ;;  %v8364_v10 = vld [vmem:[#allocation5 + $0x1324] ss:$16 sps:$4 sm:$0xff]  }
 0x272   :  { %5618 = vmatpush1.bf16.msra.mxu1 %v8287_v14  ;;  %v8365_v14 = vld [vmem:[#allocation5 + $0xf28] ss:$16 sps:$4 sm:$0xff]  }
 0x273   :  { %5188 = vmatpush1.bf16.msra.mxu0 %v8284_v13  ;;  %5619 = vmatprep.subr.bf16.mxu1 %v8295_v17  ;;  %v8362_v13 = vld [vmem:[#allocation5 + $0x1320] ss:$16 sps:$4 sm:$0xff]   ;;  %v8373_v17 = vld [vmem:[#allocation5 + $0xf4c] ss:$16 sps:$4 sm:$0xff]  }
 0x274   :  { %5189 = vmatprep.subr.bf16.mxu0 %v8292_v16  ;;  %v8370_v16 = vld [vmem:[#allocation5 + $0x1344] ss:$16 sps:$4 sm:$0xff]  }
 0x276   :  { %5620 = vmatpush1.bf16.msra.mxu1 %v8293_v19  ;;  %v8371_v19 = vld [vmem:[#allocation5 + $0xf48] ss:$16 sps:$4 sm:$0xff]  }
 0x277   :  { %5190 = vmatpush1.bf16.msra.mxu0 %v8290_v18  ;;  %5621 = vmatprep.subr.bf16.mxu1 %v8301_v42  ;;  %v8368_v18 = vld [vmem:[#allocation5 + $0x1340] ss:$16 sps:$4 sm:$0xff]   ;;  %v8379_v42 = vld [vmem:[#allocation5 + $0xf6c] ss:$16 sps:$4 sm:$0xff]  }
 0x278   :  { %5191 = vmatprep.subr.bf16.mxu0 %v8298_v20  ;;  %v8376_v20 = vld [vmem:[#allocation5 + $0x1364] ss:$16 sps:$4 sm:$0xff]  }
 0x27a   :  { %5622 = vmatpush1.bf16.msra.mxu1 %v8299_v23  ;;  %v8377_v23 = vld [vmem:[#allocation5 + $0xf68] ss:$16 sps:$4 sm:$0xff]  }
 0x27b   :  { %5192 = vmatpush1.bf16.msra.mxu0 %v8296_v22  ;;  %5623 = vmatprep.subr.bf16.mxu1 %v8307_v26  ;;  %v8374_v22 = vld [vmem:[#allocation5 + $0x1360] ss:$16 sps:$4 sm:$0xff]   ;;  %v8385_v26 = vld [vmem:[#allocation5 + $0xf8c] ss:$16 sps:$4 sm:$0xff]  }
 0x27c   :  { %5193 = vmatprep.subr.bf16.mxu0 %v8304_v25  ;;  %v8382_v25 = vld [vmem:[#allocation5 + $0x1384] ss:$16 sps:$4 sm:$0xff]  }
 0x27e   :  { %5624 = vmatpush1.bf16.msra.mxu1 %v8305_v28  ;;  %v8383_v28 = vld [vmem:[#allocation5 + $0xf88] ss:$16 sps:$4 sm:$0xff]  }
 0x27f   :  { %5194 = vmatpush1.bf16.msra.mxu0 %v8302_v27  ;;  %5636 = vmatprep.subr.bf16.mxu1 %v8313_v30  ;;  %v8380_v27 = vld [vmem:[#allocation5 + $0x1380] ss:$16 sps:$4 sm:$0xff]   ;;  %v8391_v30 = vld [vmem:[#allocation5 + $0xfac] ss:$16 sps:$4 sm:$0xff]  }
 0x280   :  { %5206 = vmatprep.subr.bf16.mxu0 %v8310_v29  ;;  %v8388_v29 = vld [vmem:[#allocation5 + $0x13a4] ss:$16 sps:$4 sm:$0xff]  }
 0x281   :  { %5626 = vmatmul.mubr.bf16.vlgmr.msra.gmra.mrb[4].mxu1 %v9189_v6  ;;  %v8331_v6 = vld [vmem:[#allocation5 + $0xe6c] ss:$16 sps:$4 sm:$0xff]  }
 0x282   :  { %5196 = vmatmul.mubr.bf16.vlgmr.msra.gmra.mrb[0].mxu0 %v9205_v12  ;;  %5637 = vmatpush1.bf16.msra.mxu1 %v8311_v37  ;;  %v8395_v37 = vld [vmem:[#allocation5 + $0xfc8] ss:$16 sps:$4 sm:$0xff]  }
 0x283   :  { %5207 = vmatpush1.bf16.msra.mxu0 %v8308_v36  ;;  %5638 = vmatprep.subr.bf16.mxu1 %v8319_v40  ;;  %v8392_v36 = vld [vmem:[#allocation5 + $0x13c0] ss:$16 sps:$4 sm:$0xff]   ;;  %v8403_v40 = vld [vmem:[#allocation5 + $0xfec] ss:$16 sps:$4 sm:$0xff]  }
 0x284   :  { %5208 = vmatprep.subr.bf16.mxu0 %v8316_v39  ;;  %5238 = vmatprep.mubr.bf16.mxu0 %v9207_v33  ;;  %v8400_v39 = vld [vmem:[#allocation5 + $0x13e4] ss:$16 sps:$4 sm:$0xff]  }
 0x285   :  { %5668 = vmatprep.mubr.bf16.mxu1 %v9191_v38  ;;  %v8335_v38 = vld [vmem:[#allocation5 + $0xe88] ss:$16 sps:$4 sm:$0xff]  }
 0x286   :  { %5639 = vmatpush1.bf16.msra.mxu1 %v8317_v55  ;;  %v8401_v55 = vld [vmem:[#allocation5 + $0xfe8] ss:$16 sps:$4 sm:$0xff]  }
 0x287   :  { %5209 = vmatpush1.bf16.msra.mxu0 %v8314_v41  ;;  %5640 = vmatprep.subr.bf16.mxu1 %v8325_v45  ;;  %v8398_v41 = vld [vmem:[#allocation5 + $0x13e0] ss:$16 sps:$4 sm:$0xff]  }
 0x288   :  { %5210 = vmatprep.subr.bf16.mxu0 %v8322_v43  ;;  %v135_v43 = vld [vmem:[#allocation2 + $0x90] sm:$0xff] }
 0x289   :  { %v159_v45 = vld [vmem:[#allocation2 + $0x150] sm:$0xff] }
 0x28a   :  { %5641 = vmatpush1.bf16.msra.mxu1 %v8323_v46  ;;  %v8409_v46 = vld [vmem:[#allocation5 + $0x100c] ss:$16 sps:$4 sm:$0xff]  }
 0x28b   :  { %5211 = vmatpush1.bf16.msra.mxu0 %v8320_v15  ;;  %5642 = vmatprep.subr.bf16.mxu1 %v8331_v6  ;;  %v8406_v15 = vld [vmem:[#allocation5 + $0x1404] ss:$16 sps:$4 sm:$0xff]   ;;  %v138_v6 = vld [vmem:[#allocation2 + $0xa8] sm:$0xff] }
 0x28c   :  { %5212 = vmatprep.subr.bf16.mxu0 %v8328_v48  ;;  %v9213_v48 = vpack.c.bf16 %v159_v45, %v135_v43  ;;  %v8484_v43 = vld [vmem:[#allocation5 + $0x15a4] ss:$16 sps:$4 sm:$0xff]   ;;  %v8487_v45 = vld [vmem:[#allocation5 + $0x11ac] ss:$16 sps:$4 sm:$0xff]  }
 0x28e   :  { %5643 = vmatpush1.bf16.msra.mxu1 %v8329_v50  ;;  %v8404_v50 = vld [vmem:[#allocation5 + $0x1400] ss:$16 sps:$4 sm:$0xff]  }
 0x28f   :  { %5213 = vmatpush1.bf16.msra.mxu0 %v8326_v49  ;;  %5644 = vmatprep.subr.bf16.mxu1 %v8337_v51  ;;  %v162_v49 = vld [vmem:[#allocation2 + $0x168] sm:$0xff]  ;;  %v8412_v51 = vld [vmem:[#allocation5 + $0x1424] ss:$16 sps:$4 sm:$0xff]  }
 0x290   :  { %5214 = vmatprep.subr.bf16.mxu0 %v8334_v44  ;;  %v8407_v44 = vld [vmem:[#allocation5 + $0x1008] ss:$16 sps:$4 sm:$0xff]  }
 0x292   :  { %5645 = vmatpush1.bf16.msra.mxu1 %v8335_v38  ;;  %v9215_v38 = vpack.c.bf16 %v162_v49, %v138_v6  ;;  %v8490_v6 = vld [vmem:[#allocation5 + $0x15c4] ss:$16 sps:$4 sm:$0xff]   ;;  %v8493_v49 = vld [vmem:[#allocation5 + $0x11cc] ss:$16 sps:$4 sm:$0xff]  }
 0x293   :  { %5215 = vmatpush1.bf16.msra.mxu0 %v8332_v52  ;;  %5646 = vmatprep.subr.bf16.mxu1 %v8343_v24  ;;  %v8415_v52 = vld [vmem:[#allocation5 + $0x102c] ss:$16 sps:$4 sm:$0xff]   ;;  %v8413_v24 = vld [vmem:[#allocation5 + $0x1028] ss:$16 sps:$4 sm:$0xff]  }
 0x294   :  { %5216 = vmatprep.subr.bf16.mxu0 %v8340_v53  ;;  %v8410_v53 = vld [vmem:[#allocation5 + $0x1420] ss:$16 sps:$4 sm:$0xff]  }
 0x296   :  { %5647 = vmatpush1.bf16.msra.mxu1 %v8341_v57  ;;  %v8421_v57 = vld [vmem:[#allocation5 + $0x104c] ss:$16 sps:$4 sm:$0xff]  }
 0x297   :  { %5217 = vmatpush1.bf16.msra.mxu0 %v8338_v56  ;;  %5648 = vmatprep.subr.bf16.mxu1 %v8349_v59  ;;  %v8418_v56 = vld [vmem:[#allocation5 + $0x1444] ss:$16 sps:$4 sm:$0xff]   ;;  %v8419_v59 = vld [vmem:[#allocation5 + $0x1048] ss:$16 sps:$4 sm:$0xff]  }
 0x298   :  { %5218 = vmatprep.subr.bf16.mxu0 %v8346_v58  ;;  %v8416_v58 = vld [vmem:[#allocation5 + $0x1440] ss:$16 sps:$4 sm:$0xff]  }
 0x29a   :  { %5649 = vmatpush1.bf16.msra.mxu1 %v8347_v61  ;;  %v8422_v61 = vld [vmem:[#allocation5 + $0x1460] ss:$16 sps:$4 sm:$0xff]  }
 0x29b   :  { %5219 = vmatpush1.bf16.msra.mxu0 %v8344_v60  ;;  %5650 = vmatprep.subr.bf16.mxu1 %v8355_v63  ;;  %v8424_v60 = vld [vmem:[#allocation5 + $0x1464] ss:$16 sps:$4 sm:$0xff]  }
 0x29c   :  { %5220 = vmatprep.subr.bf16.mxu0 %v8352_v62  ;;  %v8425_v62 = vld [vmem:[#allocation5 + $0x1068] ss:$16 sps:$4 sm:$0xff]   ;;  %v8430_v63 = vld [vmem:[#allocation5 + $0x1484] ss:$16 sps:$4 sm:$0xff]  }
 0x29e   :  { %5651 = vmatpush1.bf16.msra.mxu1 %v8353_v1  ;;  %v8428_v1 = vld [vmem:[#allocation5 + $0x1480] ss:$16 sps:$4 sm:$0xff]  }
 0x29f   :  { %5221 = vmatpush1.bf16.msra.mxu0 %v8350_v0  ;;  %5652 = vmatprep.subr.bf16.mxu1 %v8361_v34  ;;  %v8433_v0 = vld [vmem:[#allocation5 + $0x108c] ss:$16 sps:$4 sm:$0xff]  }
 0x2a0   :  { %5222 = vmatprep.subr.bf16.mxu0 %v8358_v4  ;;  %v8436_v4 = vld [vmem:[#allocation5 + $0x14a4] ss:$16 sps:$4 sm:$0xff]   ;;  %v8439_v34 = vld [vmem:[#allocation5 + $0x10ac] ss:$16 sps:$4 sm:$0xff]  }
 0x2a2   :  { %5653 = vmatpush1.bf16.msra.mxu1 %v8359_v9  ;;  %v8437_v9 = vld [vmem:[#allocation5 + $0x10a8] ss:$16 sps:$4 sm:$0xff]  }
 0x2a3   :  { %5223 = vmatpush1.bf16.msra.mxu0 %v8356_v8  ;;  %5654 = vmatprep.subr.bf16.mxu1 %v8367_v11  ;;  %v8434_v8 = vld [vmem:[#allocation5 + $0x14a0] ss:$16 sps:$4 sm:$0xff]   ;;  %v8445_v11 = vld [vmem:[#allocation5 + $0x10cc] ss:$16 sps:$4 sm:$0xff]  }
 0x2a4   :  { %5224 = vmatprep.subr.bf16.mxu0 %v8364_v10  ;;  %v8442_v10 = vld [vmem:[#allocation5 + $0x14c4] ss:$16 sps:$4 sm:$0xff]  }
 0x2a6   :  { %5655 = vmatpush1.bf16.msra.mxu1 %v8365_v14  ;;  %v8443_v14 = vld [vmem:[#allocation5 + $0x10c8] ss:$16 sps:$4 sm:$0xff]  }
 0x2a7   :  { %5225 = vmatpush1.bf16.msra.mxu0 %v8362_v13  ;;  %5656 = vmatprep.subr.bf16.mxu1 %v8373_v17  ;;  %v8440_v13 = vld [vmem:[#allocation5 + $0x14c0] ss:$16 sps:$4 sm:$0xff]   ;;  %v8451_v17 = vld [vmem:[#allocation5 + $0x10ec] ss:$16 sps:$4 sm:$0xff]  }
 0x2a8   :  { %5226 = vmatprep.subr.bf16.mxu0 %v8370_v16  ;;  %v8448_v16 = vld [vmem:[#allocation5 + $0x14e4] ss:$16 sps:$4 sm:$0xff]  }
 0x2aa   :  { %5657 = vmatpush1.bf16.msra.mxu1 %v8371_v19  ;;  %v8449_v19 = vld [vmem:[#allocation5 + $0x10e8] ss:$16 sps:$4 sm:$0xff]  }
 0x2ab   :  { %5227 = vmatpush1.bf16.msra.mxu0 %v8368_v18  ;;  %5658 = vmatprep.subr.bf16.mxu1 %v8379_v42  ;;  %v8446_v18 = vld [vmem:[#allocation5 + $0x14e0] ss:$16 sps:$4 sm:$0xff]   ;;  %v8457_v42 = vld [vmem:[#allocation5 + $0x110c] ss:$16 sps:$4 sm:$0xff]  }
 0x2ac   :  { %5228 = vmatprep.subr.bf16.mxu0 %v8376_v20  ;;  %v8454_v20 = vld [vmem:[#allocation5 + $0x1504] ss:$16 sps:$4 sm:$0xff]  }
 0x2ae   :  { %5659 = vmatpush1.bf16.msra.mxu1 %v8377_v23  ;;  %v8455_v23 = vld [vmem:[#allocation5 + $0x1108] ss:$16 sps:$4 sm:$0xff]  }
 0x2af   :  { %5229 = vmatpush1.bf16.msra.mxu0 %v8374_v22  ;;  %5660 = vmatprep.subr.bf16.mxu1 %v8385_v26  ;;  %v8452_v22 = vld [vmem:[#allocation5 + $0x1500] ss:$16 sps:$4 sm:$0xff]   ;;  %v8463_v26 = vld [vmem:[#allocation5 + $0x112c] ss:$16 sps:$4 sm:$0xff]  }
 0x2b0   :  { %5230 = vmatprep.subr.bf16.mxu0 %v8382_v25  ;;  %v8460_v25 = vld [vmem:[#allocation5 + $0x1524] ss:$16 sps:$4 sm:$0xff]  }
 0x2b2   :  { %5661 = vmatpush1.bf16.msra.mxu1 %v8383_v28  ;;  %v8461_v28 = vld [vmem:[#allocation5 + $0x1128] ss:$16 sps:$4 sm:$0xff]  }
 0x2b3   :  { %5231 = vmatpush1.bf16.msra.mxu0 %v8380_v27  ;;  %5662 = vmatprep.subr.bf16.mxu1 %v8391_v30  ;;  %v8458_v27 = vld [vmem:[#allocation5 + $0x1520] ss:$16 sps:$4 sm:$0xff]   ;;  %v8469_v30 = vld [vmem:[#allocation5 + $0x114c] ss:$16 sps:$4 sm:$0xff]  }
 0x2b4   :  { %5232 = vmatprep.subr.bf16.mxu0 %v8388_v29  ;;  %v8466_v29 = vld [vmem:[#allocation5 + $0x1544] ss:$16 sps:$4 sm:$0xff]  }
 0x2b6   :  { %5663 = vmatpush1.bf16.msra.mxu1 %v8389_v32  ;;  %v8467_v32 = vld [vmem:[#allocation5 + $0x1148] ss:$16 sps:$4 sm:$0xff]  }
 0x2b7   :  { %5233 = vmatpush1.bf16.msra.mxu0 %v8386_v31  ;;  %5664 = vmatprep.subr.bf16.mxu1 %v8397_v54  ;;  %v8464_v31 = vld [vmem:[#allocation5 + $0x1540] ss:$16 sps:$4 sm:$0xff]   ;;  %v8475_v54 = vld [vmem:[#allocation5 + $0x116c] ss:$16 sps:$4 sm:$0xff]  }
 0x2b8   :  { %5234 = vmatprep.subr.bf16.mxu0 %v8394_v35  ;;  %v8472_v35 = vld [vmem:[#allocation5 + $0x1564] ss:$16 sps:$4 sm:$0xff]  }
 0x2ba   :  { %5665 = vmatpush1.bf16.msra.mxu1 %v8395_v37  ;;  %v8473_v37 = vld [vmem:[#allocation5 + $0x1168] ss:$16 sps:$4 sm:$0xff]  }
 0x2bb   :  { %5235 = vmatpush1.bf16.msra.mxu0 %v8392_v36  ;;  %5666 = vmatprep.subr.bf16.mxu1 %v8403_v40  ;;  %v8470_v36 = vld [vmem:[#allocation5 + $0x1560] ss:$16 sps:$4 sm:$0xff]   ;;  %v8481_v40 = vld [vmem:[#allocation5 + $0x118c] ss:$16 sps:$4 sm:$0xff]  }
 0x2bc   :  { %5236 = vmatprep.subr.bf16.mxu0 %v8400_v39  ;;  %v8478_v39 = vld [vmem:[#allocation5 + $0x1584] ss:$16 sps:$4 sm:$0xff]  }
 0x2be   :  { %5667 = vmatpush1.bf16.msra.mxu1 %v8401_v55  ;;  %v8479_v55 = vld [vmem:[#allocation5 + $0x1188] ss:$16 sps:$4 sm:$0xff]  }
 0x2bf   :  { %5237 = vmatpush1.bf16.msra.mxu0 %v8398_v41  ;;  %5679 = vmatprep.subr.bf16.mxu1 %v8409_v46  ;;  %v8476_v41 = vld [vmem:[#allocation5 + $0x1580] ss:$16 sps:$4 sm:$0xff]   ;;  %v8485_v46 = vld [vmem:[#allocation5 + $0x11a8] ss:$16 sps:$4 sm:$0xff]  }
 0x2c0   :  { %5249 = vmatprep.subr.bf16.mxu0 %v8406_v15  ;;  %v8482_v15 = vld [vmem:[#allocation5 + $0x15a0] ss:$16 sps:$4 sm:$0xff]  }
 0x2c1   :  { %5669 = vmatmul.mubr.bf16.vlgmr.msra.gmra.mrb[4].mxu1 %v9197_v21  ;;  %v8427_v21 = vld [vmem:[#allocation5 + $0x106c] ss:$16 sps:$4 sm:$0xff]  }
 0x2c2   :  { %5239 = vmatmul.mubr.bf16.vlgmr.msra.gmra.mrb[0].mxu0 %v9213_v48  ;;  %5680 = vmatpush1.bf16.msra.mxu1 %v8407_v44  ;;  %v8491_v44 = vld [vmem:[#allocation5 + $0x11c8] ss:$16 sps:$4 sm:$0xff]  }
 0x2c3   :  { %5250 = vmatpush1.bf16.msra.mxu0 %v8404_v50  ;;  %5681 = vmatprep.subr.bf16.mxu1 %v8415_v52  ;;  %v8488_v50 = vld [vmem:[#allocation5 + $0x15c0] ss:$16 sps:$4 sm:$0xff]   ;;  %v8499_v52 = vld [vmem:[#allocation5 + $0x11ec] ss:$16 sps:$4 sm:$0xff]  }
 0x2c4   :  { %5251 = vmatprep.subr.bf16.mxu0 %v8412_v51  ;;  %5281 = vmatprep.mubr.bf16.mxu0 %v9215_v38  ;;  %v8496_v51 = vld [vmem:[#allocation5 + $0x15e4] ss:$16 sps:$4 sm:$0xff]  }
 0x2c5   :  { %5711 = vmatprep.mubr.bf16.mxu1 %v9199_v47  ;;  %v8431_v47 = vld [vmem:[#allocation5 + $0x1088] ss:$16 sps:$4 sm:$0xff]  }
 0x2c6   :  { %5682 = vmatpush1.bf16.msra.mxu1 %v8413_v24  ;;  %v8497_v24 = vld [vmem:[#allocation5 + $0x11e8] ss:$16 sps:$4 sm:$0xff]  }
 0x2c7   :  { %5252 = vmatpush1.bf16.msra.mxu0 %v8410_v53  ;;  %5683 = vmatprep.subr.bf16.mxu1 %v8421_v57  ;;  %v8494_v53 = vld [vmem:[#allocation5 + $0x15e0] ss:$16 sps:$4 sm:$0xff]  }
 0x2c8   :  { %5253 = vmatprep.subr.bf16.mxu0 %v8418_v56  ;;  %v137_v56 = vld [vmem:[#allocation2 + $0xa0] sm:$0xff] }
 0x2c9   :  { %v161_v57 = vld [vmem:[#allocation2 + $0x160] sm:$0xff] }
 0x2ca   :  { %5684 = vmatpush1.bf16.msra.mxu1 %v8419_v59  ;;  %v8505_v59 = vld [vmem:[#allocation5 + $0x120c] ss:$16 sps:$4 sm:$0xff]  }
 0x2cb   :  { %5254 = vmatpush1.bf16.msra.mxu0 %v8416_v58  ;;  %5685 = vmatprep.subr.bf16.mxu1 %v8427_v21  ;;  %v8502_v58 = vld [vmem:[#allocation5 + $0x1604] ss:$16 sps:$4 sm:$0xff]   ;;  %v140_v21 = vld [vmem:[#allocation2 + $0xb8] sm:$0xff] }
 0x2cc   :  { %5255 = vmatprep.subr.bf16.mxu0 %v8424_v60  ;;  %v9221_v60 = vpack.c.bf16 %v161_v57, %v137_v56  ;;  %v8580_v56 = vld [vmem:[#allocation5 + $0x17a4] ss:$16 sps:$4 sm:$0xff]   ;;  %v8583_v57 = vld [vmem:[#allocation5 + $0x13ac] ss:$16 sps:$4 sm:$0xff]  }
 0x2ce   :  { %5686 = vmatpush1.bf16.msra.mxu1 %v8425_v62  ;;  %v8500_v62 = vld [vmem:[#allocation5 + $0x1600] ss:$16 sps:$4 sm:$0xff]  }
 0x2cf   :  { %5256 = vmatpush1.bf16.msra.mxu0 %v8422_v61  ;;  %5687 = vmatprep.subr.bf16.mxu1 %v8433_v0  ;;  %v164_v61 = vld [vmem:[#allocation2 + $0x178] sm:$0xff]  ;;  %v8508_v0 = vld [vmem:[#allocation5 + $0x1624] ss:$16 sps:$4 sm:$0xff]  }
 0x2d0   :  { %5257 = vmatprep.subr.bf16.mxu0 %v8430_v63  ;;  %v8503_v63 = vld [vmem:[#allocation5 + $0x1208] ss:$16 sps:$4 sm:$0xff]  }
 0x2d2   :  { %5688 = vmatpush1.bf16.msra.mxu1 %v8431_v47  ;;  %v9223_v47 = vpack.c.bf16 %v164_v61, %v140_v21  ;;  %v8586_v21 = vld [vmem:[#allocation5 + $0x17c4] ss:$16 sps:$4 sm:$0xff]   ;;  %v8589_v61 = vld [vmem:[#allocation5 + $0x13cc] ss:$16 sps:$4 sm:$0xff]  }
 0x2d3   :  { %5258 = vmatpush1.bf16.msra.mxu0 %v8428_v1  ;;  %5689 = vmatprep.subr.bf16.mxu1 %v8439_v34  ;;  %v8511_v1 = vld [vmem:[#allocation5 + $0x122c] ss:$16 sps:$4 sm:$0xff]   ;;  %v8509_v34 = vld [vmem:[#allocation5 + $0x1228] ss:$16 sps:$4 sm:$0xff]  }
 0x2d4   :  { %5259 = vmatprep.subr.bf16.mxu0 %v8436_v4  ;;  %v8506_v4 = vld [vmem:[#allocation5 + $0x1620] ss:$16 sps:$4 sm:$0xff]  }
 0x2d6   :  { %5690 = vmatpush1.bf16.msra.mxu1 %v8437_v9  ;;  %v8517_v9 = vld [vmem:[#allocation5 + $0x124c] ss:$16 sps:$4 sm:$0xff]  }
 0x2d7   :  { %5260 = vmatpush1.bf16.msra.mxu0 %v8434_v8  ;;  %5691 = vmatprep.subr.bf16.mxu1 %v8445_v11  ;;  %v8514_v8 = vld [vmem:[#allocation5 + $0x1644] ss:$16 sps:$4 sm:$0xff]   ;;  %v8515_v11 = vld [vmem:[#allocation5 + $0x1248] ss:$16 sps:$4 sm:$0xff]  }
 0x2d8   :  { %5261 = vmatprep.subr.bf16.mxu0 %v8442_v10  ;;  %v8512_v10 = vld [vmem:[#allocation5 + $0x1640] ss:$16 sps:$4 sm:$0xff]  }
 0x2da   :  { %5692 = vmatpush1.bf16.msra.mxu1 %v8443_v14  ;;  %v8518_v14 = vld [vmem:[#allocation5 + $0x1660] ss:$16 sps:$4 sm:$0xff]  }
 0x2db   :  { %5262 = vmatpush1.bf16.msra.mxu0 %v8440_v13  ;;  %5693 = vmatprep.subr.bf16.mxu1 %v8451_v17  ;;  %v8520_v13 = vld [vmem:[#allocation5 + $0x1664] ss:$16 sps:$4 sm:$0xff]  }
 0x2dc   :  { %5263 = vmatprep.subr.bf16.mxu0 %v8448_v16  ;;  %v8521_v16 = vld [vmem:[#allocation5 + $0x1268] ss:$16 sps:$4 sm:$0xff]   ;;  %v8526_v17 = vld [vmem:[#allocation5 + $0x1684] ss:$16 sps:$4 sm:$0xff]  }
 0x2de   :  { %5694 = vmatpush1.bf16.msra.mxu1 %v8449_v19  ;;  %v8524_v19 = vld [vmem:[#allocation5 + $0x1680] ss:$16 sps:$4 sm:$0xff]  }
 0x2df   :  { %5264 = vmatpush1.bf16.msra.mxu0 %v8446_v18  ;;  %5695 = vmatprep.subr.bf16.mxu1 %v8457_v42  ;;  %v8529_v18 = vld [vmem:[#allocation5 + $0x128c] ss:$16 sps:$4 sm:$0xff]  }
 0x2e0   :  { %5265 = vmatprep.subr.bf16.mxu0 %v8454_v20  ;;  %v8532_v20 = vld [vmem:[#allocation5 + $0x16a4] ss:$16 sps:$4 sm:$0xff]   ;;  %v8535_v42 = vld [vmem:[#allocation5 + $0x12ac] ss:$16 sps:$4 sm:$0xff]  }
 0x2e2   :  { %5696 = vmatpush1.bf16.msra.mxu1 %v8455_v23  ;;  %v8533_v23 = vld [vmem:[#allocation5 + $0x12a8] ss:$16 sps:$4 sm:$0xff]  }
 0x2e3   :  { %5266 = vmatpush1.bf16.msra.mxu0 %v8452_v22  ;;  %5697 = vmatprep.subr.bf16.mxu1 %v8463_v26  ;;  %v8530_v22 = vld [vmem:[#allocation5 + $0x16a0] ss:$16 sps:$4 sm:$0xff]   ;;  %v8541_v26 = vld [vmem:[#allocation5 + $0x12cc] ss:$16 sps:$4 sm:$0xff]  }
 0x2e4   :  { %5267 = vmatprep.subr.bf16.mxu0 %v8460_v25  ;;  %v8538_v25 = vld [vmem:[#allocation5 + $0x16c4] ss:$16 sps:$4 sm:$0xff]  }
 0x2e6   :  { %5698 = vmatpush1.bf16.msra.mxu1 %v8461_v28  ;;  %v8539_v28 = vld [vmem:[#allocation5 + $0x12c8] ss:$16 sps:$4 sm:$0xff]  }
 0x2e7   :  { %5268 = vmatpush1.bf16.msra.mxu0 %v8458_v27  ;;  %5699 = vmatprep.subr.bf16.mxu1 %v8469_v30  ;;  %v8536_v27 = vld [vmem:[#allocation5 + $0x16c0] ss:$16 sps:$4 sm:$0xff]   ;;  %v8547_v30 = vld [vmem:[#allocation5 + $0x12ec] ss:$16 sps:$4 sm:$0xff]  }
 0x2e8   :  { %5269 = vmatprep.subr.bf16.mxu0 %v8466_v29  ;;  %v8544_v29 = vld [vmem:[#allocation5 + $0x16e4] ss:$16 sps:$4 sm:$0xff]  }
 0x2ea   :  { %5700 = vmatpush1.bf16.msra.mxu1 %v8467_v32  ;;  %v8545_v32 = vld [vmem:[#allocation5 + $0x12e8] ss:$16 sps:$4 sm:$0xff]  }
 0x2eb   :  { %5270 = vmatpush1.bf16.msra.mxu0 %v8464_v31  ;;  %5701 = vmatprep.subr.bf16.mxu1 %v8475_v54  ;;  %v8542_v31 = vld [vmem:[#allocation5 + $0x16e0] ss:$16 sps:$4 sm:$0xff]   ;;  %v8553_v54 = vld [vmem:[#allocation5 + $0x130c] ss:$16 sps:$4 sm:$0xff]  }
 0x2ec   :  { %5271 = vmatprep.subr.bf16.mxu0 %v8472_v35  ;;  %v8550_v35 = vld [vmem:[#allocation5 + $0x1704] ss:$16 sps:$4 sm:$0xff]  }
 0x2ee   :  { %5702 = vmatpush1.bf16.msra.mxu1 %v8473_v37  ;;  %v8551_v37 = vld [vmem:[#allocation5 + $0x1308] ss:$16 sps:$4 sm:$0xff]  }
 0x2ef   :  { %5272 = vmatpush1.bf16.msra.mxu0 %v8470_v36  ;;  %5703 = vmatprep.subr.bf16.mxu1 %v8481_v40  ;;  %v8548_v36 = vld [vmem:[#allocation5 + $0x1700] ss:$16 sps:$4 sm:$0xff]   ;;  %v8559_v40 = vld [vmem:[#allocation5 + $0x132c] ss:$16 sps:$4 sm:$0xff]  }
 0x2f0   :  { %5273 = vmatprep.subr.bf16.mxu0 %v8478_v39  ;;  %v8556_v39 = vld [vmem:[#allocation5 + $0x1724] ss:$16 sps:$4 sm:$0xff]  }
 0x2f2   :  { %5704 = vmatpush1.bf16.msra.mxu1 %v8479_v55  ;;  %v8557_v55 = vld [vmem:[#allocation5 + $0x1328] ss:$16 sps:$4 sm:$0xff]  }
 0x2f3   :  { %5274 = vmatpush1.bf16.msra.mxu0 %v8476_v41  ;;  %5705 = vmatprep.subr.bf16.mxu1 %v8487_v45  ;;  %v8554_v41 = vld [vmem:[#allocation5 + $0x1720] ss:$16 sps:$4 sm:$0xff]   ;;  %v8565_v45 = vld [vmem:[#allocation5 + $0x134c] ss:$16 sps:$4 sm:$0xff]  }
 0x2f4   :  { %5275 = vmatprep.subr.bf16.mxu0 %v8484_v43  ;;  %v8562_v43 = vld [vmem:[#allocation5 + $0x1744] ss:$16 sps:$4 sm:$0xff]  }
 0x2f6   :  { %5706 = vmatpush1.bf16.msra.mxu1 %v8485_v46  ;;  %v8563_v46 = vld [vmem:[#allocation5 + $0x1348] ss:$16 sps:$4 sm:$0xff]  }
 0x2f7   :  { %5276 = vmatpush1.bf16.msra.mxu0 %v8482_v15  ;;  %5707 = vmatprep.subr.bf16.mxu1 %v8493_v49  ;;  %v8560_v15 = vld [vmem:[#allocation5 + $0x1740] ss:$16 sps:$4 sm:$0xff]   ;;  %v8571_v49 = vld [vmem:[#allocation5 + $0x136c] ss:$16 sps:$4 sm:$0xff]  }
 0x2f8   :  { %5277 = vmatprep.subr.bf16.mxu0 %v8490_v6  ;;  %v8568_v6 = vld [vmem:[#allocation5 + $0x1764] ss:$16 sps:$4 sm:$0xff]  }
 0x2fa   :  { %5708 = vmatpush1.bf16.msra.mxu1 %v8491_v44  ;;  %v8569_v44 = vld [vmem:[#allocation5 + $0x1368] ss:$16 sps:$4 sm:$0xff]  }
 0x2fb   :  { %5278 = vmatpush1.bf16.msra.mxu0 %v8488_v50  ;;  %5709 = vmatprep.subr.bf16.mxu1 %v8499_v52  ;;  %v8566_v50 = vld [vmem:[#allocation5 + $0x1760] ss:$16 sps:$4 sm:$0xff]   ;;  %v8577_v52 = vld [vmem:[#allocation5 + $0x138c] ss:$16 sps:$4 sm:$0xff]  }
 0x2fc   :  { %5279 = vmatprep.subr.bf16.mxu0 %v8496_v51  ;;  %v8574_v51 = vld [vmem:[#allocation5 + $0x1784] ss:$16 sps:$4 sm:$0xff]  }
 0x2fe   :  { %5710 = vmatpush1.bf16.msra.mxu1 %v8497_v24  ;;  %v8575_v24 = vld [vmem:[#allocation5 + $0x1388] ss:$16 sps:$4 sm:$0xff]  }
 0x2ff   :  { %5280 = vmatpush1.bf16.msra.mxu0 %v8494_v53  ;;  %5722 = vmatprep.subr.bf16.mxu1 %v8505_v59  ;;  %v8572_v53 = vld [vmem:[#allocation5 + $0x1780] ss:$16 sps:$4 sm:$0xff]   ;;  %v8581_v59 = vld [vmem:[#allocation5 + $0x13a8] ss:$16 sps:$4 sm:$0xff]  }
 0x300   :  { %5292 = vmatprep.subr.bf16.mxu0 %v8502_v58  ;;  %v8578_v58 = vld [vmem:[#allocation5 + $0x17a0] ss:$16 sps:$4 sm:$0xff]  }
 0x301   :  { %5712 = vmatmul.mubr.bf16.vlgmr.msra.gmra.mrb[4].mxu1 %v9205_v12  ;;  %v8523_v12 = vld [vmem:[#allocation5 + $0x126c] ss:$16 sps:$4 sm:$0xff]  }
 0x302   :  { %5282 = vmatmul.mubr.bf16.vlgmr.msra.gmra.mrb[0].mxu0 %v9221_v60  ;;  %5723 = vmatpush1.bf16.msra.mxu1 %v8503_v63  ;;  %v8587_v63 = vld [vmem:[#allocation5 + $0x13c8] ss:$16 sps:$4 sm:$0xff]  }
 0x303   :  { %5293 = vmatpush1.bf16.msra.mxu0 %v8500_v62  ;;  %5724 = vmatprep.subr.bf16.mxu1 %v8511_v1  ;;  %v8584_v62 = vld [vmem:[#allocation5 + $0x17c0] ss:$16 sps:$4 sm:$0xff]   ;;  %v8595_v1 = vld [vmem:[#allocation5 + $0x13ec] ss:$16 sps:$4 sm:$0xff]  }
 0x304   :  { %5294 = vmatprep.subr.bf16.mxu0 %v8508_v0  ;;  %5324 = vmatprep.mubr.bf16.mxu0 %v9223_v47  ;;  %v8592_v0 = vld [vmem:[#allocation5 + $0x17e4] ss:$16 sps:$4 sm:$0xff]  }
 0x305   :  { %5754 = vmatprep.mubr.bf16.mxu1 %v9207_v33  ;;  %v8527_v33 = vld [vmem:[#allocation5 + $0x1288] ss:$16 sps:$4 sm:$0xff]  }
 0x306   :  { %5725 = vmatpush1.bf16.msra.mxu1 %v8509_v34  ;;  %v8593_v34 = vld [vmem:[#allocation5 + $0x13e8] ss:$16 sps:$4 sm:$0xff]  }
 0x307   :  { %5295 = vmatpush1.bf16.msra.mxu0 %v8506_v4  ;;  %5726 = vmatprep.subr.bf16.mxu1 %v8517_v9  ;;  %v8590_v4 = vld [vmem:[#allocation5 + $0x17e0] ss:$16 sps:$4 sm:$0xff]  }
 0x308   :  { %5296 = vmatprep.subr.bf16.mxu0 %v8514_v8  ;;  %v139_v8 = vld [vmem:[#allocation2 + $0xb0] sm:$0xff] }
 0x309   :  { %v163_v9 = vld [vmem:[#allocation2 + $0x170] sm:$0xff] }
 0x30a   :  { %5727 = vmatpush1.bf16.msra.mxu1 %v8515_v11  ;;  %v9229_v11 = vpack.c.bf16 %v163_v9, %v139_v8  ;;  %v8640_v8 = vld [vmem:[#allocation5 + $0x15cc] ss:$16 sps:$4 sm:$0xff]  }
 0x30b   :  { %5297 = vmatpush1.bf16.msra.mxu0 %v8512_v10  ;;  %5728 = vmatprep.subr.bf16.mxu1 %v8523_v12  ;;  %v8598_v10 = vld [vmem:[#allocation5 + $0x140c] ss:$16 sps:$4 sm:$0xff]  }
 0x30c   :  { %5298 = vmatprep.subr.bf16.mxu0 %v8520_v13  ;;  %v8596_v13 = vld [vmem:[#allocation5 + $0x1408] ss:$16 sps:$4 sm:$0xff]   ;;  %v8601_v12 = vld [vmem:[#allocation5 + $0x142c] ss:$16 sps:$4 sm:$0xff]  }
 0x30d   :  { %v8731_v9 = vld [vmem:[#allocation8 + $0xd0] ss:$8 sps:$4 sm:$0xff]  }
 0x30e   :  { %5729 = vmatpush1.bf16.msra.mxu1 %v8521_v16  ;;  %v8694_v16 = vld [vmem:[#allocation8 + $0x4] ss:$8 sps:$4 sm:$0xff]  }
 0x30f   :  { %5299 = vmatpush1.bf16.msra.mxu0 %v8518_v14  ;;  %5730 = vmatprep.subr.bf16.mxu1 %v8529_v18  ;;  %v8692_v14 = vld [vmem:[#allocation8] ss:$8 sps:$4 sm:$0xff]   ;;  %v8697_v18 = vld [vmem:[#allocation8 + $0x14] ss:$8 sps:$4 sm:$0xff]  }
 0x310   :  { %5300 = vmatprep.subr.bf16.mxu0 %v8526_v17  ;;  %v8599_v17 = vld [vmem:[#allocation5 + $0x1428] ss:$16 sps:$4 sm:$0xff]  }
 0x312   :  { %5731 = vmatpush1.bf16.msra.mxu1 %v8527_v33  ;;  %v8695_v33 = vld [vmem:[#allocation8 + $0x10] ss:$8 sps:$4 sm:$0xff]  }
 0x313   :  { %5301 = vmatpush1.bf16.msra.mxu0 %v8524_v19  ;;  %5732 = vmatprep.subr.bf16.mxu1 %v8535_v42  ;;  %v8604_v19 = vld [vmem:[#allocation5 + $0x144c] ss:$16 sps:$4 sm:$0xff]   ;;  %v8602_v42 = vld [vmem:[#allocation5 + $0x1448] ss:$16 sps:$4 sm:$0xff]  }
 0x314   :  { %5302 = vmatprep.subr.bf16.mxu0 %v8532_v20  ;;  %v8700_v20 = vld [vmem:[#allocation8 + $0x24] ss:$8 sps:$4 sm:$0xff]  }
 0x316   :  { %5733 = vmatpush1.bf16.msra.mxu1 %v8533_v23  ;;  %v8703_v23 = vld [vmem:[#allocation8 + $0x34] ss:$8 sps:$4 sm:$0xff]  }
 0x317   :  { %5303 = vmatpush1.bf16.msra.mxu0 %v8530_v22  ;;  %5734 = vmatprep.subr.bf16.mxu1 %v8541_v26  ;;  %v8607_v22 = vld [vmem:[#allocation5 + $0x146c] ss:$16 sps:$4 sm:$0xff]  }
 0x318   :  { %5304 = vmatprep.subr.bf16.mxu0 %v8538_v25  ;;  %v8605_v25 = vld [vmem:[#allocation5 + $0x1468] ss:$16 sps:$4 sm:$0xff]   ;;  %v8701_v26 = vld [vmem:[#allocation8 + $0x30] ss:$8 sps:$4 sm:$0xff]  }
 0x31a   :  { %5735 = vmatpush1.bf16.msra.mxu1 %v8539_v28  ;;  %v8608_v28 = vld [vmem:[#allocation5 + $0x1488] ss:$16 sps:$4 sm:$0xff]  }
 0x31b   :  { %5305 = vmatpush1.bf16.msra.mxu0 %v8536_v27  ;;  %5736 = vmatprep.subr.bf16.mxu1 %v8547_v30  ;;  %v8706_v27 = vld [vmem:[#allocation8 + $0x44] ss:$8 sps:$4 sm:$0xff]   ;;  %v8704_v30 = vld [vmem:[#allocation8 + $0x40] ss:$8 sps:$4 sm:$0xff]  }
 0x31c   :  { %5306 = vmatprep.subr.bf16.mxu0 %v8544_v29  ;;  %v8613_v29 = vld [vmem:[#allocation5 + $0x14ac] ss:$16 sps:$4 sm:$0xff]  }
 0x31e   :  { %5737 = vmatpush1.bf16.msra.mxu1 %v8545_v32  ;;  %v8611_v32 = vld [vmem:[#allocation5 + $0x14a8] ss:$16 sps:$4 sm:$0xff]  }
 0x31f   :  { %5307 = vmatpush1.bf16.msra.mxu0 %v8542_v31  ;;  %5738 = vmatprep.subr.bf16.mxu1 %v8553_v54  ;;  %v8709_v31 = vld [vmem:[#allocation8 + $0x54] ss:$8 sps:$4 sm:$0xff]   ;;  %v8707_v54 = vld [vmem:[#allocation8 + $0x50] ss:$8 sps:$4 sm:$0xff]  }
 0x320   :  { %5308 = vmatprep.subr.bf16.mxu0 %v8550_v35  ;;  %v8616_v35 = vld [vmem:[#allocation5 + $0x14cc] ss:$16 sps:$4 sm:$0xff]  }
 0x322   :  { %5739 = vmatpush1.bf16.msra.mxu1 %v8551_v37  ;;  %v8614_v37 = vld [vmem:[#allocation5 + $0x14c8] ss:$16 sps:$4 sm:$0xff]  }
 0x323   :  { %5309 = vmatpush1.bf16.msra.mxu0 %v8548_v36  ;;  %5740 = vmatprep.subr.bf16.mxu1 %v8559_v40  ;;  %v8712_v36 = vld [vmem:[#allocation8 + $0x64] ss:$8 sps:$4 sm:$0xff]   ;;  %v8710_v40 = vld [vmem:[#allocation8 + $0x60] ss:$8 sps:$4 sm:$0xff]  }
 0x324   :  { %5310 = vmatprep.subr.bf16.mxu0 %v8556_v39  ;;  %v8619_v39 = vld [vmem:[#allocation5 + $0x14ec] ss:$16 sps:$4 sm:$0xff]  }
 0x326   :  { %5741 = vmatpush1.bf16.msra.mxu1 %v8557_v55  ;;  %v8617_v55 = vld [vmem:[#allocation5 + $0x14e8] ss:$16 sps:$4 sm:$0xff]  }
 0x327   :  { %5311 = vmatpush1.bf16.msra.mxu0 %v8554_v41  ;;  %5742 = vmatprep.subr.bf16.mxu1 %v8565_v45  ;;  %v8715_v41 = vld [vmem:[#allocation8 + $0x74] ss:$8 sps:$4 sm:$0xff]   ;;  %v8713_v45 = vld [vmem:[#allocation8 + $0x70] ss:$8 sps:$4 sm:$0xff]  }
 0x328   :  { %5312 = vmatprep.subr.bf16.mxu0 %v8562_v43  ;;  %v8622_v43 = vld [vmem:[#allocation5 + $0x150c] ss:$16 sps:$4 sm:$0xff]  }
 0x32a   :  { %5743 = vmatpush1.bf16.msra.mxu1 %v8563_v46  ;;  %v8620_v46 = vld [vmem:[#allocation5 + $0x1508] ss:$16 sps:$4 sm:$0xff]  }
 0x32b   :  { %5313 = vmatpush1.bf16.msra.mxu0 %v8560_v15  ;;  %5744 = vmatprep.subr.bf16.mxu1 %v8571_v49  ;;  %v8718_v15 = vld [vmem:[#allocation8 + $0x84] ss:$8 sps:$4 sm:$0xff]   ;;  %v8716_v49 = vld [vmem:[#allocation8 + $0x80] ss:$8 sps:$4 sm:$0xff]  }
 0x32c   :  { %5314 = vmatprep.subr.bf16.mxu0 %v8568_v6  ;;  %v8625_v6 = vld [vmem:[#allocation5 + $0x152c] ss:$16 sps:$4 sm:$0xff]  }
 0x32e   :  { %5745 = vmatpush1.bf16.msra.mxu1 %v8569_v44  ;;  %v8623_v44 = vld [vmem:[#allocation5 + $0x1528] ss:$16 sps:$4 sm:$0xff]  }
 0x32f   :  { %5315 = vmatpush1.bf16.msra.mxu0 %v8566_v50  ;;  %5746 = vmatprep.subr.bf16.mxu1 %v8577_v52  ;;  %v8721_v50 = vld [vmem:[#allocation8 + $0x94] ss:$8 sps:$4 sm:$0xff]   ;;  %v8719_v52 = vld [vmem:[#allocation8 + $0x90] ss:$8 sps:$4 sm:$0xff]  }
 0x330   :  { %5316 = vmatprep.subr.bf16.mxu0 %v8574_v51  ;;  %v8628_v51 = vld [vmem:[#allocation5 + $0x154c] ss:$16 sps:$4 sm:$0xff]  }
 0x332   :  { %5747 = vmatpush1.bf16.msra.mxu1 %v8575_v24  ;;  %v8626_v24 = vld [vmem:[#allocation5 + $0x1548] ss:$16 sps:$4 sm:$0xff]  }
 0x333   :  { %5317 = vmatpush1.bf16.msra.mxu0 %v8572_v53  ;;  %5748 = vmatprep.subr.bf16.mxu1 %v8583_v57  ;;  %v8724_v53 = vld [vmem:[#allocation8 + $0xa4] ss:$8 sps:$4 sm:$0xff]   ;;  %v8722_v57 = vld [vmem:[#allocation8 + $0xa0] ss:$8 sps:$4 sm:$0xff]  }
 0x334   :  { %5318 = vmatprep.subr.bf16.mxu0 %v8580_v56  ;;  %v8631_v56 = vld [vmem:[#allocation5 + $0x156c] ss:$16 sps:$4 sm:$0xff]  }
 0x336   :  { %5749 = vmatpush1.bf16.msra.mxu1 %v8581_v59  ;;  %v8629_v59 = vld [vmem:[#allocation5 + $0x1568] ss:$16 sps:$4 sm:$0xff]  }
 0x337   :  { %5319 = vmatpush1.bf16.msra.mxu0 %v8578_v58  ;;  %5750 = vmatprep.subr.bf16.mxu1 %v8589_v61  ;;  %v8727_v58 = vld [vmem:[#allocation8 + $0xb4] ss:$8 sps:$4 sm:$0xff]   ;;  %v8725_v61 = vld [vmem:[#allocation8 + $0xb0] ss:$8 sps:$4 sm:$0xff]  }
 0x338   :  { %5320 = vmatprep.subr.bf16.mxu0 %v8586_v21  ;;  %v8634_v21 = vld [vmem:[#allocation5 + $0x158c] ss:$16 sps:$4 sm:$0xff]  }
 0x33a   :  { %5751 = vmatpush1.bf16.msra.mxu1 %v8587_v63  ;;  %v8632_v63 = vld [vmem:[#allocation5 + $0x1588] ss:$16 sps:$4 sm:$0xff]  }
 0x33b   :  { %5321 = vmatpush1.bf16.msra.mxu0 %v8584_v62  ;;  %5752 = vmatprep.subr.bf16.mxu1 %v8595_v1  ;;  %v8730_v62 = vld [vmem:[#allocation8 + $0xc4] ss:$8 sps:$4 sm:$0xff]   ;;  %v8728_v1 = vld [vmem:[#allocation8 + $0xc0] ss:$8 sps:$4 sm:$0xff]  }
 0x33c   :  { %5322 = vmatprep.subr.bf16.mxu0 %v8592_v0  ;;  %v8637_v0 = vld [vmem:[#allocation5 + $0x15ac] ss:$16 sps:$4 sm:$0xff]  }
 0x33e   :  { %5753 = vmatpush1.bf16.msra.mxu1 %v8593_v34  ;;  %v8635_v34 = vld [vmem:[#allocation5 + $0x15a8] ss:$16 sps:$4 sm:$0xff]  }
 0x33f   :  { %5323 = vmatpush1.bf16.msra.mxu0 %v8590_v4  ;;  %5765 = vmatprep.subr.bf16.mxu1 %v8598_v10  ;;  %v8733_v4 = vld [vmem:[#allocation8 + $0xd4] ss:$8 sps:$4 sm:$0xff]  }
 0x340   :  { %6259 = vmatprep.subr.bf16.mxu0 %v8694_v16  ;;  %v8638_v10 = vld [vmem:[#allocation5 + $0x15c8] ss:$16 sps:$4 sm:$0xff]  }
 0x341   :  { %5755 = vmatmul.mubr.bf16.vlgmr.msra.gmra.mrb[4].mxu1 %v9213_v48  ;;  %v8698_v48 = vld [vmem:[#allocation8 + $0x20] ss:$8 sps:$4 sm:$0xff]   ;;  %v8644_v16 = vld [vmem:[#allocation5 + $0x1608] ss:$16 sps:$4 sm:$0xff]  }
 0x342   :  { %5325 = vmatmul.mubr.bf16.vlgmr.msra.gmra.mrb[0].mxu0 %v9229_v11  ;;  %5766 = vmatpush1.bf16.msra.mxu1 %v8596_v13  ;;  %v8643_v13 = vld [vmem:[#allocation5 + $0x15ec] ss:$16 sps:$4 sm:$0xff]  }
 0x343   :  { %5797 = vmatprep.mubr.bf16.mxu1 %v9215_v38  ;;  %5767 = vmatprep.subr.bf16.mxu1 %v8601_v12  ;;  %v8610_v38 = vld [vmem:[#allocation5 + $0x148c] ss:$16 sps:$4 sm:$0xff]   ;;  %v8641_v12 = vld [vmem:[#allocation5 + $0x15e8] ss:$16 sps:$4 sm:$0xff]  }
 0x344   :  { %6260 = vmatpush1.bf16.msra.mxu0 %v8692_v14  ;;  %v8646_v14 = vld [vmem:[#allocation5 + $0x160c] ss:$16 sps:$4 sm:$0xff]  }
 0x345   :  { %6261 = vmatprep.subr.bf16.mxu0 %v8697_v18  ;;  %v8647_v18 = vld [vmem:[#allocation5 + $0x1628] ss:$16 sps:$4 sm:$0xff]  }
 0x346   :  { %5768 = vmatpush1.bf16.msra.mxu1 %v8599_v17  ;;  %v8649_v17 = vld [vmem:[#allocation5 + $0x162c] ss:$16 sps:$4 sm:$0xff]  }
 0x347   :  { %5769 = vmatprep.subr.bf16.mxu1 %v8604_v19  ;;  %v8652_v19 = vld [vmem:[#allocation5 + $0x164c] ss:$16 sps:$4 sm:$0xff]  }
 0x348   :  { %6262 = vmatpush1.bf16.msra.mxu0 %v8695_v33  ;;  %v8650_v33 = vld [vmem:[#allocation5 + $0x1648] ss:$16 sps:$4 sm:$0xff]  }
 0x349   :  { %6263 = vmatprep.subr.bf16.mxu0 %v8700_v20  ;;  %v8655_v20 = vld [vmem:[#allocation5 + $0x166c] ss:$16 sps:$4 sm:$0xff]  }
 0x34a   :  { %5770 = vmatpush1.bf16.msra.mxu1 %v8602_v42  ;;  %v8653_v42 = vld [vmem:[#allocation5 + $0x1668] ss:$16 sps:$4 sm:$0xff]  }
 0x34b   :  { %5771 = vmatprep.subr.bf16.mxu1 %v8607_v22  ;;  %v8658_v22 = vld [vmem:[#allocation5 + $0x168c] ss:$16 sps:$4 sm:$0xff]  }
 0x34c   :  { %6264 = vmatpush1.bf16.msra.mxu0 %v8698_v48  ;;  %v8656_v48 = vld [vmem:[#allocation5 + $0x1688] ss:$16 sps:$4 sm:$0xff]  }
 0x34d   :  { %6265 = vmatprep.subr.bf16.mxu0 %v8703_v23  ;;  %v8661_v23 = vld [vmem:[#allocation5 + $0x16ac] ss:$16 sps:$4 sm:$0xff]  }
 0x34e   :  { %5772 = vmatpush1.bf16.msra.mxu1 %v8605_v25  ;;  %v8664_v25 = vld [vmem:[#allocation5 + $0x16cc] ss:$16 sps:$4 sm:$0xff]  }
 0x34f   :  { %5773 = vmatprep.subr.bf16.mxu1 %v8610_v38  ;;  %v8736_v38 = vld [vmem:[#allocation8 + $0xe4] ss:$8 sps:$4 sm:$0xff]  }
 0x350   :  { %6266 = vmatpush1.bf16.msra.mxu0 %v8701_v26  ;;  %v8734_v26 = vld [vmem:[#allocation8 + $0xe0] ss:$8 sps:$4 sm:$0xff]  }
 0x351   :  { %6267 = vmatprep.subr.bf16.mxu0 %v8706_v27  ;;  %v8667_v27 = vld [vmem:[#allocation5 + $0x16ec] ss:$16 sps:$4 sm:$0xff]  }
 0x352   :  { %5774 = vmatpush1.bf16.msra.mxu1 %v8608_v28  ;;  %v8739_v28 = vld [vmem:[#allocation8 + $0xf4] ss:$8 sps:$4 sm:$0xff]  }
 0x353   :  { %5775 = vmatprep.subr.bf16.mxu1 %v8613_v29  ;;  %v8665_v29 = vld [vmem:[#allocation5 + $0x16e8] ss:$16 sps:$4 sm:$0xff]  }
 0x354   :  { %6268 = vmatpush1.bf16.msra.mxu0 %v8704_v30  ;;  %v8737_v30 = vld [vmem:[#allocation8 + $0xf0] ss:$8 sps:$4 sm:$0xff]  }
 0x355   :  { %6269 = vmatprep.subr.bf16.mxu0 %v8709_v31  ;;  %v8670_v31 = vld [vmem:[#allocation5 + $0x170c] ss:$16 sps:$4 sm:$0xff]  }
 0x356   :  { %5776 = vmatpush1.bf16.msra.mxu1 %v8611_v32  ;;  %v8668_v32 = vld [vmem:[#allocation5 + $0x1708] ss:$16 sps:$4 sm:$0xff]  }
 0x357   :  { %5777 = vmatprep.subr.bf16.mxu1 %v8616_v35  ;;  %v8673_v35 = vld [vmem:[#allocation5 + $0x172c] ss:$16 sps:$4 sm:$0xff]  }
 0x358   :  { %6270 = vmatpush1.bf16.msra.mxu0 %v8707_v54  ;;  %v8742_v54 = vld [vmem:[#allocation8 + $0x104] ss:$8 sps:$4 sm:$0xff]  }
 0x359   :  { %6271 = vmatprep.subr.bf16.mxu0 %v8712_v36  ;;  %v8671_v36 = vld [vmem:[#allocation5 + $0x1728] ss:$16 sps:$4 sm:$0xff]  }
 0x35a   :  { %5778 = vmatpush1.bf16.msra.mxu1 %v8614_v37  ;;  %v8676_v37 = vld [vmem:[#allocation5 + $0x174c] ss:$16 sps:$4 sm:$0xff]  }
 0x35b   :  { %5779 = vmatprep.subr.bf16.mxu1 %v8619_v39  ;;  %v8674_v39 = vld [vmem:[#allocation5 + $0x1748] ss:$16 sps:$4 sm:$0xff]  }
 0x35c   :  { %6272 = vmatpush1.bf16.msra.mxu0 %v8710_v40  ;;  %v8679_v40 = vld [vmem:[#allocation5 + $0x176c] ss:$16 sps:$4 sm:$0xff]  }
 0x35d   :  { %6273 = vmatprep.subr.bf16.mxu0 %v8715_v41  ;;  %v8677_v41 = vld [vmem:[#allocation5 + $0x1768] ss:$16 sps:$4 sm:$0xff]  }
 0x35e   :  { %5780 = vmatpush1.bf16.msra.mxu1 %v8617_v55  ;;  %v8682_v55 = vld [vmem:[#allocation5 + $0x178c] ss:$16 sps:$4 sm:$0xff]  }
 0x35f   :  { %5781 = vmatprep.subr.bf16.mxu1 %v8622_v43  ;;  %v8680_v43 = vld [vmem:[#allocation5 + $0x1788] ss:$16 sps:$4 sm:$0xff]  }
 0x360   :  { %6274 = vmatpush1.bf16.msra.mxu0 %v8713_v45  ;;  %v8685_v45 = vld [vmem:[#allocation5 + $0x17ac] ss:$16 sps:$4 sm:$0xff]  }
 0x361   :  { %6275 = vmatprep.subr.bf16.mxu0 %v8718_v15  ;;  %v8683_v15 = vld [vmem:[#allocation5 + $0x17a8] ss:$16 sps:$4 sm:$0xff]  }
 0x362   :  { %5782 = vmatpush1.bf16.msra.mxu1 %v8620_v46  ;;  %v8688_v46 = vld [vmem:[#allocation5 + $0x17cc] ss:$16 sps:$4 sm:$0xff]  }
 0x363   :  { %5783 = vmatprep.subr.bf16.mxu1 %v8625_v6  ;;  %v8686_v6 = vld [vmem:[#allocation5 + $0x17c8] ss:$16 sps:$4 sm:$0xff]  }
 0x364   :  { %6276 = vmatpush1.bf16.msra.mxu0 %v8716_v49  ;;  %v8691_v49 = vld [vmem:[#allocation5 + $0x17ec] ss:$16 sps:$4 sm:$0xff]  }
 0x365   :  { %6277 = vmatprep.subr.bf16.mxu0 %v8721_v50  ;;  %v8689_v50 = vld [vmem:[#allocation5 + $0x17e8] ss:$16 sps:$4 sm:$0xff]  }
 0x366   :  { %5784 = vmatpush1.bf16.msra.mxu1 %v8623_v44  ;;  %v959_v44 = vlaneseq }
 0x367   :  { %5785 = vmatprep.subr.bf16.mxu1 %v8628_v51 }
 0x368   :  { %6278 = vmatpush1.bf16.msra.mxu0 %v8719_v52  ;;  %v9237_v51 = vshrl.u32 %v959_v44, 7  ;;  %v8782_v44 = vld [vmem:[#allocation8 + $0x1e0] ss:$8 sps:$4 sm:$0xff]  }
 0x369   :  { %6279 = vmatprep.subr.bf16.mxu0 %v8724_v53  ;;  %v9240_v53 = vld [vmem:[#allocation7] sm:$0xf] }
 0x36a   :  { %5786 = vmatpush1.bf16.msra.mxu1 %v8626_v24  ;;  %v961_v52 = vsub.s32 0, %v9237_v51  ;;  %v965_v24 = vsub.s32 1, %v9237_v51 }
 0x36b   :  { %5787 = vmatprep.subr.bf16.mxu1 %v8631_v56 }
 0x36c   :  { %6280 = vmatpush1.bf16.msra.mxu0 %v8722_v57  ;;  %v962_v56 = vrot.slane %v9240_v53, %v961_v52  ;;  %v966_v57 = vrot.slane %v9240_v53, %v965_v24 }
 0x36d   :  { %6281 = vmatprep.subr.bf16.mxu0 %v8727_v58 }
 0x36e   :  { %5788 = vmatpush1.bf16.msra.mxu1 %v8629_v59  ;;  %v4854_v58 = vadd.f32 %v9173_v2, %v962_v56 }
 0x36f   :  { %5789 = vmatprep.subr.bf16.mxu1 %v8634_v21  ;;  %v4858_v21 = vadd.f32 %v9177_v5, %v962_v56  ;;  %v8788_v5 = vld [vmem:[#allocation11 + $0x40] sm:$0xff]   ;;  %v8787_v56 = vld [vmem:[#allocation8 + $0x1f4] ss:$8 sps:$4 sm:$0xff]  }
 0x370   :  { %6282 = vmatpush1.bf16.msra.mxu0 %v8725_v61 }
 0x371   :  { %6283 = vmatprep.subr.bf16.mxu0 %v8730_v62 }
 0x372   :  { %5790 = vmatpush1.bf16.msra.mxu1 %v8632_v63  ;;  %v4860_v63 = vadd.f32 %v9179_v7, %v966_v57  ;;  %v8743_v7 = vld [vmem:[#allocation8 + $0x110] ss:$8 sps:$4 sm:$0xff]  }
 0x373   :  { %5791 = vmatprep.subr.bf16.mxu1 %v8637_v0 }
 0x374   :  { %6284 = vmatpush1.bf16.msra.mxu0 %v8728_v1 }
 0x375   :  { %6285 = vmatprep.subr.bf16.mxu0 %v8733_v4 }
 0x376   :  { %5792 = vmatpush1.bf16.msra.mxu1 %v8635_v34 }
 0x377   :  { %5793 = vmatprep.subr.bf16.mxu1 %v8640_v8 }
 0x378   :  { %6286 = vmatpush1.bf16.msra.mxu0 %v8731_v9 }
 0x379   :  { %6287 = vmatprep.subr.bf16.mxu0 %v8736_v38  ;;  %v8795_v38 = vld [vmem:[#allocation11 + $0x18] sm:$0xff]  }
 0x37a   :  { %5794 = vmatpush1.bf16.msra.mxu1 %v8638_v10 }
 0x37b   :  { %5795 = vmatprep.subr.bf16.mxu1 %v8643_v13 }
 0x37c   :  { %6288 = vmatpush1.bf16.msra.mxu0 %v8734_v26  ;;  %v8752_v26 = vld [vmem:[#allocation8 + $0x140] ss:$8 sps:$4 sm:$0xff]  }
 0x37d   :  { %6289 = vmatprep.subr.bf16.mxu0 %v8739_v28  ;;  %v8797_v28 = vld [vmem:[#allocation11 + $0x20] sm:$0xff]  }
 0x37e   :  { %5796 = vmatpush1.bf16.msra.mxu1 %v8641_v12 }
 0x37f   :  { %5808 = vmatprep.subr.bf16.mxu1 %v8646_v14 }
 0x380   :  { %6290 = vmatpush1.bf16.msra.mxu0 %v8737_v30  ;;  %v8755_v30 = vld [vmem:[#allocation8 + $0x150] ss:$8 sps:$4 sm:$0xff]  }
 0x381   :  { %5798 = vmatmul.mubr.bf16.vlgmr.msra.gmra.mrb[4].mxu1 %v9221_v60  ;;  %v8659_v60 = vld [vmem:[#allocation5 + $0x16a8] ss:$16 sps:$4 sm:$0xff]   ;;  %6302 = vmatprep.subr.bf16.mxu0 %v8742_v54  ;;  %v8761_v54 = vld [vmem:[#allocation8 + $0x170] ss:$8 sps:$4 sm:$0xff]  }
 0x382   :  { %5809 = vmatpush1.bf16.msra.mxu1 %v8644_v16  ;;  %5840 = vmatprep.mubr.bf16.mxu1 %v9223_v47  ;;  %v8662_v47 = vld [vmem:[#allocation5 + $0x16c8] ss:$16 sps:$4 sm:$0xff]   ;;  %v8740_v16 = vld [vmem:[#allocation8 + $0x100] ss:$8 sps:$4 sm:$0xff]  }
 0x383   :  { %5810 = vmatprep.subr.bf16.mxu1 %v8649_v17  ;;  %v8789_v17 = vld [vmem:[#allocation11] sm:$0xff]  }
 0x386   :  { %5811 = vmatpush1.bf16.msra.mxu1 %v8647_v18  ;;  %v8790_v18 = vld [vmem:[#allocation11 + $0x48] sm:$0xff]  }
 0x387   :  { %5812 = vmatprep.subr.bf16.mxu1 %v8652_v19  ;;  %v8748_v19 = vld [vmem:[#allocation8 + $0x124] ss:$8 sps:$4 sm:$0xff]  }
 0x38a   :  { %5813 = vmatpush1.bf16.msra.mxu1 %v8650_v33  ;;  %v8791_v33 = vld [vmem:[#allocation11 + $0x8] sm:$0xff]  }
 0x38b   :  { %5814 = vmatprep.subr.bf16.mxu1 %v8655_v20  ;;  %v8792_v20 = vld [vmem:[#allocation11 + $0x50] sm:$0xff]  }
 0x38e   :  { %5815 = vmatpush1.bf16.msra.mxu1 %v8653_v42  ;;  %v8746_v42 = vld [vmem:[#allocation8 + $0x120] ss:$8 sps:$4 sm:$0xff]  }
 0x38f   :  { %5816 = vmatprep.subr.bf16.mxu1 %v8658_v22  ;;  %v8751_v22 = vld [vmem:[#allocation8 + $0x134] ss:$8 sps:$4 sm:$0xff]  }
 0x392   :  { %5817 = vmatpush1.bf16.msra.mxu1 %v8656_v48  ;;  %v8793_v48 = vld [vmem:[#allocation11 + $0x10] sm:$0xff]  }
 0x393   :  { %5818 = vmatprep.subr.bf16.mxu1 %v8661_v23  ;;  %v8794_v23 = vld [vmem:[#allocation11 + $0x58] sm:$0xff]  }
 0x396   :  { %5819 = vmatpush1.bf16.msra.mxu1 %v8659_v60  ;;  %v8749_v60 = vld [vmem:[#allocation8 + $0x130] ss:$8 sps:$4 sm:$0xff]  }
 0x397   :  { %5820 = vmatprep.subr.bf16.mxu1 %v8664_v25  ;;  %v8754_v25 = vld [vmem:[#allocation8 + $0x144] ss:$8 sps:$4 sm:$0xff]  }
 0x39a   :  { %5821 = vmatpush1.bf16.msra.mxu1 %v8662_v47  ;;  %v8796_v47 = vld [vmem:[#allocation11 + $0x60] sm:$0xff]  }
 0x39b   :  { %5822 = vmatprep.subr.bf16.mxu1 %v8667_v27  ;;  %v8757_v27 = vld [vmem:[#allocation8 + $0x154] ss:$8 sps:$4 sm:$0xff]  }
 0x39e   :  { %5823 = vmatpush1.bf16.msra.mxu1 %v8665_v29  ;;  %v8798_v29 = vld [vmem:[#allocation11 + $0x68] sm:$0xff]  }
 0x39f   :  { %5824 = vmatprep.subr.bf16.mxu1 %v8670_v31  ;;  %v8760_v31 = vld [vmem:[#allocation8 + $0x164] ss:$8 sps:$4 sm:$0xff]  }
 0x3a2   :  { %5825 = vmatpush1.bf16.msra.mxu1 %v8668_v32  ;;  %v8758_v32 = vld [vmem:[#allocation8 + $0x160] ss:$8 sps:$4 sm:$0xff]  }
 0x3a3   :  { %5826 = vmatprep.subr.bf16.mxu1 %v8673_v35  ;;  %v8763_v35 = vld [vmem:[#allocation8 + $0x174] ss:$8 sps:$4 sm:$0xff]  }
 0x3a6   :  { %5827 = vmatpush1.bf16.msra.mxu1 %v8671_v36  ;;  %v8766_v36 = vld [vmem:[#allocation8 + $0x184] ss:$8 sps:$4 sm:$0xff]  }
 0x3a7   :  { %5828 = vmatprep.subr.bf16.mxu1 %v8676_v37  ;;  %v8764_v37 = vld [vmem:[#allocation8 + $0x180] ss:$8 sps:$4 sm:$0xff]  }
 0x3aa   :  { %5829 = vmatpush1.bf16.msra.mxu1 %v8674_v39  ;;  %v8769_v39 = vld [vmem:[#allocation8 + $0x194] ss:$8 sps:$4 sm:$0xff]  }
 0x3ab   :  { %5830 = vmatprep.subr.bf16.mxu1 %v8679_v40  ;;  %v8767_v40 = vld [vmem:[#allocation8 + $0x190] ss:$8 sps:$4 sm:$0xff]  }
 0x3ae   :  { %5831 = vmatpush1.bf16.msra.mxu1 %v8677_v41  ;;  %v8772_v41 = vld [vmem:[#allocation8 + $0x1a4] ss:$8 sps:$4 sm:$0xff]  }
 0x3af   :  { %5832 = vmatprep.subr.bf16.mxu1 %v8682_v55  ;;  %v8770_v55 = vld [vmem:[#allocation8 + $0x1a0] ss:$8 sps:$4 sm:$0xff]  }
 0x3b2   :  { %5833 = vmatpush1.bf16.msra.mxu1 %v8680_v43  ;;  %v8775_v43 = vld [vmem:[#allocation8 + $0x1b4] ss:$8 sps:$4 sm:$0xff]  }
 0x3b3   :  { %5834 = vmatprep.subr.bf16.mxu1 %v8685_v45  ;;  %v8773_v45 = vld [vmem:[#allocation8 + $0x1b0] ss:$8 sps:$4 sm:$0xff]  }
 0x3b6   :  { %5835 = vmatpush1.bf16.msra.mxu1 %v8683_v15  ;;  %v8778_v15 = vld [vmem:[#allocation8 + $0x1c4] ss:$8 sps:$4 sm:$0xff]  }
 0x3b7   :  { %5836 = vmatprep.subr.bf16.mxu1 %v8688_v46  ;;  %v8776_v46 = vld [vmem:[#allocation8 + $0x1c0] ss:$8 sps:$4 sm:$0xff]  }
 0x3ba   :  { %5837 = vmatpush1.bf16.msra.mxu1 %v8686_v6  ;;  %v8781_v6 = vld [vmem:[#allocation8 + $0x1d4] ss:$8 sps:$4 sm:$0xff]  }
 0x3bb   :  { %5838 = vmatprep.subr.bf16.mxu1 %v8691_v49  ;;  %v8779_v49 = vld [vmem:[#allocation8 + $0x1d0] ss:$8 sps:$4 sm:$0xff]  }
 0x3be   :  { %5839 = vmatpush1.bf16.msra.mxu1 %v8689_v50  ;;  %v8784_v50 = vld [vmem:[#allocation8 + $0x1e4] ss:$8 sps:$4 sm:$0xff]  }
 0x3bf   :  { %7398 = vmatprep.subr.bf16.mxu1 %v8788_v5  ;;  %v8802_v5 = vld [vmem:[#allocation11 + $0x78] sm:$0xff]  }
 0x3c1   :  { %5841 = vmatmul.mubr.bf16.vlgmr.msra.gmra.mrb[4].mxu1 %v9229_v11  ;;  %v4856_v11 = vadd.f32 %v9175_v3, %v966_v57  ;;  %v8745_v3 = vld [vmem:[#allocation8 + $0x114] ss:$8 sps:$4 sm:$0xff]   ;;  %v8785_v57 = vld [vmem:[#allocation8 + $0x1f0] ss:$8 sps:$4 sm:$0xff]  }
 0x3c2   :  { %7399 = vmatpush3.bf16.msra.mxu1 %v8789_v17  ;;  %v8803_v17 = vld [vmem:[#allocation11 + $0x38] sm:$0xff]  }
 0x3c3   :  { %7400 = vmatprep.subr.bf16.mxu1 %v8790_v18  ;;  %v5927_v18 = vld [vmem:[#allocation10] sm:$0x3] }
 0x3c6   :  { %7401 = vmatpush3.bf16.msra.mxu1 %v8791_v33 }
 0x3c7   :  { %7402 = vmatprep.subr.bf16.mxu1 %v8792_v20 }
 0x3ca   :  { %7403 = vmatpush3.bf16.msra.mxu1 %v8793_v48 }
 0x3cb   :  { %7404 = vmatprep.subr.bf16.mxu1 %v8794_v23 }
 0x3ce   :  { %7405 = vmatpush3.bf16.msra.mxu1 %v8795_v38 }
 0x3cf   :  { %7406 = vmatprep.subr.bf16.mxu1 %v8796_v47 }
 0x3d2   :  { %7407 = vmatpush3.bf16.msra.mxu1 %v8797_v28 }
 0x3d3   :  { %7408 = vmatprep.subr.bf16.mxu1 %v8798_v29 }
 0x415   :  { %v5326_v59 = vpop.f32.mrb[0].mxu0 }
 0x416   :  { %v7421_v61 = vadd.f32 %v5326_v59, %v4854_v58  ;;  %v5328_v62 = vpop.f32.mrb[1].mxu0  ;;  %v969_v58 = vsub.s32 2, %v9237_v51 }
 0x417   :  { %v7423_v0 = vadd.f32 %v5328_v62, %v4856_v11  ;;  %v5330_v1 = vpop.f32.mrb[2].mxu0  ;;  %v973_v11 = vsub.s32 3, %v9237_v51 }
 0x418   :  { %v7425_v4 = vadd.f32 %v5330_v1, %v4858_v21  ;;  %v5332_v34 = vpop.f32.mrb[3].mxu0  ;;  %v5851_v9 = vmax.f32 %v7421_v61, 0.0  ;;  %v970_v59 = vrot.slane %v9240_v53, %v969_v58 }
 0x419   :  { %v7427_v8 = vadd.f32 %v5332_v34, %v4860_v63  ;;  %v5852_v13 = vmax.f32 %v7423_v0, 0.0  ;;  %v974_v21 = vrot.slane %v9240_v53, %v973_v11  ;;  %v8801_v53 = vld [vmem:[#allocation11 + $0x30] sm:$0xff]  }
 0x41a   :  { %v5855_v10 = vmax.f32 %v7425_v4, 0.0 }
 0x41b   :  { %v5856_v12 = vmax.f32 %v7427_v8, 0.0 }
 0x41c   :  { %v5859_v14 = vpack.c.bf16 %v5855_v10, %v5851_v9 }
 0x41d   :  { %v5860_v2 = vpack.c.bf16 %v5856_v12, %v5852_v13 }
 0x41f   :  { %6291 = vmatprep.mubr.bf16.mxu0 %v5860_v2 }
 0x420   :  { %6292 = vmatmul.mubr.bf16.vlgmr.msra.gmra.mrb[4].mxu0 %v5859_v14 }
 0x421   :  { %6303 = vmatpush1.bf16.msra.mxu0 %v8740_v16  ;;  %v8799_v16 = vld [vmem:[#allocation11 + $0x28] sm:$0xff]  }
 0x422   :  { %6304 = vmatprep.subr.bf16.mxu0 %v8745_v3  ;;  %7409 = vmatpush3.bf16.msra.mxu1 %v8799_v16  ;;  %v8800_v3 = vld [vmem:[#allocation11 + $0x70] sm:$0xff]  }
 0x423   :  { %7410 = vmatprep.subr.bf16.mxu1 %v8800_v3 }
 0x425   :  { %6305 = vmatpush1.bf16.msra.mxu0 %v8743_v7  ;;  %v5932_v7 = vrot.slane %v5927_v18, %v961_v52 }
 0x426   :  { %6306 = vmatprep.subr.bf16.mxu0 %v8748_v19  ;;  %7411 = vmatpush3.bf16.msra.mxu1 %v8801_v53  ;;  %v5936_v19 = vrot.slane %v5927_v18, %v965_v24 }
 0x427   :  { %7412 = vmatprep.subr.bf16.mxu1 %v8802_v5 }
 0x429   :  { %6307 = vmatpush1.bf16.msra.mxu0 %v8746_v42 }
 0x42a   :  { %6308 = vmatprep.subr.bf16.mxu0 %v8751_v22  ;;  %7413 = vmatpush3.bf16.msra.mxu1 %v8803_v17 }
 0x42d   :  { %6309 = vmatpush1.bf16.msra.mxu0 %v8749_v60 }
 0x42e   :  { %6310 = vmatprep.subr.bf16.mxu0 %v8754_v25 }
 0x431   :  { %6311 = vmatpush1.bf16.msra.mxu0 %v8752_v26 }
 0x432   :  { %6312 = vmatprep.subr.bf16.mxu0 %v8757_v27 }
 0x435   :  { %6313 = vmatpush1.bf16.msra.mxu0 %v8755_v30  ;;  %v7381_v30 = vld [vmem:[#allocation13] ss:$0 sm:$0xff] }
 0x436   :  { %6314 = vmatprep.subr.bf16.mxu0 %v8760_v31 }
 0x439   :  { %6315 = vmatpush1.bf16.msra.mxu0 %v8758_v32 }
 0x43a   :  { %6316 = vmatprep.subr.bf16.mxu0 %v8763_v35 }
 0x43d   :  { %6317 = vmatpush1.bf16.msra.mxu0 %v8761_v54 }
 0x43e   :  { %6318 = vmatprep.subr.bf16.mxu0 %v8766_v36 }
 0x441   :  { %6319 = vmatpush1.bf16.msra.mxu0 %v8764_v37 }
 0x442   :  { %6320 = vmatprep.subr.bf16.mxu0 %v8769_v39 }
 0x445   :  { %6321 = vmatpush1.bf16.msra.mxu0 %v8767_v40 }
 0x446   :  { %6322 = vmatprep.subr.bf16.mxu0 %v8772_v41 }
 0x449   :  { %6323 = vmatpush1.bf16.msra.mxu0 %v8770_v55 }
 0x44a   :  { %6324 = vmatprep.subr.bf16.mxu0 %v8775_v43 }
 0x44d   :  { %6325 = vmatpush1.bf16.msra.mxu0 %v8773_v45 }
 0x44e   :  { %6326 = vmatprep.subr.bf16.mxu0 %v8778_v15 }
 0x451   :  { %6327 = vmatpush1.bf16.msra.mxu0 %v8776_v46 }
 0x452   :  { %6328 = vmatprep.subr.bf16.mxu0 %v8781_v6 }
 0x455   :  { %6329 = vmatpush1.bf16.msra.mxu0 %v8779_v49 }
 0x456   :  { %6330 = vmatprep.subr.bf16.mxu0 %v8784_v50 }
 0x459   :  { %6331 = vmatpush1.bf16.msra.mxu0 %v8782_v44 }
 0x45a   :  { %6332 = vmatprep.subr.bf16.mxu0 %v8787_v56 }
 0x45d   :  { %6333 = vmatpush1.bf16.msra.mxu0 %v8785_v57 }
 0x494   :  { %v5842_v61 = vpop.f32.mrb[4].mxu1 }
 0x495   :  { %v7428_v62 = vadd.f32 %v5842_v61, %v970_v59  ;;  %v5844_v63 = vpop.f32.mrb[5].mxu1 }
 0x496   :  { %v7429_v0 = vadd.f32 %v5844_v63, %v974_v21  ;;  %v5846_v1 = vpop.f32.mrb[6].mxu1 }
 0x497   :  { %v7430_v4 = vadd.f32 %v5846_v1, %v970_v59  ;;  %v5848_v34 = vpop.f32.mrb[7].mxu1  ;;  %v5853_v9 = vmax.f32 %v7428_v62, 0.0 }
 0x498   :  { %v7431_v8 = vadd.f32 %v5848_v34, %v974_v21  ;;  %v5854_v13 = vmax.f32 %v7429_v0, 0.0 }
 0x499   :  { %v5857_v10 = vmax.f32 %v7430_v4, 0.0 }
 0x49a   :  { %v5858_v12 = vmax.f32 %v7431_v8, 0.0 }
 0x49b   :  { %v5861_v14 = vpack.c.bf16 %v5857_v10, %v5853_v9 }
 0x49c   :  { %v5862_v2 = vpack.c.bf16 %v5858_v12, %v5854_v13 }
 0x49e   :  { %6334 = vmatprep.mubr.bf16.mxu0 %v5862_v2 }
 0x49f   :  { %6335 = vmatmul.mubr.bf16.vlgmr.msra.gmra.mrb[4].mxu0 %v5861_v14 }
 0x572   :  { %v6336_v33 = vpop.f32.mrb[4].mxu0 }
 0x573   :  { %v7432_v20 = vadd.f32 %v6336_v33, %v5932_v7  ;;  %v6338_v42 = vpop.f32.mrb[5].mxu0 }
 0x574   :  { %v7433_v22 = vadd.f32 %v6338_v42, %v5936_v19  ;;  %v6340_v48 = vpop.f32.mrb[6].mxu0 }
 0x575   :  { %v7434_v23 = vadd.f32 %v6340_v48, %v5932_v7  ;;  %v6342_v60 = vpop.f32.mrb[7].mxu0  ;;  %v6345_v38 = vmax.f32 %v7432_v20, 0.0 }
 0x576   :  { %v7435_v25 = vadd.f32 %v6342_v60, %v5936_v19  ;;  %v6346_v26 = vmax.f32 %v7433_v22, 0.0 }
 0x577   :  { %v6347_v47 = vmax.f32 %v7434_v23, 0.0 }
 0x578   :  { %v6348_v27 = vmax.f32 %v7435_v25, 0.0 }
 0x579   :  { %v6349_v28 = vpack.c.bf16 %v6347_v47, %v6345_v38 }
 0x57a   :  { %v6350_v29 = vpack.c.bf16 %v6348_v27, %v6346_v26 }
 0x57c   :  { %6518 = vmatprep.mubr.bf16.mxu1 %v6350_v29 }
 0x57d   :  { %6519 = vmatmul.mubr.bf16.vlgmr.msra.gmra.mrb[8].mxu1 %v6349_v28 }
 0x650   :  { %v7414_v52 = vpop.f32.mrb[8].mxu1 }
 0x651   :  { %v7415_v51 = vpop.f32.mrb[9].mxu1 }
 0x652   :  { %v7416_v24 = vadd.f32 %v7415_v51, %v7414_v52  ;;  %v7417_v31 = vpop.f32.mrb[10].mxu1 }
 0x653   :  { %v7418_v32 = vpop.f32.mrb[11].mxu1 }
 0x654   :  { %v6521_v35 = vadd.f32 %v7416_v24, %v7381_v30  ;;  %v7419_v54 = vadd.f32 %v7418_v32, %v7417_v31 }
 0x656   :  { %6527 = vst [vmem:[#allocation14] sm:$0xff] %v6521_v35  ;;  %v6524_v36 = vadd.f32 %v7419_v54, %v7381_v30 }
 0x658   :  { %6528 = vst [vmem:[#allocation14 + $0x8] sm:$0xff] %v6524_v36 }
 0x659   :  { %8969 = shalt.err (!%p8966_p4)
}
 0x65a   :  { %s8970_s21 = scalar_lea.hbm %s9283_s7, 256 }
 0x65b   :  { %p8971_p5 = scmp.ne.s32.totalorder %s9283_s7, %s8970_s21  ;;  %p8974_p6 = scmp.lt.u32.totalorder %s8970_s21, %s9283_s7 }
 0x65d   :  { %p8976_p7 = pnand %p8974_p6, %p8971_p5 }
 0x65f   :  { %8979 = shalt.err (!%p8976_p7)
}
 0x660   :  { %6540 = dma.vmem_to_hbm [thread:$0]  %s6535_s18, 256, %s9283_s7, [#allocation4], %s8994_s1, %s8994_s1, %s8995_s25  }
 0x661   :  { %8988 = dma.done.wait [#allocation4], 256  }
 0x662   :  { %8989 = vsyncadd [#allocation4], 4294967040 }
 0x663   :  { %6544 = vsyncpa [#allocation3], 1 }
 0x664   :  { %6545 = vsyncpa [#allocation6], 1 }
 0x665   :  { %6546 = vsyncpa [#allocation9], 1 }
 0x666   :  { %6547 = vsyncpa [#allocation12], 1 }
 0x667   :  { %6548 = vsyncpa [#allocation4], 1 }

</bundles_post_ra>
